<compile_context>
chip_gen: v5e
topology: v5e:2x2
jax: 0.10.0
libtpu: 0.0.40
codegen_flags: <defaults>
</compile_context>

<pallas_src>
import jax
import jax.numpy as jnp
import numpy as np
from jax.experimental import pallas as pl
from jax.experimental.pallas import tpu as pltpu

PL_PAD = 8  # left zero-padding columns of the wide layout (keeps offsets sublane aligned)


def _round_up(x, m):
    return ((x + m - 1) // m) * m


def _pick_chunk(mq):
    for c in (128, 64, 32, 16, 8):
        if mq % c == 0:
            return c
    return mq


# ----------------------------- Pallas kernels -----------------------------

def _make_conv3x3_kernel(mq, wq, cout, ch, pad_left):
    """3x3 conv on the wide/flattened layout + per-batch BN partial statistics.

    f_ref:     (R, Cin)       zero-padded, row-flattened image, f32
    w_ref:     (9, Cin, Cout) bf16 taps, k = dh*3 + dw
    mask_ref:  (Mq, Cout)     1.0 on valid columns (w < W), 0.0 on wide-layout garbage columns
    y_ref:     (Mq, Cout)     conv output (pre-BN), f32
    stats_ref: (1, 2, Cout)   [sum, sum_of_squares] over valid pixels of this image
    """
    shifts = [dh * wq + dw + (pad_left - 1) for dh in range(3) for dw in range(3)]

    def kernel(f_ref, w_ref, mask_ref, y_ref, stats_ref):
        ssum = jnp.zeros((1, cout), jnp.float32)
        ssq = jnp.zeros((1, cout), jnp.float32)
        for m0 in range(0, mq, ch):
            acc = jnp.zeros((ch, cout), jnp.float32)
            for k, s in enumerate(shifts):
                lhs = f_ref[m0 + s:m0 + s + ch, :].astype(jnp.bfloat16)
                acc = acc + jnp.dot(lhs, w_ref[k], preferred_element_type=jnp.float32)
            y_ref[m0:m0 + ch, :] = acc
            am = acc * mask_ref[m0:m0 + ch, :]
            ssum = ssum + jnp.sum(am, axis=0, keepdims=True)
            ssq = ssq + jnp.sum(am * acc, axis=0, keepdims=True)
        stats_ref[0, 0:1, :] = ssum
        stats_ref[0, 1:2, :] = ssq

    return kernel


def _make_bn_relu_repack_kernel(h, w, wq, pad_left):
    """BN+ReLU of conv1's output fused with re-packing into conv2's padded wide input."""

    def kernel(y_ref, sc_ref, sh_ref, f2_ref):
        # y_ref: (H, Wq, C); sc/sh: (1, 1, C); f2_ref: (H+3, Wq, C)
        z = jnp.maximum(y_ref[:, 0:w, :] * sc_ref[...] + sh_ref[...], 0.0)
        f2_ref[...] = jnp.zeros_like(f2_ref)
        f2_ref[1:h + 1, pad_left:pad_left + w, :] = z

    return kernel


def _make_bn_relu_skip_pool_kernel(h2, w2, wq2, c):
    """BN+ReLU of conv2's output fused with the 2x2 stride-2 max pool (writes skip + pooled).

    y_ref:    (H2, 2, Wq2, 2, C)  conv2 output, window dims split out by a free wrapper reshape
    skip_ref: (H2, 2, W2,  2, C)  BN+ReLU'd activations (garbage columns dropped)
    pool_ref: (H2, W2, C)         2x2 max-pooled activations
    Only integer + contiguous-slice ref indexing (no strided pl.ds -> interpret & Mosaic safe).
    """
    del wq2

    def kernel(y_ref, sc_ref, sh_ref, skip_ref, pool_ref):
        sc = sc_ref[...]   # (1, 1, C)
        sh = sh_ref[...]

        def act(r, s):
            v = y_ref[:, r, 0:w2, s, :]          # (H2, W2, C)
            return jnp.maximum(v * sc + sh, 0.0)

        z00 = act(0, 0)
        z01 = act(0, 1)
        z10 = act(1, 0)
        z11 = act(1, 1)

        skip_ref[:, 0, :, 0, :] = z00
        skip_ref[:, 0, :, 1, :] = z01
        skip_ref[:, 1, :, 0, :] = z10
        skip_ref[:, 1, :, 1, :] = z11

        pool_ref[...] = jnp.maximum(jnp.maximum(z00, z01), jnp.maximum(z10, z11))

    return kernel


def _matmul_bias_kernel(x_ref, w_ref, b_ref, o_ref):
    o_ref[...] = jnp.dot(x_ref[...].astype(jnp.bfloat16), w_ref[...],
                         preferred_element_type=jnp.float32) + b_ref[...]


# ----------------------------- wrappers -----------------------------

def conv3x3_bn_stats(f_flat, w9_bf16, mask, *, n, h, wq, cout):
    r = f_flat.shape[0] // n
    cin = f_flat.shape[1]
    mq = h * wq
    ch = _pick_chunk(mq)
    kernel = _make_conv3x3_kernel(mq, wq, cout, ch, PL_PAD)
    y, stats = pl.pallas_call(
        kernel,
        out_shape=(jax.ShapeDtypeStruct((n * mq, cout), jnp.float32),
                   jax.ShapeDtypeStruct((n, 2, cout), jnp.float32)),
        grid_spec=pltpu.PrefetchScalarGridSpec(
            num_scalar_prefetch=0,
            grid=(n,),
            in_specs=[pl.BlockSpec((r, cin), lambda b: (b, 0)),
                      pl.BlockSpec((9, cin, cout), lambda b: (0, 0, 0)),
                      pl.BlockSpec((mq, cout), lambda b: (0, 0))],
            out_specs=[pl.BlockSpec((mq, cout), lambda b: (b, 0)),
                       pl.BlockSpec((1, 2, cout), lambda b: (b, 0, 0))]),
        compiler_params=pltpu.CompilerParams(dimension_semantics=("parallel",)),
    )(f_flat, w9_bf16, mask)
    return y, stats


def bn_relu_repack(y_wide, scale, shift, *, n, h, w, wq):
    c = y_wide.shape[-1]
    y3 = y_wide.reshape(n * h, wq, c)                       # free row-major view
    kernel = _make_bn_relu_repack_kernel(h, w, wq, PL_PAD)
    f2 = pl.pallas_call(
        kernel,
        out_shape=jax.ShapeDtypeStruct((n * (h + 3), wq, c), jnp.float32),
        grid_spec=pltpu.PrefetchScalarGridSpec(
            num_scalar_prefetch=0,
            grid=(n,),
            in_specs=[pl.BlockSpec((h, wq, c), lambda b: (b, 0, 0)),
                      pl.BlockSpec((1, 1, c), lambda b: (0, 0, 0)),
                      pl.BlockSpec((1, 1, c), lambda b: (0, 0, 0))],
            out_specs=pl.BlockSpec((h + 3, wq, c), lambda b: (b, 0, 0))),
        compiler_params=pltpu.CompilerParams(dimension_semantics=("parallel",)),
    )(y3, scale.reshape(1, 1, c), shift.reshape(1, 1, c))
    return f2.reshape(n * (h + 3) * wq, c)


def bn_relu_skip_maxpool(y_wide, scale, shift, *, n, h, w, wq):
    c = y_wide.shape[-1]
    h2, w2 = h // 2, w // 2
    wq2 = wq // 2
    # Free row-major view: (b', r, j, s, c) <-> wide row (2*i + r)*Wq + 2*j + s of batch b.
    y5 = y_wide.reshape(n * h2, 2, wq2, 2, c)
    kernel = _make_bn_relu_skip_pool_kernel(h2, w2, wq2, c)
    skip5, pooled3 = pl.pallas_call(
        kernel,
        out_shape=(jax.ShapeDtypeStruct((n * h2, 2, w2, 2, c), jnp.float32),
                   jax.ShapeDtypeStruct((n * h2, w2, c), jnp.float32)),
        grid_spec=pltpu.PrefetchScalarGridSpec(
            num_scalar_prefetch=0,
            grid=(n,),
            in_specs=[pl.BlockSpec((h2, 2, wq2, 2, c), lambda b: (b, 0, 0, 0, 0)),
                      pl.BlockSpec((1, 1, c), lambda b: (0, 0, 0)),
                      pl.BlockSpec((1, 1, c), lambda b: (0, 0, 0))],
            out_specs=[pl.BlockSpec((h2, 2, w2, 2, c), lambda b: (b, 0, 0, 0, 0)),
                       pl.BlockSpec((h2, w2, c), lambda b: (b, 0, 0))]),
        compiler_params=pltpu.CompilerParams(dimension_semantics=("parallel",)),
    )(y5, scale.reshape(1, 1, c), shift.reshape(1, 1, c))
    return skip5.reshape(n, h, w, c), pooled3.reshape(n, h2, w2, c)


def matmul_bias(x, w_bf16, bias, tm=128):
    m, k = x.shape
    nout = w_bf16.shape[1]
    mp = _round_up(m, tm)
    xp = jnp.pad(x, ((0, mp - m), (0, 0)))
    out = pl.pallas_call(
        _matmul_bias_kernel,
        out_shape=jax.ShapeDtypeStruct((mp, nout), jnp.float32),
        grid_spec=pltpu.PrefetchScalarGridSpec(
            num_scalar_prefetch=0,
            grid=(mp // tm,),
            in_specs=[pl.BlockSpec((tm, k), lambda i: (i, 0)),
                      pl.BlockSpec((k, nout), lambda i: (0, 0)),
                      pl.BlockSpec((1, nout), lambda i: (0, 0))],
            out_specs=pl.BlockSpec((tm, nout), lambda i: (i, 0))),
        compiler_params=pltpu.CompilerParams(dimension_semantics=("parallel",)),
    )(xp, w_bf16, bias.reshape(1, nout))
    return out[:m]


# ----------------------------- JAX glue -----------------------------

def _bn_scale_shift(stats_tot, count, gamma, beta, eps):
    mean = stats_tot[0] / count
    var = stats_tot[1] / count - mean * mean        # biased variance (training-mode BN)
    scale = gamma * jax.lax.rsqrt(var + eps)
    shift = beta - mean * scale
    return scale, shift


def contracting_block_forward(x_nhwc, params, max_pool=True, ignore_pool=False, eps=1e-5):
    n, h, w, _ = x_nhwc.shape
    cout = params["w1"].shape[-1]
    assert h % 2 == 0 and w % 2 == 0
    wq = _round_up(w + PL_PAD + 1, 8)               # padded row width of the wide layout
    count = float(n * h * w)

    # validity mask for the BN statistics (the wide layout carries Wq - W garbage columns per row)
    mask = (jnp.tile((jnp.arange(wq) < w).astype(jnp.float32), h)[:, None]
            * jnp.ones((1, cout), jnp.float32))                               # (Mq, Cout)

    # conv1 wide input: zero-pad (top 1, bottom 2, left PL_PAD, right to Wq) then flatten rows.
    x_pad = jnp.pad(x_nhwc, ((0, 0), (1, 2), (PL_PAD, wq - w - PL_PAD), (0, 0)))
    f1 = x_pad.reshape(n * (h + 3) * wq, x_nhwc.shape[-1])

    # ---- conv1 -> bn1 -> relu1 (conv bias dropped: cancelled exactly by batch-stat BN) ----
    y1, s1 = conv3x3_bn_stats(f1, params["w1"].astype(jnp.bfloat16), mask,
                              n=n, h=h, wq=wq, cout=cout)
    sc1, sh1 = _bn_scale_shift(s1.sum(axis=0), count, params["g1"], params["be1"], eps)
    f2 = bn_relu_repack(y1, sc1, sh1, n=n, h=h, w=w, wq=wq)   # conv2's padded wide input (fused)

    # ---- conv2 -> bn2 -> relu2 (+ fused 2x2 max pool) ----
    y2, s2 = conv3x3_bn_stats(f2, params["w2"].astype(jnp.bfloat16), mask,
                              n=n, h=h, wq=wq, cout=cout)
    sc2, sh2 = _bn_scale_shift(s2.sum(axis=0), count, params["g2"], params["be2"], eps)
    skip, pooled = bn_relu_skip_maxpool(y2, sc2, sh2, n=n, h=h, w=w, wq=wq)

    if ignore_pool:
        return skip, skip
    if max_pool:
        return pooled, skip

    # 2x2 stride-2 conv pooling path (non-overlapping windows -> plain tiled matmul + bias).
    h2, w2 = h // 2, w // 2
    xw = (skip.reshape(n, h2, 2, w2, 2, cout)
              .transpose(0, 1, 3, 2, 4, 5)
              .reshape(n * h2 * w2, 4 * cout))
    yp = matmul_bias(xw, params["wp"].astype(jnp.bfloat16), params["bp"])
    return yp.reshape(n, h2, w2, cout), skip


# ----------------------------- parameters & reference -----------------------------

def init_params(key, cin, cout):
    k1, k2, k3, k4, k5, k6 = jax.random.split(key, 6)

    def u(k, shape, fan_in):
        b = 1.0 / np.sqrt(fan_in)
        return jax.random.uniform(k, shape, jnp.float32, -b, b)

    w1 = u(k1, (3, 3, cin, cout), 9 * cin)          # HWIO
    b1 = u(k2, (cout,), 9 * cin)
    w2 = u(k3, (3, 3, cout, cout), 9 * cout)
    b2 = u(k4, (cout,), 9 * cout)
    wp = u(k5, (2, 2, cout, cout), 4 * cout)
    bp = u(k6, (cout,), 4 * cout)
    return dict(
        w1=w1.reshape(9, cin, cout), b1=b1,          # b1/b2 used only by the reference; the
        w2=w2.reshape(9, cout, cout), b2=b2,         # kernels drop them (training-mode BN cancels)
        wp=wp.reshape(4 * cout, cout), bp=bp,
        g1=jnp.ones((cout,), jnp.float32), be1=jnp.zeros((cout,), jnp.float32),
        g2=jnp.ones((cout,), jnp.float32), be2=jnp.zeros((cout,), jnp.float32),
        w1_hwio=w1, w2_hwio=w2,
    )


def reference_forward(x, params, eps=1e-5):
    def conv(xx, w_hwio, b):
        y = jax.lax.conv_general_dilated(
            xx, w_hwio, window_strides=(1, 1), padding=((1, 1), (1, 1)),
            dimension_numbers=("NHWC", "HWIO", "NHWC"))
        return y + b

    def bn_relu_ref(y, g, b):
        mean = jnp.mean(y, axis=(0, 1, 2))
        var = jnp.var(y, axis=(0, 1, 2))
        return jnp.maximum((y - mean) * g * jax.lax.rsqrt(var + eps) + b, 0.0)

    a1 = bn_relu_ref(conv(x, params["w1_hwio"], params["b1"]), params["g1"], params["be1"])
    skip = bn_relu_ref(conv(a1, params["w2_hwio"], params["b2"]), params["g2"], params["be2"])
    n, h, w, c = skip.shape
    pooled = skip.reshape(n, h // 2, 2, w // 2, 2, c).max(axis=(2, 4))
    return pooled, skip


if __name__ == "__main__":
    key = jax.random.PRNGKey(0)
    kx, kp = jax.random.split(key)
    N, Cin, Cout, H, W = 2, 4, 8, 16, 16   # NHWC here == torch NCHW (2, 4, 16, 16)
    x = jax.random.normal(kx, (N, H, W, Cin), jnp.float32)
    params = init_params(kp, Cin, Cout)

    pooled, skip = contracting_block_forward(x, params, max_pool=True, ignore_pool=False)
    pooled, skip = jax.block_until_ready((pooled, skip))

    pooled_ref, skip_ref = reference_forward(x, params)
    # bf16 MXU inputs (f32 accumulation) across two conv+BN layers -> a few 1e-2 of slack needed.
    np.testing.assert_allclose(np.asarray(pooled), np.asarray(pooled_ref), atol=4e-2, rtol=4e-2)
    np.testing.assert_allclose(np.asarray(skip), np.asarray(skip_ref), atol=4e-2, rtol=4e-2)

    print("KERNEL_OK")
</pallas_src>

<mosaic_0001>
module attributes {stable_mosaic.version = 11 : i64} {
  func.func @kernel(%arg0: i32, %arg1: memref<608x4xf32, #tpu.memory_space<vmem>>, %arg2: memref<9x4x8xbf16, #tpu.memory_space<vmem>>, %arg3: memref<512x8xf32, #tpu.memory_space<vmem>>, %arg4: memref<512x8xf32, #tpu.memory_space<vmem>>, %arg5: memref<1x2x8xf32, #tpu.memory_space<vmem>>) attributes {dimension_semantics = [#tpu.dimension_semantics<parallel>], iteration_bounds = array<i64: 2>, scalar_prefetch = 0 : i64, scratch_operands = 0 : i64, tpu.core_type = #tpu.core_type<tc>, window_params = [{transform_indices = @transform_0, window_bounds = array<i64: 608, 4>}, {pipeline_mode = #tpu.pipeline_mode<synchronous>, transform_indices = @transform_1, window_bounds = array<i64: 9, 4, 8>}, {pipeline_mode = #tpu.pipeline_mode<synchronous>, transform_indices = @transform_2, window_bounds = array<i64: 512, 8>}, {transform_indices = @transform_3, window_bounds = array<i64: 512, 8>}, {transform_indices = @transform_4, window_bounds = array<i64: 1, 2, 8>}]} {
    %cst = arith.constant 0.000000e+00 : f32
    %0 = vector.broadcast %cst : f32 to vector<1x8xf32>
    %cst_0 = arith.constant 0.000000e+00 : f32
    %1 = vector.broadcast %cst_0 : f32 to vector<1x8xf32>
    %cst_1 = arith.constant 0.000000e+00 : f32
    %2 = vector.broadcast %cst_1 : f32 to vector<128x8xf32>
    %c7 = arith.constant 7 : index
    %c0 = arith.constant 0 : index
    %3 = vector.load %arg1[%c7, %c0] : memref<608x4xf32, #tpu.memory_space<vmem>>, vector<128x4xf32>
    %4 = arith.truncf %3 : vector<128x4xf32> to vector<128x4xbf16>
    %c0_2 = arith.constant 0 : index
    %c0_3 = arith.constant 0 : index
    %c0_4 = arith.constant 0 : index
    %5 = vector.load %arg2[%c0_2, %c0_3, %c0_4] : memref<9x4x8xbf16, #tpu.memory_space<vmem>>, vector<1x4x8xbf16>
    %6 = vector.shape_cast %5 : vector<1x4x8xbf16> to vector<4x8xbf16>
    %cst_5 = arith.constant dense<0.000000e+00> : vector<128x8xf32>
    %7 = tpu.matmul %4, %6, %cst_5 {dimension_numbers = #tpu.dot_dimension_numbers<[1], [0], [0], [1], [0, 0, 1, 1], [], []>} : vector<128x4xbf16>, vector<4x8xbf16>, vector<128x8xf32> -> vector<128x8xf32>
    %8 = arith.addf %2, %7 : vector<128x8xf32>
    %c8 = arith.constant 8 : index
    %c0_6 = arith.constant 0 : index
    %9 = vector.load %arg1[%c8, %c0_6] : memref<608x4xf32, #tpu.memory_space<vmem>>, vector<128x4xf32>
    %10 = arith.truncf %9 : vector<128x4xf32> to vector<128x4xbf16>
    %c1 = arith.constant 1 : index
    %c0_7 = arith.constant 0 : index
    %c0_8 = arith.constant 0 : index
    %11 = vector.load %arg2[%c1, %c0_7, %c0_8] : memref<9x4x8xbf16, #tpu.memory_space<vmem>>, vector<1x4x8xbf16>
    %12 = vector.shape_cast %11 : vector<1x4x8xbf16> to vector<4x8xbf16>
    %cst_9 = arith.constant dense<0.000000e+00> : vector<128x8xf32>
    %13 = tpu.matmul %10, %12, %cst_9 {dimension_numbers = #tpu.dot_dimension_numbers<[1], [0], [0], [1], [0, 0, 1, 1], [], []>} : vector<128x4xbf16>, vector<4x8xbf16>, vector<128x8xf32> -> vector<128x8xf32>
    %14 = arith.addf %8, %13 : vector<128x8xf32>
    %c9 = arith.constant 9 : index
    %c0_10 = arith.constant 0 : index
    %15 = vector.load %arg1[%c9, %c0_10] : memref<608x4xf32, #tpu.memory_space<vmem>>, vector<128x4xf32>
    %16 = arith.truncf %15 : vector<128x4xf32> to vector<128x4xbf16>
    %c2 = arith.constant 2 : index
    %c0_11 = arith.constant 0 : index
    %c0_12 = arith.constant 0 : index
    %17 = vector.load %arg2[%c2, %c0_11, %c0_12] : memref<9x4x8xbf16, #tpu.memory_space<vmem>>, vector<1x4x8xbf16>
    %18 = vector.shape_cast %17 : vector<1x4x8xbf16> to vector<4x8xbf16>
    %cst_13 = arith.constant dense<0.000000e+00> : vector<128x8xf32>
    %19 = tpu.matmul %16, %18, %cst_13 {dimension_numbers = #tpu.dot_dimension_numbers<[1], [0], [0], [1], [0, 0, 1, 1], [], []>} : vector<128x4xbf16>, vector<4x8xbf16>, vector<128x8xf32> -> vector<128x8xf32>
    %20 = arith.addf %14, %19 : vector<128x8xf32>
    %c39 = arith.constant 39 : index
    %c0_14 = arith.constant 0 : index
    %21 = vector.load %arg1[%c39, %c0_14] : memref<608x4xf32, #tpu.memory_space<vmem>>, vector<128x4xf32>
    %22 = arith.truncf %21 : vector<128x4xf32> to vector<128x4xbf16>
    %c3 = arith.constant 3 : index
    %c0_15 = arith.constant 0 : index
    %c0_16 = arith.constant 0 : index
    %23 = vector.load %arg2[%c3, %c0_15, %c0_16] : memref<9x4x8xbf16, #tpu.memory_space<vmem>>, vector<1x4x8xbf16>
    %24 = vector.shape_cast %23 : vector<1x4x8xbf16> to vector<4x8xbf16>
    %cst_17 = arith.constant dense<0.000000e+00> : vector<128x8xf32>
    %25 = tpu.matmul %22, %24, %cst_17 {dimension_numbers = #tpu.dot_dimension_numbers<[1], [0], [0], [1], [0, 0, 1, 1], [], []>} : vector<128x4xbf16>, vector<4x8xbf16>, vector<128x8xf32> -> vector<128x8xf32>
    %26 = arith.addf %20, %25 : vector<128x8xf32>
    %c40 = arith.constant 40 : index
    %c0_18 = arith.constant 0 : index
    %27 = vector.load %arg1[%c40, %c0_18] : memref<608x4xf32, #tpu.memory_space<vmem>>, vector<128x4xf32>
    %28 = arith.truncf %27 : vector<128x4xf32> to vector<128x4xbf16>
    %c4 = arith.constant 4 : index
    %c0_19 = arith.constant 0 : index
    %c0_20 = arith.constant 0 : index
    %29 = vector.load %arg2[%c4, %c0_19, %c0_20] : memref<9x4x8xbf16, #tpu.memory_space<vmem>>, vector<1x4x8xbf16>
    %30 = vector.shape_cast %29 : vector<1x4x8xbf16> to vector<4x8xbf16>
    %cst_21 = arith.constant dense<0.000000e+00> : vector<128x8xf32>
    %31 = tpu.matmul %28, %30, %cst_21 {dimension_numbers = #tpu.dot_dimension_numbers<[1], [0], [0], [1], [0, 0, 1, 1], [], []>} : vector<128x4xbf16>, vector<4x8xbf16>, vector<128x8xf32> -> vector<128x8xf32>
    %32 = arith.addf %26, %31 : vector<128x8xf32>
    %c41 = arith.constant 41 : index
    %c0_22 = arith.constant 0 : index
    %33 = vector.load %arg1[%c41, %c0_22] : memref<608x4xf32, #tpu.memory_space<vmem>>, vector<128x4xf32>
    %34 = arith.truncf %33 : vector<128x4xf32> to vector<128x4xbf16>
    %c5 = arith.constant 5 : index
    %c0_23 = arith.constant 0 : index
    %c0_24 = arith.constant 0 : index
    %35 = vector.load %arg2[%c5, %c0_23, %c0_24] : memref<9x4x8xbf16, #tpu.memory_space<vmem>>, vector<1x4x8xbf16>
    %36 = vector.shape_cast %35 : vector<1x4x8xbf16> to vector<4x8xbf16>
    %cst_25 = arith.constant dense<0.000000e+00> : vector<128x8xf32>
    %37 = tpu.matmul %34, %36, %cst_25 {dimension_numbers = #tpu.dot_dimension_numbers<[1], [0], [0], [1], [0, 0, 1, 1], [], []>} : vector<128x4xbf16>, vector<4x8xbf16>, vector<128x8xf32> -> vector<128x8xf32>
    %38 = arith.addf %32, %37 : vector<128x8xf32>
    %c71 = arith.constant 71 : index
    %c0_26 = arith.constant 0 : index
    %39 = vector.load %arg1[%c71, %c0_26] : memref<608x4xf32, #tpu.memory_space<vmem>>, vector<128x4xf32>
    %40 = arith.truncf %39 : vector<128x4xf32> to vector<128x4xbf16>
    %c6 = arith.constant 6 : index
    %c0_27 = arith.constant 0 : index
    %c0_28 = arith.constant 0 : index
    %41 = vector.load %arg2[%c6, %c0_27, %c0_28] : memref<9x4x8xbf16, #tpu.memory_space<vmem>>, vector<1x4x8xbf16>
    %42 = vector.shape_cast %41 : vector<1x4x8xbf16> to vector<4x8xbf16>
    %cst_29 = arith.constant dense<0.000000e+00> : vector<128x8xf32>
    %43 = tpu.matmul %40, %42, %cst_29 {dimension_numbers = #tpu.dot_dimension_numbers<[1], [0], [0], [1], [0, 0, 1, 1], [], []>} : vector<128x4xbf16>, vector<4x8xbf16>, vector<128x8xf32> -> vector<128x8xf32>
    %44 = arith.addf %38, %43 : vector<128x8xf32>
    %c72 = arith.constant 72 : index
    %c0_30 = arith.constant 0 : index
    %45 = vector.load %arg1[%c72, %c0_30] : memref<608x4xf32, #tpu.memory_space<vmem>>, vector<128x4xf32>
    %46 = arith.truncf %45 : vector<128x4xf32> to vector<128x4xbf16>
    %c7_31 = arith.constant 7 : index
    %c0_32 = arith.constant 0 : index
    %c0_33 = arith.constant 0 : index
    %47 = vector.load %arg2[%c7_31, %c0_32, %c0_33] : memref<9x4x8xbf16, #tpu.memory_space<vmem>>, vector<1x4x8xbf16>
    %48 = vector.shape_cast %47 : vector<1x4x8xbf16> to vector<4x8xbf16>
    %cst_34 = arith.constant dense<0.000000e+00> : vector<128x8xf32>
    %49 = tpu.matmul %46, %48, %cst_34 {dimension_numbers = #tpu.dot_dimension_numbers<[1], [0], [0], [1], [0, 0, 1, 1], [], []>} : vector<128x4xbf16>, vector<4x8xbf16>, vector<128x8xf32> -> vector<128x8xf32>
    %50 = arith.addf %44, %49 : vector<128x8xf32>
    %c73 = arith.constant 73 : index
    %c0_35 = arith.constant 0 : index
    %51 = vector.load %arg1[%c73, %c0_35] : memref<608x4xf32, #tpu.memory_space<vmem>>, vector<128x4xf32>
    %52 = arith.truncf %51 : vector<128x4xf32> to vector<128x4xbf16>
    %c8_36 = arith.constant 8 : index
    %c0_37 = arith.constant 0 : index
    %c0_38 = arith.constant 0 : index
    %53 = vector.load %arg2[%c8_36, %c0_37, %c0_38] : memref<9x4x8xbf16, #tpu.memory_space<vmem>>, vector<1x4x8xbf16>
    %54 = vector.shape_cast %53 : vector<1x4x8xbf16> to vector<4x8xbf16>
    %cst_39 = arith.constant dense<0.000000e+00> : vector<128x8xf32>
    %55 = tpu.matmul %52, %54, %cst_39 {dimension_numbers = #tpu.dot_dimension_numbers<[1], [0], [0], [1], [0, 0, 1, 1], [], []>} : vector<128x4xbf16>, vector<4x8xbf16>, vector<128x8xf32> -> vector<128x8xf32>
    %56 = arith.addf %50, %55 : vector<128x8xf32>
    %c0_40 = arith.constant 0 : index
    %c0_41 = arith.constant 0 : index
    %57 = vector.load %arg4[%c0_40, %c0_41] : memref<512x8xf32, #tpu.memory_space<vmem>>, vector<128x8xf32>
    tpu.vector_store %arg4[%c0_40, %c0_41], %56 {strides = array<i32>} : memref<512x8xf32, #tpu.memory_space<vmem>>, vector<128x8xf32>,
    %c0_42 = arith.constant 0 : index
    %c0_43 = arith.constant 0 : index
    %58 = vector.load %arg3[%c0_42, %c0_43] : memref<512x8xf32, #tpu.memory_space<vmem>>, vector<128x8xf32>
    %59 = arith.mulf %56, %58 : vector<128x8xf32>
    %cst_44 = arith.constant dense<0.000000e+00> : vector<8xf32>
    %60 = vector.multi_reduction <add>, %59, %cst_44 [0] : vector<128x8xf32> to vector<8xf32>
    %61 = vector.shape_cast %60 : vector<8xf32> to vector<1x8xf32>
    %62 = arith.addf %0, %61 : vector<1x8xf32>
    %63 = arith.mulf %59, %56 : vector<128x8xf32>
    %cst_45 = arith.constant dense<0.000000e+00> : vector<8xf32>
    %64 = vector.multi_reduction <add>, %63, %cst_45 [0] : vector<128x8xf32> to vector<8xf32>
    %65 = vector.shape_cast %64 : vector<8xf32> to vector<1x8xf32>
    %66 = arith.addf %1, %65 : vector<1x8xf32>
    %cst_46 = arith.constant 0.000000e+00 : f32
    %67 = vector.broadcast %cst_46 : f32 to vector<128x8xf32>
    %c135 = arith.constant 135 : index
    %c0_47 = arith.constant 0 : index
    %68 = vector.load %arg1[%c135, %c0_47] : memref<608x4xf32, #tpu.memory_space<vmem>>, vector<128x4xf32>
    %69 = arith.truncf %68 : vector<128x4xf32> to vector<128x4xbf16>
    %c0_48 = arith.constant 0 : index
    %c0_49 = arith.constant 0 : index
    %c0_50 = arith.constant 0 : index
    %70 = vector.load %arg2[%c0_48, %c0_49, %c0_50] : memref<9x4x8xbf16, #tpu.memory_space<vmem>>, vector<1x4x8xbf16>
    %71 = vector.shape_cast %70 : vector<1x4x8xbf16> to vector<4x8xbf16>
    %cst_51 = arith.constant dense<0.000000e+00> : vector<128x8xf32>
    %72 = tpu.matmul %69, %71, %cst_51 {dimension_numbers = #tpu.dot_dimension_numbers<[1], [0], [0], [1], [0, 0, 1, 1], [], []>} : vector<128x4xbf16>, vector<4x8xbf16>, vector<128x8xf32> -> vector<128x8xf32>
    %73 = arith.addf %67, %72 : vector<128x8xf32>
    %c136 = arith.constant 136 : index
    %c0_52 = arith.constant 0 : index
    %74 = vector.load %arg1[%c136, %c0_52] : memref<608x4xf32, #tpu.memory_space<vmem>>, vector<128x4xf32>
    %75 = arith.truncf %74 : vector<128x4xf32> to vector<128x4xbf16>
    %c1_53 = arith.constant 1 : index
    %c0_54 = arith.constant 0 : index
    %c0_55 = arith.constant 0 : index
    %76 = vector.load %arg2[%c1_53, %c0_54, %c0_55] : memref<9x4x8xbf16, #tpu.memory_space<vmem>>, vector<1x4x8xbf16>
    %77 = vector.shape_cast %76 : vector<1x4x8xbf16> to vector<4x8xbf16>
    %cst_56 = arith.constant dense<0.000000e+00> : vector<128x8xf32>
    %78 = tpu.matmul %75, %77, %cst_56 {dimension_numbers = #tpu.dot_dimension_numbers<[1], [0], [0], [1], [0, 0, 1, 1], [], []>} : vector<128x4xbf16>, vector<4x8xbf16>, vector<128x8xf32> -> vector<128x8xf32>
    %79 = arith.addf %73, %78 : vector<128x8xf32>
    %c137 = arith.constant 137 : index
    %c0_57 = arith.constant 0 : index
    %80 = vector.load %arg1[%c137, %c0_57] : memref<608x4xf32, #tpu.memory_space<vmem>>, vector<128x4xf32>
    %81 = arith.truncf %80 : vector<128x4xf32> to vector<128x4xbf16>
    %c2_58 = arith.constant 2 : index
    %c0_59 = arith.constant 0 : index
    %c0_60 = arith.constant 0 : index
    %82 = vector.load %arg2[%c2_58, %c0_59, %c0_60] : memref<9x4x8xbf16, #tpu.memory_space<vmem>>, vector<1x4x8xbf16>
    %83 = vector.shape_cast %82 : vector<1x4x8xbf16> to vector<4x8xbf16>
    %cst_61 = arith.constant dense<0.000000e+00> : vector<128x8xf32>
    %84 = tpu.matmul %81, %83, %cst_61 {dimension_numbers = #tpu.dot_dimension_numbers<[1], [0], [0], [1], [0, 0, 1, 1], [], []>} : vector<128x4xbf16>, vector<4x8xbf16>, vector<128x8xf32> -> vector<128x8xf32>
    %85 = arith.addf %79, %84 : vector<128x8xf32>
    %c167 = arith.constant 167 : index
    %c0_62 = arith.constant 0 : index
    %86 = vector.load %arg1[%c167, %c0_62] : memref<608x4xf32, #tpu.memory_space<vmem>>, vector<128x4xf32>
    %87 = arith.truncf %86 : vector<128x4xf32> to vector<128x4xbf16>
    %c3_63 = arith.constant 3 : index
    %c0_64 = arith.constant 0 : index
    %c0_65 = arith.constant 0 : index
    %88 = vector.load %arg2[%c3_63, %c0_64, %c0_65] : memref<9x4x8xbf16, #tpu.memory_space<vmem>>, vector<1x4x8xbf16>
    %89 = vector.shape_cast %88 : vector<1x4x8xbf16> to vector<4x8xbf16>
    %cst_66 = arith.constant dense<0.000000e+00> : vector<128x8xf32>
    %90 = tpu.matmul %87, %89, %cst_66 {dimension_numbers = #tpu.dot_dimension_numbers<[1], [0], [0], [1], [0, 0, 1, 1], [], []>} : vector<128x4xbf16>, vector<4x8xbf16>, vector<128x8xf32> -> vector<128x8xf32>
    %91 = arith.addf %85, %90 : vector<128x8xf32>
    %c168 = arith.constant 168 : index
    %c0_67 = arith.constant 0 : index
    %92 = vector.load %arg1[%c168, %c0_67] : memref<608x4xf32, #tpu.memory_space<vmem>>, vector<128x4xf32>
    %93 = arith.truncf %92 : vector<128x4xf32> to vector<128x4xbf16>
    %c4_68 = arith.constant 4 : index
    %c0_69 = arith.constant 0 : index
    %c0_70 = arith.constant 0 : index
    %94 = vector.load %arg2[%c4_68, %c0_69, %c0_70] : memref<9x4x8xbf16, #tpu.memory_space<vmem>>, vector<1x4x8xbf16>
    %95 = vector.shape_cast %94 : vector<1x4x8xbf16> to vector<4x8xbf16>
    %cst_71 = arith.constant dense<0.000000e+00> : vector<128x8xf32>
    %96 = tpu.matmul %93, %95, %cst_71 {dimension_numbers = #tpu.dot_dimension_numbers<[1], [0], [0], [1], [0, 0, 1, 1], [], []>} : vector<128x4xbf16>, vector<4x8xbf16>, vector<128x8xf32> -> vector<128x8xf32>
    %97 = arith.addf %91, %96 : vector<128x8xf32>
    %c169 = arith.constant 169 : index
    %c0_72 = arith.constant 0 : index
    %98 = vector.load %arg1[%c169, %c0_72] : memref<608x4xf32, #tpu.memory_space<vmem>>, vector<128x4xf32>
    %99 = arith.truncf %98 : vector<128x4xf32> to vector<128x4xbf16>
    %c5_73 = arith.constant 5 : index
    %c0_74 = arith.constant 0 : index
    %c0_75 = arith.constant 0 : index
    %100 = vector.load %arg2[%c5_73, %c0_74, %c0_75] : memref<9x4x8xbf16, #tpu.memory_space<vmem>>, vector<1x4x8xbf16>
    %101 = vector.shape_cast %100 : vector<1x4x8xbf16> to vector<4x8xbf16>
    %cst_76 = arith.constant dense<0.000000e+00> : vector<128x8xf32>
    %102 = tpu.matmul %99, %101, %cst_76 {dimension_numbers = #tpu.dot_dimension_numbers<[1], [0], [0], [1], [0, 0, 1, 1], [], []>} : vector<128x4xbf16>, vector<4x8xbf16>, vector<128x8xf32> -> vector<128x8xf32>
    %103 = arith.addf %97, %102 : vector<128x8xf32>
    %c199 = arith.constant 199 : index
    %c0_77 = arith.constant 0 : index
    %104 = vector.load %arg1[%c199, %c0_77] : memref<608x4xf32, #tpu.memory_space<vmem>>, vector<128x4xf32>
    %105 = arith.truncf %104 : vector<128x4xf32> to vector<128x4xbf16>
    %c6_78 = arith.constant 6 : index
    %c0_79 = arith.constant 0 : index
    %c0_80 = arith.constant 0 : index
    %106 = vector.load %arg2[%c6_78, %c0_79, %c0_80] : memref<9x4x8xbf16, #tpu.memory_space<vmem>>, vector<1x4x8xbf16>
    %107 = vector.shape_cast %106 : vector<1x4x8xbf16> to vector<4x8xbf16>
    %cst_81 = arith.constant dense<0.000000e+00> : vector<128x8xf32>
    %108 = tpu.matmul %105, %107, %cst_81 {dimension_numbers = #tpu.dot_dimension_numbers<[1], [0], [0], [1], [0, 0, 1, 1], [], []>} : vector<128x4xbf16>, vector<4x8xbf16>, vector<128x8xf32> -> vector<128x8xf32>
    %109 = arith.addf %103, %108 : vector<128x8xf32>
    %c200 = arith.constant 200 : index
    %c0_82 = arith.constant 0 : index
    %110 = vector.load %arg1[%c200, %c0_82] : memref<608x4xf32, #tpu.memory_space<vmem>>, vector<128x4xf32>
    %111 = arith.truncf %110 : vector<128x4xf32> to vector<128x4xbf16>
    %c7_83 = arith.constant 7 : index
    %c0_84 = arith.constant 0 : index
    %c0_85 = arith.constant 0 : index
    %112 = vector.load %arg2[%c7_83, %c0_84, %c0_85] : memref<9x4x8xbf16, #tpu.memory_space<vmem>>, vector<1x4x8xbf16>
    %113 = vector.shape_cast %112 : vector<1x4x8xbf16> to vector<4x8xbf16>
    %cst_86 = arith.constant dense<0.000000e+00> : vector<128x8xf32>
    %114 = tpu.matmul %111, %113, %cst_86 {dimension_numbers = #tpu.dot_dimension_numbers<[1], [0], [0], [1], [0, 0, 1, 1], [], []>} : vector<128x4xbf16>, vector<4x8xbf16>, vector<128x8xf32> -> vector<128x8xf32>
    %115 = arith.addf %109, %114 : vector<128x8xf32>
    %c201 = arith.constant 201 : index
    %c0_87 = arith.constant 0 : index
    %116 = vector.load %arg1[%c201, %c0_87] : memref<608x4xf32, #tpu.memory_space<vmem>>, vector<128x4xf32>
    %117 = arith.truncf %116 : vector<128x4xf32> to vector<128x4xbf16>
    %c8_88 = arith.constant 8 : index
    %c0_89 = arith.constant 0 : index
    %c0_90 = arith.constant 0 : index
    %118 = vector.load %arg2[%c8_88, %c0_89, %c0_90] : memref<9x4x8xbf16, #tpu.memory_space<vmem>>, vector<1x4x8xbf16>
    %119 = vector.shape_cast %118 : vector<1x4x8xbf16> to vector<4x8xbf16>
    %cst_91 = arith.constant dense<0.000000e+00> : vector<128x8xf32>
    %120 = tpu.matmul %117, %119, %cst_91 {dimension_numbers = #tpu.dot_dimension_numbers<[1], [0], [0], [1], [0, 0, 1, 1], [], []>} : vector<128x4xbf16>, vector<4x8xbf16>, vector<128x8xf32> -> vector<128x8xf32>
    %121 = arith.addf %115, %120 : vector<128x8xf32>
    %c128 = arith.constant 128 : index
    %c0_92 = arith.constant 0 : index
    %122 = vector.load %arg4[%c128, %c0_92] : memref<512x8xf32, #tpu.memory_space<vmem>>, vector<128x8xf32>
    tpu.vector_store %arg4[%c128, %c0_92], %121 {strides = array<i32>} : memref<512x8xf32, #tpu.memory_space<vmem>>, vector<128x8xf32>,
    %c128_93 = arith.constant 128 : index
    %c0_94 = arith.constant 0 : index
    %123 = vector.load %arg3[%c128_93, %c0_94] : memref<512x8xf32, #tpu.memory_space<vmem>>, vector<128x8xf32>
    %124 = arith.mulf %121, %123 : vector<128x8xf32>
    %cst_95 = arith.constant dense<0.000000e+00> : vector<8xf32>
    %125 = vector.multi_reduction <add>, %124, %cst_95 [0] : vector<128x8xf32> to vector<8xf32>
    %126 = vector.shape_cast %125 : vector<8xf32> to vector<1x8xf32>
    %127 = arith.addf %62, %126 : vector<1x8xf32>
    %128 = arith.mulf %124, %121 : vector<128x8xf32>
    %cst_96 = arith.constant dense<0.000000e+00> : vector<8xf32>
    %129 = vector.multi_reduction <add>, %128, %cst_96 [0] : vector<128x8xf32> to vector<8xf32>
    %130 = vector.shape_cast %129 : vector<8xf32> to vector<1x8xf32>
    %131 = arith.addf %66, %130 : vector<1x8xf32>
    %cst_97 = arith.constant 0.000000e+00 : f32
    %132 = vector.broadcast %cst_97 : f32 to vector<128x8xf32>
    %c263 = arith.constant 263 : index
    %c0_98 = arith.constant 0 : index
    %133 = vector.load %arg1[%c263, %c0_98] : memref<608x4xf32, #tpu.memory_space<vmem>>, vector<128x4xf32>
    %134 = arith.truncf %133 : vector<128x4xf32> to vector<128x4xbf16>
    %c0_99 = arith.constant 0 : index
    %c0_100 = arith.constant 0 : index
    %c0_101 = arith.constant 0 : index
    %135 = vector.load %arg2[%c0_99, %c0_100, %c0_101] : memref<9x4x8xbf16, #tpu.memory_space<vmem>>, vector<1x4x8xbf16>
    %136 = vector.shape_cast %135 : vector<1x4x8xbf16> to vector<4x8xbf16>
    %cst_102 = arith.constant dense<0.000000e+00> : vector<128x8xf32>
    %137 = tpu.matmul %134, %136, %cst_102 {dimension_numbers = #tpu.dot_dimension_numbers<[1], [0], [0], [1], [0, 0, 1, 1], [], []>} : vector<128x4xbf16>, vector<4x8xbf16>, vector<128x8xf32> -> vector<128x8xf32>
    %138 = arith.addf %132, %137 : vector<128x8xf32>
    %c264 = arith.constant 264 : index
    %c0_103 = arith.constant 0 : index
    %139 = vector.load %arg1[%c264, %c0_103] : memref<608x4xf32, #tpu.memory_space<vmem>>, vector<128x4xf32>
    %140 = arith.truncf %139 : vector<128x4xf32> to vector<128x4xbf16>
    %c1_104 = arith.constant 1 : index
    %c0_105 = arith.constant 0 : index
    %c0_106 = arith.constant 0 : index
    %141 = vector.load %arg2[%c1_104, %c0_105, %c0_106] : memref<9x4x8xbf16, #tpu.memory_space<vmem>>, vector<1x4x8xbf16>
    %142 = vector.shape_cast %141 : vector<1x4x8xbf16> to vector<4x8xbf16>
    %cst_107 = arith.constant dense<0.000000e+00> : vector<128x8xf32>
    %143 = tpu.matmul %140, %142, %cst_107 {dimension_numbers = #tpu.dot_dimension_numbers<[1], [0], [0], [1], [0, 0, 1, 1], [], []>} : vector<128x4xbf16>, vector<4x8xbf16>, vector<128x8xf32> -> vector<128x8xf32>
    %144 = arith.addf %138, %143 : vector<128x8xf32>
    %c265 = arith.constant 265 : index
    %c0_108 = arith.constant 0 : index
    %145 = vector.load %arg1[%c265, %c0_108] : memref<608x4xf32, #tpu.memory_space<vmem>>, vector<128x4xf32>
    %146 = arith.truncf %145 : vector<128x4xf32> to vector<128x4xbf16>
    %c2_109 = arith.constant 2 : index
    %c0_110 = arith.constant 0 : index
    %c0_111 = arith.constant 0 : index
    %147 = vector.load %arg2[%c2_109, %c0_110, %c0_111] : memref<9x4x8xbf16, #tpu.memory_space<vmem>>, vector<1x4x8xbf16>
    %148 = vector.shape_cast %147 : vector<1x4x8xbf16> to vector<4x8xbf16>
    %cst_112 = arith.constant dense<0.000000e+00> : vector<128x8xf32>
    %149 = tpu.matmul %146, %148, %cst_112 {dimension_numbers = #tpu.dot_dimension_numbers<[1], [0], [0], [1], [0, 0, 1, 1], [], []>} : vector<128x4xbf16>, vector<4x8xbf16>, vector<128x8xf32> -> vector<128x8xf32>
    %150 = arith.addf %144, %149 : vector<128x8xf32>
    %c295 = arith.constant 295 : index
    %c0_113 = arith.constant 0 : index
    %151 = vector.load %arg1[%c295, %c0_113] : memref<608x4xf32, #tpu.memory_space<vmem>>, vector<128x4xf32>
    %152 = arith.truncf %151 : vector<128x4xf32> to vector<128x4xbf16>
    %c3_114 = arith.constant 3 : index
    %c0_115 = arith.constant 0 : index
    %c0_116 = arith.constant 0 : index
    %153 = vector.load %arg2[%c3_114, %c0_115, %c0_116] : memref<9x4x8xbf16, #tpu.memory_space<vmem>>, vector<1x4x8xbf16>
    %154 = vector.shape_cast %153 : vector<1x4x8xbf16> to vector<4x8xbf16>
    %cst_117 = arith.constant dense<0.000000e+00> : vector<128x8xf32>
    %155 = tpu.matmul %152, %154, %cst_117 {dimension_numbers = #tpu.dot_dimension_numbers<[1], [0], [0], [1], [0, 0, 1, 1], [], []>} : vector<128x4xbf16>, vector<4x8xbf16>, vector<128x8xf32> -> vector<128x8xf32>
    %156 = arith.addf %150, %155 : vector<128x8xf32>
    %c296 = arith.constant 296 : index
    %c0_118 = arith.constant 0 : index
    %157 = vector.load %arg1[%c296, %c0_118] : memref<608x4xf32, #tpu.memory_space<vmem>>, vector<128x4xf32>
    %158 = arith.truncf %157 : vector<128x4xf32> to vector<128x4xbf16>
    %c4_119 = arith.constant 4 : index
    %c0_120 = arith.constant 0 : index
    %c0_121 = arith.constant 0 : index
    %159 = vector.load %arg2[%c4_119, %c0_120, %c0_121] : memref<9x4x8xbf16, #tpu.memory_space<vmem>>, vector<1x4x8xbf16>
    %160 = vector.shape_cast %159 : vector<1x4x8xbf16> to vector<4x8xbf16>
    %cst_122 = arith.constant dense<0.000000e+00> : vector<128x8xf32>
    %161 = tpu.matmul %158, %160, %cst_122 {dimension_numbers = #tpu.dot_dimension_numbers<[1], [0], [0], [1], [0, 0, 1, 1], [], []>} : vector<128x4xbf16>, vector<4x8xbf16>, vector<128x8xf32> -> vector<128x8xf32>
    %162 = arith.addf %156, %161 : vector<128x8xf32>
    %c297 = arith.constant 297 : index
    %c0_123 = arith.constant 0 : index
    %163 = vector.load %arg1[%c297, %c0_123] : memref<608x4xf32, #tpu.memory_space<vmem>>, vector<128x4xf32>
    %164 = arith.truncf %163 : vector<128x4xf32> to vector<128x4xbf16>
    %c5_124 = arith.constant 5 : index
    %c0_125 = arith.constant 0 : index
    %c0_126 = arith.constant 0 : index
    %165 = vector.load %arg2[%c5_124, %c0_125, %c0_126] : memref<9x4x8xbf16, #tpu.memory_space<vmem>>, vector<1x4x8xbf16>
    %166 = vector.shape_cast %165 : vector<1x4x8xbf16> to vector<4x8xbf16>
    %cst_127 = arith.constant dense<0.000000e+00> : vector<128x8xf32>
    %167 = tpu.matmul %164, %166, %cst_127 {dimension_numbers = #tpu.dot_dimension_numbers<[1], [0], [0], [1], [0, 0, 1, 1], [], []>} : vector<128x4xbf16>, vector<4x8xbf16>, vector<128x8xf32> -> vector<128x8xf32>
    %168 = arith.addf %162, %167 : vector<128x8xf32>
    %c327 = arith.constant 327 : index
    %c0_128 = arith.constant 0 : index
    %169 = vector.load %arg1[%c327, %c0_128] : memref<608x4xf32, #tpu.memory_space<vmem>>, vector<128x4xf32>
    %170 = arith.truncf %169 : vector<128x4xf32> to vector<128x4xbf16>
    %c6_129 = arith.constant 6 : index
    %c0_130 = arith.constant 0 : index
    %c0_131 = arith.constant 0 : index
    %171 = vector.load %arg2[%c6_129, %c0_130, %c0_131] : memref<9x4x8xbf16, #tpu.memory_space<vmem>>, vector<1x4x8xbf16>
    %172 = vector.shape_cast %171 : vector<1x4x8xbf16> to vector<4x8xbf16>
    %cst_132 = arith.constant dense<0.000000e+00> : vector<128x8xf32>
    %173 = tpu.matmul %170, %172, %cst_132 {dimension_numbers = #tpu.dot_dimension_numbers<[1], [0], [0], [1], [0, 0, 1, 1], [], []>} : vector<128x4xbf16>, vector<4x8xbf16>, vector<128x8xf32> -> vector<128x8xf32>
    %174 = arith.addf %168, %173 : vector<128x8xf32>
    %c328 = arith.constant 328 : index
    %c0_133 = arith.constant 0 : index
    %175 = vector.load %arg1[%c328, %c0_133] : memref<608x4xf32, #tpu.memory_space<vmem>>, vector<128x4xf32>
    %176 = arith.truncf %175 : vector<128x4xf32> to vector<128x4xbf16>
    %c7_134 = arith.constant 7 : index
    %c0_135 = arith.constant 0 : index
    %c0_136 = arith.constant 0 : index
    %177 = vector.load %arg2[%c7_134, %c0_135, %c0_136] : memref<9x4x8xbf16, #tpu.memory_space<vmem>>, vector<1x4x8xbf16>
    %178 = vector.shape_cast %177 : vector<1x4x8xbf16> to vector<4x8xbf16>
    %cst_137 = arith.constant dense<0.000000e+00> : vector<128x8xf32>
    %179 = tpu.matmul %176, %178, %cst_137 {dimension_numbers = #tpu.dot_dimension_numbers<[1], [0], [0], [1], [0, 0, 1, 1], [], []>} : vector<128x4xbf16>, vector<4x8xbf16>, vector<128x8xf32> -> vector<128x8xf32>
    %180 = arith.addf %174, %179 : vector<128x8xf32>
    %c329 = arith.constant 329 : index
    %c0_138 = arith.constant 0 : index
    %181 = vector.load %arg1[%c329, %c0_138] : memref<608x4xf32, #tpu.memory_space<vmem>>, vector<128x4xf32>
    %182 = arith.truncf %181 : vector<128x4xf32> to vector<128x4xbf16>
    %c8_139 = arith.constant 8 : index
    %c0_140 = arith.constant 0 : index
    %c0_141 = arith.constant 0 : index
    %183 = vector.load %arg2[%c8_139, %c0_140, %c0_141] : memref<9x4x8xbf16, #tpu.memory_space<vmem>>, vector<1x4x8xbf16>
    %184 = vector.shape_cast %183 : vector<1x4x8xbf16> to vector<4x8xbf16>
    %cst_142 = arith.constant dense<0.000000e+00> : vector<128x8xf32>
    %185 = tpu.matmul %182, %184, %cst_142 {dimension_numbers = #tpu.dot_dimension_numbers<[1], [0], [0], [1], [0, 0, 1, 1], [], []>} : vector<128x4xbf16>, vector<4x8xbf16>, vector<128x8xf32> -> vector<128x8xf32>
    %186 = arith.addf %180, %185 : vector<128x8xf32>
    %c256 = arith.constant 256 : index
    %c0_143 = arith.constant 0 : index
    %187 = vector.load %arg4[%c256, %c0_143] : memref<512x8xf32, #tpu.memory_space<vmem>>, vector<128x8xf32>
    tpu.vector_store %arg4[%c256, %c0_143], %186 {strides = array<i32>} : memref<512x8xf32, #tpu.memory_space<vmem>>, vector<128x8xf32>,
    %c256_144 = arith.constant 256 : index
    %c0_145 = arith.constant 0 : index
    %188 = vector.load %arg3[%c256_144, %c0_145] : memref<512x8xf32, #tpu.memory_space<vmem>>, vector<128x8xf32>
    %189 = arith.mulf %186, %188 : vector<128x8xf32>
    %cst_146 = arith.constant dense<0.000000e+00> : vector<8xf32>
    %190 = vector.multi_reduction <add>, %189, %cst_146 [0] : vector<128x8xf32> to vector<8xf32>
    %191 = vector.shape_cast %190 : vector<8xf32> to vector<1x8xf32>
    %192 = arith.addf %127, %191 : vector<1x8xf32>
    %193 = arith.mulf %189, %186 : vector<128x8xf32>
    %cst_147 = arith.constant dense<0.000000e+00> : vector<8xf32>
    %194 = vector.multi_reduction <add>, %193, %cst_147 [0] : vector<128x8xf32> to vector<8xf32>
    %195 = vector.shape_cast %194 : vector<8xf32> to vector<1x8xf32>
    %196 = arith.addf %131, %195 : vector<1x8xf32>
    %cst_148 = arith.constant 0.000000e+00 : f32
    %197 = vector.broadcast %cst_148 : f32 to vector<128x8xf32>
    %c391 = arith.constant 391 : index
    %c0_149 = arith.constant 0 : index
    %198 = vector.load %arg1[%c391, %c0_149] : memref<608x4xf32, #tpu.memory_space<vmem>>, vector<128x4xf32>
    %199 = arith.truncf %198 : vector<128x4xf32> to vector<128x4xbf16>
    %c0_150 = arith.constant 0 : index
    %c0_151 = arith.constant 0 : index
    %c0_152 = arith.constant 0 : index
    %200 = vector.load %arg2[%c0_150, %c0_151, %c0_152] : memref<9x4x8xbf16, #tpu.memory_space<vmem>>, vector<1x4x8xbf16>
    %201 = vector.shape_cast %200 : vector<1x4x8xbf16> to vector<4x8xbf16>
    %cst_153 = arith.constant dense<0.000000e+00> : vector<128x8xf32>
    %202 = tpu.matmul %199, %201, %cst_153 {dimension_numbers = #tpu.dot_dimension_numbers<[1], [0], [0], [1], [0, 0, 1, 1], [], []>} : vector<128x4xbf16>, vector<4x8xbf16>, vector<128x8xf32> -> vector<128x8xf32>
    %203 = arith.addf %197, %202 : vector<128x8xf32>
    %c392 = arith.constant 392 : index
    %c0_154 = arith.constant 0 : index
    %204 = vector.load %arg1[%c392, %c0_154] : memref<608x4xf32, #tpu.memory_space<vmem>>, vector<128x4xf32>
    %205 = arith.truncf %204 : vector<128x4xf32> to vector<128x4xbf16>
    %c1_155 = arith.constant 1 : index
    %c0_156 = arith.constant 0 : index
    %c0_157 = arith.constant 0 : index
    %206 = vector.load %arg2[%c1_155, %c0_156, %c0_157] : memref<9x4x8xbf16, #tpu.memory_space<vmem>>, vector<1x4x8xbf16>
    %207 = vector.shape_cast %206 : vector<1x4x8xbf16> to vector<4x8xbf16>
    %cst_158 = arith.constant dense<0.000000e+00> : vector<128x8xf32>
    %208 = tpu.matmul %205, %207, %cst_158 {dimension_numbers = #tpu.dot_dimension_numbers<[1], [0], [0], [1], [0, 0, 1, 1], [], []>} : vector<128x4xbf16>, vector<4x8xbf16>, vector<128x8xf32> -> vector<128x8xf32>
    %209 = arith.addf %203, %208 : vector<128x8xf32>
    %c393 = arith.constant 393 : index
    %c0_159 = arith.constant 0 : index
    %210 = vector.load %arg1[%c393, %c0_159] : memref<608x4xf32, #tpu.memory_space<vmem>>, vector<128x4xf32>
    %211 = arith.truncf %210 : vector<128x4xf32> to vector<128x4xbf16>
    %c2_160 = arith.constant 2 : index
    %c0_161 = arith.constant 0 : index
    %c0_162 = arith.constant 0 : index
    %212 = vector.load %arg2[%c2_160, %c0_161, %c0_162] : memref<9x4x8xbf16, #tpu.memory_space<vmem>>, vector<1x4x8xbf16>
    %213 = vector.shape_cast %212 : vector<1x4x8xbf16> to vector<4x8xbf16>
    %cst_163 = arith.constant dense<0.000000e+00> : vector<128x8xf32>
    %214 = tpu.matmul %211, %213, %cst_163 {dimension_numbers = #tpu.dot_dimension_numbers<[1], [0], [0], [1], [0, 0, 1, 1], [], []>} : vector<128x4xbf16>, vector<4x8xbf16>, vector<128x8xf32> -> vector<128x8xf32>
    %215 = arith.addf %209, %214 : vector<128x8xf32>
    %c423 = arith.constant 423 : index
    %c0_164 = arith.constant 0 : index
    %216 = vector.load %arg1[%c423, %c0_164] : memref<608x4xf32, #tpu.memory_space<vmem>>, vector<128x4xf32>
    %217 = arith.truncf %216 : vector<128x4xf32> to vector<128x4xbf16>
    %c3_165 = arith.constant 3 : index
    %c0_166 = arith.constant 0 : index
    %c0_167 = arith.constant 0 : index
    %218 = vector.load %arg2[%c3_165, %c0_166, %c0_167] : memref<9x4x8xbf16, #tpu.memory_space<vmem>>, vector<1x4x8xbf16>
    %219 = vector.shape_cast %218 : vector<1x4x8xbf16> to vector<4x8xbf16>
    %cst_168 = arith.constant dense<0.000000e+00> : vector<128x8xf32>
    %220 = tpu.matmul %217, %219, %cst_168 {dimension_numbers = #tpu.dot_dimension_numbers<[1], [0], [0], [1], [0, 0, 1, 1], [], []>} : vector<128x4xbf16>, vector<4x8xbf16>, vector<128x8xf32> -> vector<128x8xf32>
    %221 = arith.addf %215, %220 : vector<128x8xf32>
    %c424 = arith.constant 424 : index
    %c0_169 = arith.constant 0 : index
    %222 = vector.load %arg1[%c424, %c0_169] : memref<608x4xf32, #tpu.memory_space<vmem>>, vector<128x4xf32>
    %223 = arith.truncf %222 : vector<128x4xf32> to vector<128x4xbf16>
    %c4_170 = arith.constant 4 : index
    %c0_171 = arith.constant 0 : index
    %c0_172 = arith.constant 0 : index
    %224 = vector.load %arg2[%c4_170, %c0_171, %c0_172] : memref<9x4x8xbf16, #tpu.memory_space<vmem>>, vector<1x4x8xbf16>
    %225 = vector.shape_cast %224 : vector<1x4x8xbf16> to vector<4x8xbf16>
    %cst_173 = arith.constant dense<0.000000e+00> : vector<128x8xf32>
    %226 = tpu.matmul %223, %225, %cst_173 {dimension_numbers = #tpu.dot_dimension_numbers<[1], [0], [0], [1], [0, 0, 1, 1], [], []>} : vector<128x4xbf16>, vector<4x8xbf16>, vector<128x8xf32> -> vector<128x8xf32>
    %227 = arith.addf %221, %226 : vector<128x8xf32>
    %c425 = arith.constant 425 : index
    %c0_174 = arith.constant 0 : index
    %228 = vector.load %arg1[%c425, %c0_174] : memref<608x4xf32, #tpu.memory_space<vmem>>, vector<128x4xf32>
    %229 = arith.truncf %228 : vector<128x4xf32> to vector<128x4xbf16>
    %c5_175 = arith.constant 5 : index
    %c0_176 = arith.constant 0 : index
    %c0_177 = arith.constant 0 : index
    %230 = vector.load %arg2[%c5_175, %c0_176, %c0_177] : memref<9x4x8xbf16, #tpu.memory_space<vmem>>, vector<1x4x8xbf16>
    %231 = vector.shape_cast %230 : vector<1x4x8xbf16> to vector<4x8xbf16>
    %cst_178 = arith.constant dense<0.000000e+00> : vector<128x8xf32>
    %232 = tpu.matmul %229, %231, %cst_178 {dimension_numbers = #tpu.dot_dimension_numbers<[1], [0], [0], [1], [0, 0, 1, 1], [], []>} : vector<128x4xbf16>, vector<4x8xbf16>, vector<128x8xf32> -> vector<128x8xf32>
    %233 = arith.addf %227, %232 : vector<128x8xf32>
    %c455 = arith.constant 455 : index
    %c0_179 = arith.constant 0 : index
    %234 = vector.load %arg1[%c455, %c0_179] : memref<608x4xf32, #tpu.memory_space<vmem>>, vector<128x4xf32>
    %235 = arith.truncf %234 : vector<128x4xf32> to vector<128x4xbf16>
    %c6_180 = arith.constant 6 : index
    %c0_181 = arith.constant 0 : index
    %c0_182 = arith.constant 0 : index
    %236 = vector.load %arg2[%c6_180, %c0_181, %c0_182] : memref<9x4x8xbf16, #tpu.memory_space<vmem>>, vector<1x4x8xbf16>
    %237 = vector.shape_cast %236 : vector<1x4x8xbf16> to vector<4x8xbf16>
    %cst_183 = arith.constant dense<0.000000e+00> : vector<128x8xf32>
    %238 = tpu.matmul %235, %237, %cst_183 {dimension_numbers = #tpu.dot_dimension_numbers<[1], [0], [0], [1], [0, 0, 1, 1], [], []>} : vector<128x4xbf16>, vector<4x8xbf16>, vector<128x8xf32> -> vector<128x8xf32>
    %239 = arith.addf %233, %238 : vector<128x8xf32>
    %c456 = arith.constant 456 : index
    %c0_184 = arith.constant 0 : index
    %240 = vector.load %arg1[%c456, %c0_184] : memref<608x4xf32, #tpu.memory_space<vmem>>, vector<128x4xf32>
    %241 = arith.truncf %240 : vector<128x4xf32> to vector<128x4xbf16>
    %c7_185 = arith.constant 7 : index
    %c0_186 = arith.constant 0 : index
    %c0_187 = arith.constant 0 : index
    %242 = vector.load %arg2[%c7_185, %c0_186, %c0_187] : memref<9x4x8xbf16, #tpu.memory_space<vmem>>, vector<1x4x8xbf16>
    %243 = vector.shape_cast %242 : vector<1x4x8xbf16> to vector<4x8xbf16>
    %cst_188 = arith.constant dense<0.000000e+00> : vector<128x8xf32>
    %244 = tpu.matmul %241, %243, %cst_188 {dimension_numbers = #tpu.dot_dimension_numbers<[1], [0], [0], [1], [0, 0, 1, 1], [], []>} : vector<128x4xbf16>, vector<4x8xbf16>, vector<128x8xf32> -> vector<128x8xf32>
    %245 = arith.addf %239, %244 : vector<128x8xf32>
    %c457 = arith.constant 457 : index
    %c0_189 = arith.constant 0 : index
    %246 = vector.load %arg1[%c457, %c0_189] : memref<608x4xf32, #tpu.memory_space<vmem>>, vector<128x4xf32>
    %247 = arith.truncf %246 : vector<128x4xf32> to vector<128x4xbf16>
    %c8_190 = arith.constant 8 : index
    %c0_191 = arith.constant 0 : index
    %c0_192 = arith.constant 0 : index
    %248 = vector.load %arg2[%c8_190, %c0_191, %c0_192] : memref<9x4x8xbf16, #tpu.memory_space<vmem>>, vector<1x4x8xbf16>
    %249 = vector.shape_cast %248 : vector<1x4x8xbf16> to vector<4x8xbf16>
    %cst_193 = arith.constant dense<0.000000e+00> : vector<128x8xf32>
    %250 = tpu.matmul %247, %249, %cst_193 {dimension_numbers = #tpu.dot_dimension_numbers<[1], [0], [0], [1], [0, 0, 1, 1], [], []>} : vector<128x4xbf16>, vector<4x8xbf16>, vector<128x8xf32> -> vector<128x8xf32>
    %251 = arith.addf %245, %250 : vector<128x8xf32>
    %c384 = arith.constant 384 : index
    %c0_194 = arith.constant 0 : index
    %252 = vector.load %arg4[%c384, %c0_194] : memref<512x8xf32, #tpu.memory_space<vmem>>, vector<128x8xf32>
    tpu.vector_store %arg4[%c384, %c0_194], %251 {strides = array<i32>} : memref<512x8xf32, #tpu.memory_space<vmem>>, vector<128x8xf32>,
    %c384_195 = arith.constant 384 : index
    %c0_196 = arith.constant 0 : index
    %253 = vector.load %arg3[%c384_195, %c0_196] : memref<512x8xf32, #tpu.memory_space<vmem>>, vector<128x8xf32>
    %254 = arith.mulf %251, %253 : vector<128x8xf32>
    %cst_197 = arith.constant dense<0.000000e+00> : vector<8xf32>
    %255 = vector.multi_reduction <add>, %254, %cst_197 [0] : vector<128x8xf32> to vector<8xf32>
    %256 = vector.shape_cast %255 : vector<8xf32> to vector<1x8xf32>
    %257 = arith.addf %192, %256 : vector<1x8xf32>
    %258 = arith.mulf %254, %251 : vector<128x8xf32>
    %cst_198 = arith.constant dense<0.000000e+00> : vector<8xf32>
    %259 = vector.multi_reduction <add>, %258, %cst_198 [0] : vector<128x8xf32> to vector<8xf32>
    %260 = vector.shape_cast %259 : vector<8xf32> to vector<1x8xf32>
    %261 = arith.addf %196, %260 : vector<1x8xf32>
    %c0_199 = arith.constant 0 : index
    %c0_200 = arith.constant 0 : index
    %c0_201 = arith.constant 0 : index
    %262 = vector.load %arg5[%c0_199, %c0_200, %c0_201] : memref<1x2x8xf32, #tpu.memory_space<vmem>>, vector<1x1x8xf32>
    %263 = vector.shape_cast %262 : vector<1x1x8xf32> to vector<1x8xf32>
    %264 = vector.shape_cast %257 : vector<1x8xf32> to vector<1x1x8xf32>
    tpu.vector_store %arg5[%c0_199, %c0_200, %c0_201], %264 {strides = array<i32>} : memref<1x2x8xf32, #tpu.memory_space<vmem>>, vector<1x1x8xf32>,
    %c0_202 = arith.constant 0 : index
    %c1_203 = arith.constant 1 : index
    %c0_204 = arith.constant 0 : index
    %265 = vector.load %arg5[%c0_202, %c1_203, %c0_204] : memref<1x2x8xf32, #tpu.memory_space<vmem>>, vector<1x1x8xf32>
    %266 = vector.shape_cast %265 : vector<1x1x8xf32> to vector<1x8xf32>
    %267 = vector.shape_cast %261 : vector<1x8xf32> to vector<1x1x8xf32>
    tpu.vector_store %arg5[%c0_202, %c1_203, %c0_204], %267 {strides = array<i32>} : memref<1x2x8xf32, #tpu.memory_space<vmem>>, vector<1x1x8xf32>,
    return
  }
  func.func @transform_0(%arg0: i32) -> (i32, i32) {
    %c0_i32 = arith.constant 0 : i32
    %c0_i32_0 = arith.constant 0 : i32
    return %arg0, %c0_i32 : i32, i32
  }
  func.func @transform_1(%arg0: i32) -> (i32, i32, i32) {
    %c0_i32 = arith.constant 0 : i32
    %c0_i32_0 = arith.constant 0 : i32
    %c0_i32_1 = arith.constant 0 : i32
    %c0_i32_2 = arith.constant 0 : i32
    return %c0_i32, %c0_i32_0, %c0_i32_1 : i32, i32, i32
  }
  func.func @transform_2(%arg0: i32) -> (i32, i32) {
    %c0_i32 = arith.constant 0 : i32
    %c0_i32_0 = arith.constant 0 : i32
    %c0_i32_1 = arith.constant 0 : i32
    return %c0_i32, %c0_i32_0 : i32, i32
  }
  func.func @transform_3(%arg0: i32) -> (i32, i32) {
    %c0_i32 = arith.constant 0 : i32
    %c0_i32_0 = arith.constant 0 : i32
    return %arg0, %c0_i32 : i32, i32
  }
  func.func @transform_4(%arg0: i32) -> (i32, i32, i32) {
    %c0_i32 = arith.constant 0 : i32
    %c0_i32_0 = arith.constant 0 : i32
    %c0_i32_1 = arith.constant 0 : i32
    return %arg0, %c0_i32, %c0_i32_0 : i32, i32, i32
  }
}

</mosaic_0001>

<bundles_post_ra>
// kernel: tpu_custom_call.1
= control target key start
LH: loop header
LB: loop body
LE: loop exit
PB: predicated region body
PF: predicated region fallthrough
CT: control target
= control target key end

     0   :  { %10 = vsyncpa [#allocation3], 0  ;;  %s7499_s0 = inlined_call_operand.vmem [shape: f32[1216,4], index: 0, kind: input, shape index: {}]   ;;  %s7500_s1 = inlined_call_operand.vmem [shape: bf16[9,4,8], index: 1, kind: input, shape index: {}]   ;;  %s7501_s2 = inlined_call_operand.vmem [shape: f32[512,8], index: 2, kind: input, shape index: {}]   ;;  %s7502_s3 = inlined_call_operand.vmem [shape: f32[1024,8], index: 3, kind: output, shape index: {0}]   ;;  %s7503_s4 = inlined_call_operand.hbm [shape: f32[2,2,8], index: 4, kind: output, shape index: {1}]  }
   0x1   :  { %12 = vsyncpa [#allocation3 + $0x1], 0  ;;  %s5440_s15 = smov 0   ;;  %s5442_s16 = smov 0  }
   0x2   :  { %s5444_s17 = smov 0   ;;  %s5446_s18 = smov 0  }
   0x3 LB: > { %s5461_s19 = sadd.s32 4294967295, %s5413_s18   ;;  %s4980_s20 = sadd.s32 4294967294, %s5413_s18   ;;  %s5413_s18 = sphi %s5446_s18, %s7509_s18   ;;  %s5409_s17 = sphi %s5444_s17, %s7508_s17   ;;  %s5405_s16 = sphi %s5442_s16, %s7507_s16   ;;  %s5401_s15 = sphi %s5440_s15, %s7506_s15  }
   0x4   : > { %s5465_s21 = sadd.s32 1, %s5413_s18   ;;  %s119_s22 = sadd.s32 1, %s5409_s17 }
   0x5   : > { %s116_s23 = ssub.s32 %s5413_s18, %s5465_s21  ;;  %p129_p0 = scmp.ne.s32.totalorder %s5409_s17, %s5405_s16 }
   0x6   : > { %p117_p1 = scmp.eq.s32.totalorder %s116_s23, 0  ;;  %p130_p2 = scmp.eq.s32.totalorder %s5461_s19, 1 }
   0x7   : > { %p135_p3 = scmp.ne.s32.totalorder %s5405_s16, %s5401_s15  ;;  %p136_p4 = scmp.eq.s32.totalorder %s4980_s20, 1 }
   0x8   : > { %s5476_s24 = scalar_select %p117_p1, %s5409_s17, %s119_s22  }
   0x9   : > { %p5478_p5 = por %p130_p2, %p129_p0  ;;  %p5482_p6 = por %p136_p4, %p135_p3 }
   0xa   : > { %p4983_p7 = scmp.ge.s32.totalorder %s5413_s18, 1  ;;  %p169_p8 = scmp.lt.s32.totalorder %s5413_s18, 3 }
   0xc   : > { %p170_p9 = pnand %p4983_p7, %p169_p8 }
   0xd   : > { %s200_s5 = smul.u32 (!%p170_p9), 76, %s5461_s19  ;;  %s4986_s13 = sshll.u32 (!%p170_p9), %s5461_s19, 6 }
   0xe   : > { %173 = sbr.rel (%p170_p9) target bundleno = 1334 (0x536), region = 32  ;;  %p207_p11 = scmp.lt.s32.totalorder (!%p170_p9), %s4986_s13, 127 }
   0xf   : > { %p201_p10 = scmp.lt.s32.totalorder (!%p170_p9), %s200_s5, 151  ;;  %s5309_s11 = sshll.u32 (!%p170_p9), %s5461_s19, 1 }
  0x10   : > { %s5371_s6 = scalar_lea.hbm (!%p170_p9), %s7503_s4, 4 }
  0x13   : > { %v4988_v0 = vld [vmem:[%s7500_s1 + $0x2] sm:$0x3]  ;;  %vm289_vm0 = vcmask 1041408   ;;  %v237_v1 = vld [vmem:[%s7500_s1] sm:$0x3]  ;;  %s7511_s5 = smov (!%p201_p10, %s200_s5), 151 }
  0x14   : > { %v291_v2 = vsel %vm289_vm0, %v4988_v0, 0  ;;  %v367_v3 = vsel %vm289_vm0, %v237_v1, 0  ;;  %v5005_v4 = vld [vmem:[%s7500_s1 + $0x4] sm:$0x3]  ;;  %v5014_v5 = vld [vmem:[%s7500_s1 + $0x6] sm:$0x3] }
  0x15   : > { %300 = vmatpush.bf16.msra.mxu0 %v291_v2  ;;  %376 = vmatpush.bf16.msra.mxu1 %v367_v3  ;;  %v469_v6 = vsel %vm289_vm0, %v5005_v4, 0  ;;  %v587_v7 = vsel %vm289_vm0, %v5014_v5, 0  ;;  %v5041_v8 = vld [vmem:[%s7500_s1 + $0xc] sm:$0x3]  ;;  %v5023_v10 = vld [vmem:[%s7500_s1 + $0x8] sm:$0x3] }
  0x16   : > { %478 = vmatpush.bf16.msra.mxu2 %v469_v6  ;;  %596 = vmatpush.bf16.msra.mxu3 %v587_v7  ;;  %v941_v9 = vsel %vm289_vm0, %v5041_v8, 0  ;;  %v5050_v11 = vld [vmem:[%s7500_s1 + $0xe] sm:$0x3]  ;;  %v705_v12 = vsel %vm289_vm0, %v5023_v10, 0  ;;  %v5032_v14 = vld [vmem:[%s7500_s1 + $0xa] sm:$0x3] }
  0x17   : > { %v1059_v13 = vsel %vm289_vm0, %v5050_v11, 0  ;;  %v823_v15 = vsel %vm289_vm0, %v5032_v14, 0  ;;  %s4985_s27 = sshll.u32 %s7511_s5, 3  ;;  %vm264_vm1 = vcmask 31744   ;;  %s7513_s13 = smov (!%p207_p11, %s4986_s13), 127  ;;  %vm1244_vm2 = vcmask 64512  }
  0x18   : > { %s5524_s30 = scalar_lea.vmem %s7499_s0, %s4985_s27  ;;  %s4987_s14 = sshll.u32 %s7513_s13, 3  ;;  %vm4868_vm3 = vcmask 57344  }
  0x19   : > { %714 = vmatpush.bf16.msrb.mxu0 %v705_v12  ;;  %832 = vmatpush.bf16.msrb.mxu1 %v823_v15  ;;  %v238_v16 = vld [vmem:[%s5524_s30 + $0x8] sm:$0xff]  ;;  %v239_v17 = vld [vmem:[%s5524_s30 + $0x10] sm:$0xff]  ;;  %v240_v28 = vld [vmem:[%s5524_s30 + $0x18] sm:$0xff]  ;;  %s6014_s23 = scalar_lea.vmem %s7502_s3, %s4987_s14  ;;  %s4891_s13 = scalar_lea.hbm %s7503_s4, %s5309_s11 }
  0x1a   : > { %950 = vmatpush.bf16.msrb.mxu2 %v941_v9  ;;  %1068 = vmatpush.bf16.msrb.mxu3 %v1059_v13  ;;  %v213_v18 = vld [vmem:[%s5524_s30 + $0x7] sm:$0xff]  ;;  %v254_v19 = vpack.c.bf16 %v239_v17, %v238_v16  ;;  %v214_v20 = vld [vmem:[%s5524_s30 + $0xf] sm:$0xff]  ;;  %v215_v30 = vld [vmem:[%s5524_s30 + $0x17] sm:$0xff]  ;;  %s4895_s22 = sshll.u32 %s4891_s13, 4  ;;  %s4896_s22 = int_to_ptr.hbm [resolvable:$true] %s4895_s22 }
  0x1b   : > { %v418_v21 = vld [vmem:[%s5524_s30 + $0x9] sm:$0xff]  ;;  %v419_v22 = vld [vmem:[%s5524_s30 + $0x11] sm:$0xff]  ;;  %v229_v23 = vpack.c.bf16 %v214_v20, %v213_v18  ;;  %v241_v29 = vld [vmem:[%s5524_s30 + $0x20] sm:$0xff]  ;;  %s5365_s27 = sshra.s32 %s4896_s22, 4  ;;  %s5366_s27 = int_to_ptr.hbm [resolvable:$true] %s5365_s27 }
  0x1c   : > { %v434_v24 = vpack.c.bf16 %v419_v22, %v418_v21  ;;  %v536_v25 = vld [vmem:[%s5524_s30 + $0x27] sm:$0xff]  ;;  %v537_v26 = vld [vmem:[%s5524_s30 + $0x2f] sm:$0xff]  ;;  %4989 = vmatmul.msk.bf16.vlgmr.msra.gmra.mxu0 %vm264_vm1, %v254_v19  ;;  %v216_v31 = vld [vmem:[%s5524_s30 + $0x1f] sm:$0xff]  ;;  %v255_v36 = vpack.c.bf16 %v241_v29, %v240_v28  ;;  %s5367_s28 = scalar_lea.hbm %s5366_s27, 2  ;;  %p5372_p1 = scmp.lt.s32.totalorder %s5366_s27, %s7503_s4 }
  0x1d   : > { %v552_v27 = vpack.c.bf16 %v537_v26, %v536_v25  ;;  %4997 = vmatmul.msk.bf16.vlgmr.msra.gmra.mxu1 %vm264_vm1, %v229_v23  ;;  %v420_v32 = vld [vmem:[%s5524_s30 + $0x19] sm:$0xff]  ;;  %v421_v33 = vld [vmem:[%s5524_s30 + $0x21] sm:$0xff]  ;;  %v230_v37 = vpack.c.bf16 %v216_v31, %v215_v30  ;;  %v243_v41 = vld [vmem:[%s5524_s30 + $0x30] sm:$0xff]  ;;  %p5368_p12 = scmp.ne.s32.totalorder %s5366_s27, %s5367_s28  ;;  %p5373_p2 = scmp.lt.s32.totalorder %s5371_s6, %s5367_s28 }
  0x1e   : > { %5006 = vmatmul.msk.bf16.vlgmr.msra.gmra.mxu2 %vm264_vm1, %v434_v24  ;;  %v538_v34 = vld [vmem:[%s5524_s30 + $0x37] sm:$0xff]  ;;  %v539_v35 = vld [vmem:[%s5524_s30 + $0x3f] sm:$0xff]  ;;  %v435_v38 = vpack.c.bf16 %v421_v33, %v420_v32  ;;  %v242_v40 = vld [vmem:[%s5524_s30 + $0x28] sm:$0xff] }
  0x1f   : > { %5015 = vmatmul.msk.bf16.vlgmr.msra.gmra.mxu3 %vm264_vm1, %v552_v27  ;;  %v553_v39 = vpack.c.bf16 %v539_v35, %v538_v34  ;;  %v422_v42 = vld [vmem:[%s5524_s30 + $0x29] sm:$0xff]  ;;  %v423_v43 = vld [vmem:[%s5524_s30 + $0x31] sm:$0xff]  ;;  %v5556_v46 = vpack.c.bf16 %v243_v41, %v242_v40  ;;  %v245_v50 = vld [vmem:[%s5524_s30 + $0x40] sm:$0xff]  ;;  %p5369_p13 = pnand %p5368_p12, %p5478_p5  ;;  %p5374_p3 = por %p5373_p2, %p5372_p1 }
  0x20   : > { %v540_v44 = vld [vmem:[%s5524_s30 + $0x47] sm:$0xff]  ;;  %v541_v45 = vld [vmem:[%s5524_s30 + $0x4f] sm:$0xff]  ;;  %v5558_v47 = vpack.c.bf16 %v423_v43, %v422_v42  ;;  %v244_v49 = vld [vmem:[%s5524_s30 + $0x38] sm:$0xff] }
  0x21   : > { %v5560_v48 = vpack.c.bf16 %v541_v45, %v540_v44  ;;  %v424_v51 = vld [vmem:[%s5524_s30 + $0x39] sm:$0xff]  ;;  %v425_v52 = vld [vmem:[%s5524_s30 + $0x41] sm:$0xff]  ;;  %v5575_v55 = vpack.c.bf16 %v245_v50, %v244_v49  ;;  %v247_v59 = vld [vmem:[%s5524_s30 + $0x50] sm:$0xff]  ;;  %p5370_p0 = pneg %p5369_p13 }
  0x22   : > { %v542_v53 = vld [vmem:[%s5524_s30 + $0x57] sm:$0xff]  ;;  %v543_v54 = vld [vmem:[%s5524_s30 + $0x5f] sm:$0xff]  ;;  %v5577_v56 = vpack.c.bf16 %v425_v52, %v424_v51  ;;  %v246_v58 = vld [vmem:[%s5524_s30 + $0x48] sm:$0xff] }
  0x23   : > { %v5579_v57 = vpack.c.bf16 %v543_v54, %v542_v53  ;;  %v426_v60 = vld [vmem:[%s5524_s30 + $0x49] sm:$0xff]  ;;  %v427_v61 = vld [vmem:[%s5524_s30 + $0x51] sm:$0xff]  ;;  %v5594_v0 = vpack.c.bf16 %v247_v59, %v246_v58  ;;  %v249_v4 = vld [vmem:[%s5524_s30 + $0x60] sm:$0xff]  ;;  %p5375_p4 = pnand %p5374_p3, %p5370_p0 }
  0x24   : > { %v544_v62 = vld [vmem:[%s5524_s30 + $0x67] sm:$0xff]  ;;  %v545_v63 = vld [vmem:[%s5524_s30 + $0x6f] sm:$0xff]  ;;  %v5596_v1 = vpack.c.bf16 %v427_v61, %v426_v60  ;;  %v248_v3 = vld [vmem:[%s5524_s30 + $0x58] sm:$0xff] }
  0x25   : > { %v5598_v2 = vpack.c.bf16 %v545_v63, %v544_v62  ;;  %v428_v5 = vld [vmem:[%s5524_s30 + $0x59] sm:$0xff]  ;;  %v429_v6 = vld [vmem:[%s5524_s30 + $0x61] sm:$0xff]  ;;  %v5614_v9 = vpack.c.bf16 %v249_v4, %v248_v3  ;;  %v251_v13 = vld [vmem:[%s5524_s30 + $0x70] sm:$0xff] }
  0x26   : > { %v546_v7 = vld [vmem:[%s5524_s30 + $0x77] sm:$0xff]  ;;  %v547_v8 = vld [vmem:[%s5524_s30 + $0x7f] sm:$0xff]  ;;  %v5616_v10 = vpack.c.bf16 %v429_v6, %v428_v5  ;;  %v250_v12 = vld [vmem:[%s5524_s30 + $0x68] sm:$0xff] }
  0x27   : > { %v5618_v11 = vpack.c.bf16 %v547_v8, %v546_v7  ;;  %v430_v14 = vld [vmem:[%s5524_s30 + $0x69] sm:$0xff]  ;;  %v431_v15 = vld [vmem:[%s5524_s30 + $0x71] sm:$0xff]  ;;  %v5634_v18 = vpack.c.bf16 %v251_v13, %v250_v12  ;;  %v1409_v21 = vld [vmem:[%s7500_s1] sm:$0x3] }
  0x28   : > { %v548_v16 = vld [vmem:[%s5524_s30 + $0x87] sm:$0xff]  ;;  %v549_v17 = vld [vmem:[%s5524_s30 + $0x8f] sm:$0xff]  ;;  %v5636_v19 = vpack.c.bf16 %v431_v15, %v430_v14  ;;  %v5085_v23 = vld [vmem:[%s7500_s1 + $0x4] sm:$0x3]  ;;  %v1536_v24 = vsel %vm289_vm0, %v1409_v21, 0 }
  0x29   : > { %v5638_v20 = vpack.c.bf16 %v549_v17, %v548_v16  ;;  %v5059_v22 = vld [vmem:[%s7500_s1 + $0x10] sm:$0x3]  ;;  %v1637_v26 = vsel %vm289_vm0, %v5085_v23, 0  ;;  %1545 = vmatpush.bf16.msra.mxu2 %v1536_v24  ;;  %v252_v29 = vld [vmem:[%s5524_s30 + $0x78] sm:$0xff]  ;;  %v253_v30 = vld [vmem:[%s5524_s30 + $0x80] sm:$0xff] }
  0x2a   : > { %v1177_v25 = vsel %vm289_vm0, %v5059_v22, 0  ;;  %1646 = vmatpush.bf16.msra.mxu3 %v1637_v26  ;;  %v432_v31 = vld [vmem:[%s5524_s30 + $0x79] sm:$0xff]  ;;  %v433_v32 = vld [vmem:[%s5524_s30 + $0x81] sm:$0xff]  ;;  %v5670_v35 = vpack.c.bf16 %v253_v30, %v252_v29 }
  0x2b   : > { %1186 = vmatpush.bf16.msra.mxu0 %v1177_v25  ;;  %v550_v33 = vld [vmem:[%s5524_s30 + $0x97] sm:$0xff]  ;;  %v551_v34 = vld [vmem:[%s5524_s30 + $0x9f] sm:$0xff] }
  0x2c   : > { %4990 = vmatmul.msk.bf16.gmra.mxu0 %vm264_vm1, %v255_v36  ;;  %v5672_v36 = vpack.c.bf16 %v433_v32, %v432_v31 }
  0x2d   : > { %4998 = vmatmul.msk.bf16.gmra.mxu1 %vm264_vm1, %v230_v37  ;;  %v5674_v37 = vpack.c.bf16 %v551_v34, %v550_v33  ;;  %v1016_v33 = vld [vmem:[%s5524_s30 + $0x88] sm:$0xff]  ;;  %v1017_v34 = vld [vmem:[%s5524_s30 + $0x90] sm:$0xff] }
  0x2e   : > { %5007 = vmatmul.msk.bf16.gmra.mxu2 %vm264_vm1, %v435_v38 }
  0x2f   : > { %5016 = vmatmul.msk.bf16.gmra.mxu3 %vm264_vm1, %v553_v39 }
  0x3c   : > { %4991 = vmatmul.msk.bf16.gmra.mxu0 %vm264_vm1, %v5556_v46 }
  0x3d   : > { %4999 = vmatmul.msk.bf16.gmra.mxu1 %vm264_vm1, %v552_v27  ;;  %v5068_v27 = vld [vmem:[%s7500_s1 + $0x2] sm:$0x3] }
  0x3e   : > { %5008 = vmatmul.msk.bf16.gmra.mxu2 %vm264_vm1, %v5558_v47  ;;  %v1460_v28 = vsel %vm289_vm0, %v5068_v27, 0 }
  0x3f   : > { %5017 = vmatmul.msk.bf16.gmra.mxu3 %vm264_vm1, %v5560_v48  ;;  %1469 = vmatpush.bf16.msra.mxu1 %v1460_v28 }
  0x4c   : > { %4992 = vmatmul.msk.bf16.gmra.mxu0 %vm264_vm1, %v5575_v55 }
  0x4d   : > { %5000 = vmatmul.msk.bf16.gmra.mxu1 %vm264_vm1, %v553_v39 }
  0x4e   : > { %5009 = vmatmul.msk.bf16.gmra.mxu2 %vm264_vm1, %v5577_v56 }
  0x4f   : > { %5018 = vmatmul.msk.bf16.gmra.mxu3 %vm264_vm1, %v5579_v57 }
  0x5c   : > { %4993 = vmatmul.msk.bf16.gmra.mxu0 %vm264_vm1, %v5594_v0 }
  0x5d   : > { %5001 = vmatmul.msk.bf16.gmra.mxu1 %vm264_vm1, %v5560_v48 }
  0x5e   : > { %5010 = vmatmul.msk.bf16.gmra.mxu2 %vm264_vm1, %v5596_v1 }
  0x5f   : > { %5019 = vmatmul.msk.bf16.gmra.mxu3 %vm264_vm1, %v5598_v2 }
  0x6c   : > { %4994 = vmatmul.msk.bf16.gmra.mxu0 %vm264_vm1, %v5614_v9 }
  0x6d   : > { %5002 = vmatmul.msk.bf16.gmra.mxu1 %vm264_vm1, %v5579_v57 }
  0x6e   : > { %5011 = vmatmul.msk.bf16.gmra.mxu2 %vm264_vm1, %v5616_v10 }
  0x6f   : > { %5020 = vmatmul.msk.bf16.gmra.mxu3 %vm264_vm1, %v5618_v11 }
  0x7c   : > { %4995 = vmatmul.msk.bf16.gmra.mxu0 %vm264_vm1, %v5634_v18 }
  0x7d   : > { %5003 = vmatmul.msk.bf16.gmra.mxu1 %vm264_vm1, %v5598_v2 }
  0x7e   : > { %5012 = vmatmul.msk.bf16.gmra.mxu2 %vm264_vm1, %v5636_v19 }
  0x7f   : > { %5021 = vmatmul.msk.bf16.gmra.mxu3 %vm264_vm1, %v5638_v20 }
  0x8c   : > { %4996 = vmatmul.msk.bf16.gmra.mxu0 %vm264_vm1, %v5670_v35 }
  0x8d   : > { %5004 = vmatmul.msk.bf16.gmra.mxu1 %vm264_vm1, %v5618_v11 }
  0x8e   : > { %5013 = vmatmul.msk.bf16.gmra.mxu2 %vm264_vm1, %v5672_v36 }
  0x8f   : > { %5022 = vmatmul.msk.bf16.gmra.mxu3 %vm264_vm1, %v5674_v37 }
  0x99   : > { %v302_v38 = vpop.f32.mrf.mxu0 }
  0x9a   : > { %v378_v39 = vpop.f32.mrf.mxu1 }
  0x9b   : > { %v379_v40 = vadd.f32 %v378_v39, %v302_v38 }
  0x9c   : > { %5024 = vmatmul.msk.bf16.vlgmr.msrb.gmra.mxu0 %vm264_vm1, %v5556_v46 }
  0x9d   : > { %5033 = vmatmul.msk.bf16.vlgmr.msrb.gmra.mxu1 %vm264_vm1, %v5558_v47 }
  0x9e   : > { %5042 = vmatmul.msk.bf16.vlgmr.msrb.gmra.mxu2 %vm264_vm1, %v5560_v48 }
  0x9f   : > { %5051 = vmatmul.msk.bf16.vlgmr.msrb.gmra.mxu3 %vm264_vm1, %v5594_v0 }
  0xa1   : > { %v480_v41 = vpop.f32.mrf.mxu2  ;;  %v304_v44 = vpop.f32.mrf.mxu0 }
  0xa2   : > { %v520_v42 = vadd.f32 %v480_v41, %v379_v40  ;;  %v598_v43 = vpop.f32.mrf.mxu3  ;;  %v380_v45 = vpop.f32.mrf.mxu1 }
  0xa3   : > { %v381_v50 = vadd.f32 %v380_v45, %v304_v44 }
  0xa4   : > { %v5692_v49 = vadd.f32 %v598_v43, %v520_v42 }
  0xa9   : > { %v482_v51 = vpop.f32.mrf.mxu2  ;;  %v307_v53 = vpop.f32.mrf.mxu0 }
  0xaa   : > { %v521_v52 = vadd.f32 %v482_v51, %v381_v50  ;;  %v600_v46 = vpop.f32.mrf.mxu3  ;;  %v383_v54 = vpop.f32.mrf.mxu1 }
  0xab   : > { %v384_v58 = vadd.f32 %v383_v54, %v307_v53  ;;  %v1018_v54 = vld [vmem:[%s5524_s30 + $0x98] sm:$0xff] }
  0xac   : > { %v5694_v47 = vadd.f32 %v600_v46, %v521_v52  ;;  %5025 = vmatmul.msk.bf16.gmra.mxu0 %vm264_vm1, %v5575_v55 }
  0xad   : > { %5034 = vmatmul.msk.bf16.gmra.mxu1 %vm264_vm1, %v5577_v56 }
  0xae   : > { %5043 = vmatmul.msk.bf16.gmra.mxu2 %vm264_vm1, %v5579_v57 }
  0xaf   : > { %5052 = vmatmul.msk.bf16.gmra.mxu3 %vm264_vm1, %v5614_v9 }
  0xb1   : > { %v485_v48 = vpop.f32.mrf.mxu2  ;;  %v309_v61 = vpop.f32.mrf.mxu0 }
  0xb2   : > { %v522_v59 = vadd.f32 %v485_v48, %v384_v58  ;;  %v603_v60 = vpop.f32.mrf.mxu3  ;;  %v385_v62 = vpop.f32.mrf.mxu1  ;;  %v1019_v58 = vld [vmem:[%s5524_s30 + $0xa0] sm:$0xff] }
  0xb3   : > { %v386_v3 = vadd.f32 %v385_v62, %v309_v61  ;;  %v5748_v62 = vpack.c.bf16 %v1019_v58, %v1018_v54  ;;  %v786_v54 = vld [vmem:[%s5524_s30 + $0x99] sm:$0xff]  ;;  %v787_v58 = vld [vmem:[%s5524_s30 + $0xa1] sm:$0xff] }
  0xb4   : > { %v5704_v63 = vadd.f32 %v603_v60, %v522_v59 }
  0xb9   : > { %v487_v4 = vpop.f32.mrf.mxu2  ;;  %v312_v6 = vpop.f32.mrf.mxu0 }
  0xba   : > { %v523_v5 = vadd.f32 %v487_v4, %v386_v3  ;;  %v605_v55 = vpop.f32.mrf.mxu3  ;;  %v388_v7 = vpop.f32.mrf.mxu1 }
  0xbb   : > { %v389_v8 = vadd.f32 %v388_v7, %v312_v6 }
  0xbc   : > { %v5706_v56 = vadd.f32 %v605_v55, %v523_v5  ;;  %5026 = vmatmul.msk.bf16.gmra.mxu0 %vm264_vm1, %v5594_v0 }
  0xbd   : > { %5035 = vmatmul.msk.bf16.gmra.mxu1 %vm264_vm1, %v5596_v1 }
  0xbe   : > { %5044 = vmatmul.msk.bf16.gmra.mxu2 %vm264_vm1, %v5598_v2 }
  0xbf   : > { %5053 = vmatmul.msk.bf16.gmra.mxu3 %vm264_vm1, %v5634_v18 }
  0xc1   : > { %v490_v57 = vpop.f32.mrf.mxu2  ;;  %v314_v14 = vpop.f32.mrf.mxu0 }
  0xc2   : > { %v524_v12 = vadd.f32 %v490_v57, %v389_v8  ;;  %v608_v13 = vpop.f32.mrf.mxu3  ;;  %v390_v15 = vpop.f32.mrf.mxu1 }
  0xc3   : > { %v391_v17 = vadd.f32 %v390_v15, %v314_v14  ;;  %v902_v14 = vld [vmem:[%s5524_s30 + $0xa7] sm:$0xff]  ;;  %v903_v15 = vld [vmem:[%s5524_s30 + $0xaf] sm:$0xff] }
  0xc4   : > { %v5716_v16 = vadd.f32 %v608_v13, %v524_v12  ;;  %v784_v13 = vld [vmem:[%s5524_s30 + $0x89] sm:$0xff] }
  0xc9   : > { %v492_v21 = vpop.f32.mrf.mxu2  ;;  %v317_v23 = vpop.f32.mrf.mxu0 }
  0xca   : > { %v525_v22 = vadd.f32 %v492_v21, %v391_v17  ;;  %v610_v0 = vpop.f32.mrf.mxu3  ;;  %v393_v24 = vpop.f32.mrf.mxu1  ;;  %v1020_v17 = vld [vmem:[%s5524_s30 + $0xa8] sm:$0xff]  ;;  %v1021_v21 = vld [vmem:[%s5524_s30 + $0xb0] sm:$0xff] }
  0xcb   : > { %v394_v2 = vadd.f32 %v393_v24, %v317_v23 }
  0xcc   : > { %v5718_v25 = vadd.f32 %v610_v0, %v525_v22  ;;  %5027 = vmatmul.msk.bf16.gmra.mxu0 %vm264_vm1, %v5614_v9 }
  0xcd   : > { %5036 = vmatmul.msk.bf16.gmra.mxu1 %vm264_vm1, %v5616_v10 }
  0xce   : > { %5045 = vmatmul.msk.bf16.gmra.mxu2 %vm264_vm1, %v5618_v11  ;;  %v5732_v11 = vpack.c.bf16 %v1017_v34, %v1016_v33  ;;  %v5094_v33 = vld [vmem:[%s7500_s1 + $0x6] sm:$0x3]  ;;  %v5121_v34 = vld [vmem:[%s7500_s1 + $0xc] sm:$0x3] }
  0xcf   : > { %5054 = vmatmul.msk.bf16.gmra.mxu3 %vm264_vm1, %v5670_v35 }
  0xd1   : > { %v495_v26 = vpop.f32.mrf.mxu2  ;;  %v319_v29 = vpop.f32.mrf.mxu0 }
  0xd2   : > { %v526_v27 = vadd.f32 %v495_v26, %v394_v2  ;;  %v613_v28 = vpop.f32.mrf.mxu3  ;;  %v395_v30 = vpop.f32.mrf.mxu1  ;;  %v5770_v26 = vpack.c.bf16 %v903_v15, %v902_v14 }
  0xd3   : > { %v396_v32 = vadd.f32 %v395_v30, %v319_v29 }
  0xd4   : > { %v5728_v31 = vadd.f32 %v613_v28, %v526_v27  ;;  %v5772_v28 = vpack.c.bf16 %v1021_v21, %v1020_v17 }
  0xd9   : > { %v497_v9 = vpop.f32.mrf.mxu2  ;;  %v322_v40 = vpop.f32.mrf.mxu0 }
  0xda   : > { %v527_v38 = vadd.f32 %v497_v9, %v396_v32  ;;  %v615_v39 = vpop.f32.mrf.mxu3  ;;  %v398_v41 = vpop.f32.mrf.mxu1  ;;  %v5112_v32 = vld [vmem:[%s7500_s1 + $0xa] sm:$0x3] }
  0xdb   : > { %v399_v43 = vadd.f32 %v398_v41, %v322_v40  ;;  %v1988_v9 = vsel %vm289_vm0, %v5112_v32, 0 }
  0xdc   : > { %v5734_v42 = vadd.f32 %v615_v39, %v527_v38  ;;  %5028 = vmatmul.msk.bf16.gmra.mxu0 %vm264_vm1, %v5634_v18  ;;  %v1754_v38 = vsel %vm289_vm0, %v5094_v33, 0  ;;  %v2105_v39 = vsel %vm289_vm0, %v5121_v34, 0  ;;  %1997 = vmatpush.bf16.msrb.mxu2 %v1988_v9 }
  0xdd   : > { %5037 = vmatmul.msk.bf16.gmra.mxu1 %vm264_vm1, %v5636_v19  ;;  %1763 = vmatpush.bf16.msrb.mxu0 %v1754_v38 }
  0xde   : > { %5046 = vmatmul.msk.bf16.gmra.mxu2 %vm264_vm1, %v5638_v20  ;;  %2114 = vmatpush.bf16.msrb.mxu3 %v2105_v39 }
  0xdf   : > { %5055 = vmatmul.msk.bf16.gmra.mxu3 %vm264_vm1, %v5732_v11 }
  0xe1   : > { %v500_v44 = vpop.f32.mrf.mxu2  ;;  %v324_v51 = vpop.f32.mrf.mxu0 }
  0xe2   : > { %v528_v45 = vadd.f32 %v500_v44, %v399_v43  ;;  %v618_v50 = vpop.f32.mrf.mxu3  ;;  %v400_v52 = vpop.f32.mrf.mxu1 }
  0xe3   : > { %v401_v53 = vadd.f32 %v400_v52, %v324_v51  ;;  %v5103_v52 = vld [vmem:[%s7500_s1 + $0x8] sm:$0x3] }
  0xe4   : > { %v5744_v46 = vadd.f32 %v618_v50, %v528_v45 }
  0xe9   : > { %v502_v18 = vpop.f32.mrf.mxu2  ;;  %v327_v60 = vpop.f32.mrf.mxu0 }
  0xea   : > { %v529_v48 = vadd.f32 %v502_v18, %v401_v53  ;;  %v620_v59 = vpop.f32.mrf.mxu3  ;;  %v403_v61 = vpop.f32.mrf.mxu1  ;;  %v1871_v53 = vsel %vm289_vm0, %v5103_v52, 0  ;;  %v904_v18 = vld [vmem:[%s5524_s30 + $0xb7] sm:$0xff] }
  0xeb   : > { %v404_v4 = vadd.f32 %v403_v61, %v327_v60  ;;  %1880 = vmatpush.bf16.msrb.mxu1 %v1871_v53  ;;  %v1023_v60 = vld [vmem:[%s5524_s30 + $0xc0] sm:$0xff] }
  0xec   : > { %v5750_v3 = vadd.f32 %v620_v59, %v529_v48  ;;  %5029 = vmatmul.msk.bf16.gmra.mxu0 %vm264_vm1, %v5670_v35  ;;  %v785_v35 = vld [vmem:[%s5524_s30 + $0x91] sm:$0xff]  ;;  %v905_v48 = vld [vmem:[%s5524_s30 + $0xbf] sm:$0xff] }
  0xed   : > { %5038 = vmatmul.msk.bf16.gmra.mxu1 %vm264_vm1, %v5672_v36  ;;  %v5768_v2 = vpack.c.bf16 %v785_v35, %v784_v13  ;;  %v1022_v59 = vld [vmem:[%s5524_s30 + $0xb8] sm:$0xff] }
  0xee   : > { %5047 = vmatmul.msk.bf16.gmra.mxu2 %vm264_vm1, %v5674_v37 }
  0xef   : > { %5056 = vmatmul.msk.bf16.gmra.mxu3 %vm264_vm1, %v5748_v62 }
  0xf1   : > { %v505_v5 = vpop.f32.mrf.mxu2  ;;  %v329_v7 = vpop.f32.mrf.mxu0 }
  0xf2   : > { %v530_v55 = vadd.f32 %v505_v5, %v404_v4  ;;  %v623_v6 = vpop.f32.mrf.mxu3  ;;  %v405_v8 = vpop.f32.mrf.mxu1 }
  0xf3   : > { %v406_v12 = vadd.f32 %v405_v8, %v329_v7  ;;  %v5810_v7 = vpack.c.bf16 %v905_v48, %v904_v18 }
  0xf4   : > { %v5760_v57 = vadd.f32 %v623_v6, %v530_v55  ;;  %v5808_v6 = vpack.c.bf16 %v787_v58, %v786_v54 }
  0xf9   : > { %v507_v22 = vpop.f32.mrf.mxu2  ;;  %v332_v24 = vpop.f32.mrf.mxu0 }
  0xfa   : > { %v531_v0 = vadd.f32 %v507_v22, %v406_v12  ;;  %v625_v23 = vpop.f32.mrf.mxu3  ;;  %v408_v27 = vpop.f32.mrf.mxu1  ;;  %v5812_v12 = vpack.c.bf16 %v1023_v60, %v1022_v59 }
  0xfb   : > { %v409_v30 = vadd.f32 %v408_v27, %v332_v24 }
  0xfc   : > { %v5774_v29 = vadd.f32 %v625_v23, %v531_v0  ;;  %5030 = vmatmul.msk.bf16.gmra.mxu0 %vm264_vm1, %v5732_v11 }
  0xfd   : > { %5039 = vmatmul.msk.bf16.gmra.mxu1 %vm264_vm1, %v5768_v2 }
  0xfe   : > { %5048 = vmatmul.msk.bf16.gmra.mxu2 %vm264_vm1, %v5770_v26 }
  0xff   : > { %5057 = vmatmul.msk.bf16.gmra.mxu3 %vm264_vm1, %v5772_v28 }
 0x101   : > { %v510_v40 = vpop.f32.mrf.mxu2  ;;  %v334_v44 = vpop.f32.mrf.mxu0 }
 0x102   : > { %v532_v41 = vadd.f32 %v510_v40, %v409_v30  ;;  %v628_v43 = vpop.f32.mrf.mxu3  ;;  %v410_v45 = vpop.f32.mrf.mxu1 }
 0x103   : > { %v411_v51 = vadd.f32 %v410_v45, %v334_v44 }
 0x104   : > { %v5796_v50 = vadd.f32 %v628_v43, %v532_v41 }
 0x109   : > { %v512_v61 = vpop.f32.mrf.mxu2  ;;  %v337_v55 = vpop.f32.mrf.mxu0 }
 0x10a   : > { %v533_v4 = vadd.f32 %v512_v61, %v411_v51  ;;  %v630_v5 = vpop.f32.mrf.mxu3  ;;  %v413_v8 = vpop.f32.mrf.mxu1 }
 0x10b   : > { %v414_v35 = vadd.f32 %v413_v8, %v337_v55  ;;  %v1592_v55 = vld [vmem:[%s5524_s30 + $0xb1] sm:$0xff] }
 0x10c   : > { %v5814_v13 = vadd.f32 %v630_v5, %v533_v4  ;;  %5031 = vmatmul.msk.bf16.gmra.mxu0 %vm264_vm1, %v5748_v62 }
 0x10d   : > { %5040 = vmatmul.msk.bf16.gmra.mxu1 %vm264_vm1, %v5808_v6 }
 0x10e   : > { %5049 = vmatmul.msk.bf16.gmra.mxu2 %vm264_vm1, %v5810_v7 }
 0x10f   : > { %5058 = vmatmul.msk.bf16.gmra.mxu3 %vm264_vm1, %v5812_v12 }
 0x111   : > { %v515_v14 = vpop.f32.mrf.mxu2  ;;  %v339_v21 = vpop.f32.mrf.mxu0 }
 0x112   : > { %v534_v15 = vadd.f32 %v515_v14, %v414_v35  ;;  %v633_v17 = vpop.f32.mrf.mxu3  ;;  %v415_v22 = vpop.f32.mrf.mxu1 }
 0x113   : > { %v416_v23 = vadd.f32 %v415_v22, %v339_v21 }
 0x114   : > { %v5824_v0 = vadd.f32 %v633_v17, %v534_v15 }
 0x119   : > { %v517_v24 = vpop.f32.mrf.mxu2  ;;  %v716_v32 = vpop.f32.mrf.mxu0 }
 0x11a   : > { %v535_v27 = vadd.f32 %v517_v24, %v416_v23  ;;  %v635_v30 = vpop.f32.mrf.mxu3  ;;  %v756_v33 = vadd.f32 %v716_v32, %v5692_v49  ;;  %v834_v34 = vpop.f32.mrf.mxu1 }
 0x11c   : > { %v5827_v9 = vadd.f32 %v635_v30, %v535_v27  ;;  %v874_v38 = vadd.f32 %v834_v34, %v756_v33  ;;  %5060 = vmatmul.msk.bf16.vlgmr.msra.gmra.mxu0 %vm264_vm1, %v5596_v1  ;;  %v1594_v34 = vld [vmem:[%s5524_s30 + $0xc1] sm:$0xff] }
 0x11d   : > { %5069 = vmatmul.msk.bf16.vlgmr.msra.gmra.mxu1 %vm264_vm1, %v5732_v11 }
 0x11e   : > { %5077 = vmatmul.msk.bf16.vlgmr.msra.gmra.mxu2 %vm264_vm1, %v5638_v20 }
 0x11f   : > { %5086 = vmatmul.msk.bf16.vlgmr.msra.gmra.mxu3 %vm264_vm1, %v5768_v2 }
 0x121   : > { %v952_v39 = vpop.f32.mrf.mxu2  ;;  %v718_v49 = vpop.f32.mrf.mxu0 }
 0x122   : > { %v992_v40 = vadd.f32 %v952_v39, %v874_v38  ;;  %v1070_v41 = vpop.f32.mrf.mxu3  ;;  %v757_v43 = vadd.f32 %v718_v49, %v5694_v47  ;;  %v836_v44 = vpop.f32.mrf.mxu1 }
 0x124   : > { %v5838_v45 = vadd.f32 %v1070_v41, %v992_v40  ;;  %v875_v51 = vadd.f32 %v836_v44, %v757_v43 }
 0x129   : > { %v954_v1 = vpop.f32.mrf.mxu2  ;;  %v721_v11 = vpop.f32.mrf.mxu0 }
 0x12a   : > { %v993_v52 = vadd.f32 %v954_v1, %v875_v51  ;;  %v1072_v53 = vpop.f32.mrf.mxu3  ;;  %v758_v54 = vadd.f32 %v721_v11, %v5704_v63  ;;  %v839_v20 = vpop.f32.mrf.mxu1 }
 0x12c   : > { %v5841_v58 = vadd.f32 %v1072_v53, %v993_v52  ;;  %v876_v18 = vadd.f32 %v839_v20, %v758_v54  ;;  %5061 = vmatmul.msk.bf16.gmra.mxu0 %vm264_vm1, %v5616_v10  ;;  %v1591_v10 = vld [vmem:[%s5524_s30 + $0xa9] sm:$0xff] }
 0x12d   : > { %5070 = vmatmul.msk.bf16.gmra.mxu1 %vm264_vm1, %v5748_v62  ;;  %v5857_v17 = vpack.c.bf16 %v1592_v55, %v1591_v10 }
 0x12e   : > { %5078 = vmatmul.msk.bf16.gmra.mxu2 %vm264_vm1, %v5674_v37 }
 0x12f   : > { %5087 = vmatmul.msk.bf16.gmra.mxu3 %vm264_vm1, %v5808_v6 }
 0x131   : > { %v957_v47 = vpop.f32.mrf.mxu2  ;;  %v723_v59 = vpop.f32.mrf.mxu0 }
 0x132   : > { %v994_v63 = vadd.f32 %v957_v47, %v876_v18  ;;  %v1075_v48 = vpop.f32.mrf.mxu3  ;;  %v759_v60 = vadd.f32 %v723_v59, %v5706_v56  ;;  %v841_v61 = vpop.f32.mrf.mxu1  ;;  %v1418_v18 = vld [vmem:[%s5524_s30 + $0xc8] sm:$0xff]  ;;  %v1419_v47 = vld [vmem:[%s5524_s30 + $0xd0] sm:$0xff] }
 0x133   : > { %v1595_v59 = vld [vmem:[%s5524_s30 + $0xc9] sm:$0xff] }
 0x134   : > { %v5852_v4 = vadd.f32 %v1075_v48, %v994_v63  ;;  %v877_v5 = vadd.f32 %v841_v61, %v759_v60  ;;  %v1393_v63 = vld [vmem:[%s5524_s30 + $0xc7] sm:$0xff]  ;;  %v1394_v48 = vld [vmem:[%s5524_s30 + $0xcf] sm:$0xff] }
 0x135   : > { %v1596_v60 = vld [vmem:[%s5524_s30 + $0xd1] sm:$0xff] }
 0x139   : > { %v959_v8 = vpop.f32.mrf.mxu2  ;;  %v726_v14 = vpop.f32.mrf.mxu0 }
 0x13a   : > { %v995_v62 = vadd.f32 %v959_v8, %v877_v5  ;;  %v1077_v35 = vpop.f32.mrf.mxu3  ;;  %v760_v37 = vadd.f32 %v726_v14, %v5716_v16  ;;  %v844_v15 = vpop.f32.mrf.mxu1  ;;  %v5896_v8 = vpack.c.bf16 %v1419_v47, %v1418_v18  ;;  %v5901_v14 = vpack.c.bf16 %v1596_v60, %v1595_v59  ;;  %v1422_v59 = vld [vmem:[%s5524_s30 + $0xe8] sm:$0xff]  ;;  %v1423_v60 = vld [vmem:[%s5524_s30 + $0xf0] sm:$0xff] }
 0x13c   : > { %v5859_v21 = vadd.f32 %v1077_v35, %v995_v62  ;;  %v878_v56 = vadd.f32 %v844_v15, %v760_v37  ;;  %5062 = vmatmul.msk.bf16.gmra.mxu0 %vm264_vm1, %v5636_v19  ;;  %v1593_v19 = vld [vmem:[%s5524_s30 + $0xb9] sm:$0xff]  ;;  %v5898_v62 = vpack.c.bf16 %v1394_v48, %v1393_v63 }
 0x13d   : > { %5071 = vmatmul.msk.bf16.gmra.mxu1 %vm264_vm1, %v5772_v28  ;;  %v5875_v44 = vpack.c.bf16 %v1594_v34, %v1593_v19  ;;  %v1395_v19 = vld [vmem:[%s5524_s30 + $0xd7] sm:$0xff]  ;;  %v1396_v34 = vld [vmem:[%s5524_s30 + $0xdf] sm:$0xff] }
 0x13e   : > { %5079 = vmatmul.msk.bf16.gmra.mxu2 %vm264_vm1, %v5770_v26 }
 0x13f   : > { %5088 = vmatmul.msk.bf16.gmra.mxu3 %vm264_vm1, %v5857_v17 }
 0x141   : > { %v962_v16 = vpop.f32.mrf.mxu2  ;;  %v728_v24 = vpop.f32.mrf.mxu0 }
 0x142   : > { %v996_v22 = vadd.f32 %v962_v16, %v878_v56  ;;  %v1080_v23 = vpop.f32.mrf.mxu3  ;;  %v761_v27 = vadd.f32 %v728_v24, %v5718_v25  ;;  %v846_v30 = vpop.f32.mrf.mxu1 }
 0x144   : > { %v5870_v32 = vadd.f32 %v1080_v23, %v996_v22  ;;  %v879_v33 = vadd.f32 %v846_v30, %v761_v27  ;;  %v1420_v30 = vld [vmem:[%s5524_s30 + $0xd8] sm:$0xff] }
 0x149   : > { %v964_v38 = vpop.f32.mrf.mxu2  ;;  %v731_v41 = vpop.f32.mrf.mxu0 }
 0x14a   : > { %v997_v39 = vadd.f32 %v964_v38, %v879_v33  ;;  %v1082_v40 = vpop.f32.mrf.mxu3  ;;  %v762_v49 = vadd.f32 %v731_v41, %v5728_v31  ;;  %v849_v43 = vpop.f32.mrf.mxu1  ;;  %v1421_v33 = vld [vmem:[%s5524_s30 + $0xe0] sm:$0xff] }
 0x14b   : > { %v1597_v38 = vld [vmem:[%s5524_s30 + $0xd9] sm:$0xff] }
 0x14c   : > { %v5877_v51 = vadd.f32 %v1082_v40, %v997_v39  ;;  %v880_v25 = vadd.f32 %v849_v43, %v762_v49  ;;  %5063 = vmatmul.msk.bf16.gmra.mxu0 %vm264_vm1, %v5672_v36  ;;  %v1598_v39 = vld [vmem:[%s5524_s30 + $0xe1] sm:$0xff] }
 0x14d   : > { %5072 = vmatmul.msk.bf16.gmra.mxu1 %vm264_vm1, %v5812_v12 }
 0x14e   : > { %5080 = vmatmul.msk.bf16.gmra.mxu2 %vm264_vm1, %v5810_v7 }
 0x14f   : > { %5089 = vmatmul.msk.bf16.gmra.mxu3 %vm264_vm1, %v5875_v44 }
 0x151   : > { %v967_v31 = vpop.f32.mrf.mxu2  ;;  %v733_v53 = vpop.f32.mrf.mxu0 }
 0x152   : > { %v998_v1 = vadd.f32 %v967_v31, %v880_v25  ;;  %v1085_v52 = vpop.f32.mrf.mxu3  ;;  %v763_v11 = vadd.f32 %v733_v53, %v5734_v42  ;;  %v851_v54 = vpop.f32.mrf.mxu1  ;;  %v5922_v25 = vpack.c.bf16 %v1421_v33, %v1420_v30  ;;  %v5924_v31 = vpack.c.bf16 %v1396_v34, %v1395_v19  ;;  %v5130_v33 = vld [vmem:[%s7500_s1 + $0xe] sm:$0x3]  ;;  %v2570_v19 = vld [vmem:[%s7500_s1] sm:$0x3] }
 0x154   : > { %v5888_v20 = vadd.f32 %v1085_v52, %v998_v1  ;;  %v881_v36 = vadd.f32 %v851_v54, %v763_v11  ;;  %v5927_v52 = vpack.c.bf16 %v1598_v39, %v1597_v38 }
 0x159   : > { %v969_v61 = vpop.f32.mrf.mxu2  ;;  %v736_v55 = vpop.f32.mrf.mxu0 }
 0x15a   : > { %v999_v5 = vadd.f32 %v969_v61, %v881_v36  ;;  %v1087_v10 = vpop.f32.mrf.mxu3  ;;  %v764_v42 = vadd.f32 %v736_v55, %v5744_v46  ;;  %v854_v35 = vpop.f32.mrf.mxu1  ;;  %v1397_v61 = vld [vmem:[%s5524_s30 + $0xe7] sm:$0xff]  ;;  %v1600_v55 = vld [vmem:[%s5524_s30 + $0xf1] sm:$0xff] }
 0x15c   : > { %v5903_v37 = vadd.f32 %v1087_v10, %v999_v5  ;;  %v882_v15 = vadd.f32 %v854_v35, %v764_v42  ;;  %5064 = vmatmul.msk.bf16.gmra.mxu0 %vm264_vm1, %v5768_v2  ;;  %v1398_v5 = vld [vmem:[%s5524_s30 + $0xef] sm:$0xff] }
 0x15d   : > { %5073 = vmatmul.msk.bf16.gmra.mxu1 %vm264_vm1, %v5896_v8  ;;  %v1599_v10 = vld [vmem:[%s5524_s30 + $0xe9] sm:$0xff] }
 0x15e   : > { %5081 = vmatmul.msk.bf16.gmra.mxu2 %vm264_vm1, %v5898_v62 }
 0x15f   : > { %5090 = vmatmul.msk.bf16.gmra.mxu3 %vm264_vm1, %v5901_v14 }
 0x161   : > { %v972_v46 = vpop.f32.mrf.mxu2  ;;  %v738_v22 = vpop.f32.mrf.mxu0 }
 0x162   : > { %v1000_v56 = vadd.f32 %v972_v46, %v882_v15  ;;  %v1090_v16 = vpop.f32.mrf.mxu3  ;;  %v765_v23 = vadd.f32 %v738_v22, %v5750_v3  ;;  %v856_v24 = vpop.f32.mrf.mxu1 }
 0x164   : > { %v5914_v27 = vadd.f32 %v1090_v16, %v1000_v56  ;;  %v883_v2 = vadd.f32 %v856_v24, %v765_v23  ;;  %v5948_v56 = vpack.c.bf16 %v1423_v60, %v1422_v59  ;;  %v5950_v16 = vpack.c.bf16 %v1398_v5, %v1397_v61 }
 0x165   : > { %v5953_v23 = vpack.c.bf16 %v1600_v55, %v1599_v10 }
 0x169   : > { %v974_v40 = vpop.f32.mrf.mxu2  ;;  %v741_v43 = vpop.f32.mrf.mxu0 }
 0x16a   : > { %v1001_v41 = vadd.f32 %v974_v40, %v883_v2  ;;  %v1092_v49 = vpop.f32.mrf.mxu3  ;;  %v766_v3 = vadd.f32 %v741_v43, %v5760_v57  ;;  %v859_v1 = vpop.f32.mrf.mxu1 }
 0x16c   : > { %v5929_v53 = vadd.f32 %v1092_v49, %v1001_v41  ;;  %v884_v11 = vadd.f32 %v859_v1, %v766_v3  ;;  %5065 = vmatmul.msk.bf16.gmra.mxu0 %vm264_vm1, %v5808_v6  ;;  %v2222_v41 = vsel %vm289_vm0, %v5130_v33, 0  ;;  %v2697_v49 = vsel %vm289_vm0, %v2570_v19, 0 }
 0x16d   : > { %5074 = vmatmul.msk.bf16.gmra.mxu1 %vm264_vm1, %v5922_v25  ;;  %2231 = vmatpush.bf16.msra.mxu0 %v2222_v41 }
 0x16e   : > { %5082 = vmatmul.msk.bf16.gmra.mxu2 %vm264_vm1, %v5924_v31  ;;  %2706 = vmatpush.bf16.msra.mxu3 %v2697_v49 }
 0x16f   : > { %5091 = vmatmul.msk.bf16.gmra.mxu3 %vm264_vm1, %v5927_v52 }
 0x171   : > { %v977_v57 = vpop.f32.mrf.mxu2  ;;  %v743_v18 = vpop.f32.mrf.mxu0 }
 0x172   : > { %v1002_v54 = vadd.f32 %v977_v57, %v884_v11  ;;  %v1095_v36 = vpop.f32.mrf.mxu3  ;;  %v767_v47 = vadd.f32 %v743_v18, %v5774_v29  ;;  %v861_v63 = vpop.f32.mrf.mxu1  ;;  %v5139_v11 = vld [vmem:[%s7500_s1 + $0x10] sm:$0x3]  ;;  %v1425_v18 = vld [vmem:[%s5524_s30 + $0x100] sm:$0xff] }
 0x174   : > { %v5940_v48 = vadd.f32 %v1095_v36, %v1002_v54  ;;  %v885_v6 = vadd.f32 %v861_v63, %v767_v47  ;;  %v2339_v54 = vsel %vm289_vm0, %v5139_v11, 0  ;;  %v1424_v36 = vld [vmem:[%s5524_s30 + $0xf8] sm:$0xff] }
 0x175   : > { %2348 = vmatpush.bf16.msra.mxu1 %v2339_v54  ;;  %v1399_v47 = vld [vmem:[%s5524_s30 + $0xf7] sm:$0xff]  ;;  %v1400_v63 = vld [vmem:[%s5524_s30 + $0xff] sm:$0xff]  ;;  %v5990_v10 = vpack.c.bf16 %v1425_v18, %v1424_v36 }
 0x176   : > { %v5992_v55 = vpack.c.bf16 %v1400_v63, %v1399_v47 }
 0x179   : > { %v979_v42 = vpop.f32.mrf.mxu2  ;;  %v746_v46 = vpop.f32.mrf.mxu0 }
 0x17a   : > { %v1003_v35 = vadd.f32 %v979_v42, %v885_v6  ;;  %v1097_v15 = vpop.f32.mrf.mxu3  ;;  %v768_v29 = vadd.f32 %v746_v46, %v5796_v50  ;;  %v864_v22 = vpop.f32.mrf.mxu1  ;;  %v5148_v50 = vld [vmem:[%s7500_s1 + $0x2] sm:$0x3] }
 0x17b   : > { %v2621_v40 = vsel %vm289_vm0, %v5148_v50, 0  ;;  %v1602_v6 = vld [vmem:[%s5524_s30 + $0x101] sm:$0xff] }
 0x17c   : > { %v5955_v24 = vadd.f32 %v1097_v15, %v1003_v35  ;;  %v886_v2 = vadd.f32 %v864_v22, %v768_v29  ;;  %5066 = vmatmul.msk.bf16.gmra.mxu0 %vm264_vm1, %v5857_v17  ;;  %2630 = vmatpush.bf16.msra.mxu2 %v2621_v40 }
 0x17d   : > { %5075 = vmatmul.msk.bf16.gmra.mxu1 %vm264_vm1, %v5948_v56 }
 0x17e   : > { %5083 = vmatmul.msk.bf16.gmra.mxu2 %vm264_vm1, %v5950_v16 }
 0x17f   : > { %5092 = vmatmul.msk.bf16.gmra.mxu3 %vm264_vm1, %v5953_v23 }
 0x181   : > { %v982_v30 = vpop.f32.mrf.mxu2  ;;  %v748_v39 = vpop.f32.mrf.mxu0 }
 0x182   : > { %v1004_v34 = vadd.f32 %v982_v30, %v886_v2  ;;  %v1100_v38 = vpop.f32.mrf.mxu3  ;;  %v769_v43 = vadd.f32 %v748_v39, %v5814_v13  ;;  %v866_v3 = vpop.f32.mrf.mxu1  ;;  %v1601_v13 = vld [vmem:[%s5524_s30 + $0xf9] sm:$0xff] }
 0x183   : > { %v5995_v15 = vpack.c.bf16 %v1602_v6, %v1601_v13 }
 0x184   : > { %v5978_v1 = vadd.f32 %v1100_v38, %v1004_v34  ;;  %v887_v57 = vadd.f32 %v866_v3, %v769_v43  ;;  %v1261_v3 = vld [vmem:[%s7501_s2] sm:$0xff] }
 0x189   : > { %v984_v59 = vpop.f32.mrf.mxu2  ;;  %v751_v5 = vpop.f32.mrf.mxu0 }
 0x18a   : > { %v1005_v60 = vadd.f32 %v984_v59, %v887_v57  ;;  %v1102_v61 = vpop.f32.mrf.mxu3  ;;  %v770_v42 = vadd.f32 %v751_v5, %v5824_v0  ;;  %v869_v35 = vpop.f32.mrf.mxu1 }
 0x18c   : > { %v5997_v46 = vadd.f32 %v1102_v61, %v1005_v60  ;;  %v888_v29 = vadd.f32 %v869_v35, %v770_v42  ;;  %5067 = vmatmul.msk.bf16.gmra.mxu0 %vm264_vm1, %v5875_v44 }
 0x18d   : > { %5076 = vmatmul.msk.bf16.gmra.mxu1 %vm264_vm1, %v5990_v10 }
 0x18e   : > { %5084 = vmatmul.msk.bf16.gmra.mxu2 %vm264_vm1, %v5992_v55 }
 0x18f   : > { %5093 = vmatmul.msk.bf16.gmra.mxu3 %vm264_vm1, %v5995_v15 }
 0x191   : > { %v987_v0 = vpop.f32.mrf.mxu2  ;;  %v753_v30 = vpop.f32.mrf.mxu0 }
 0x192   : > { %v1006_v22 = vadd.f32 %v987_v0, %v888_v29  ;;  %v1105_v2 = vpop.f32.mrf.mxu3  ;;  %v771_v50 = vadd.f32 %v753_v30, %v5827_v9  ;;  %v871_v33 = vpop.f32.mrf.mxu1 }
 0x194   : > { %v6009_v19 = vadd.f32 %v1105_v2, %v1006_v22  ;;  %v889_v34 = vadd.f32 %v871_v33, %v771_v50  ;;  %v1263_v22 = vld [vmem:[%s7501_s2 + $0x10] sm:$0xff] }
 0x199   : > { %v989_v38 = vpop.f32.mrf.mxu2  ;;  %v1188_v41 = vpop.f32.mrf.mxu0 }
 0x19a   : > { %v1007_v39 = vadd.f32 %v989_v38, %v889_v34  ;;  %v1107_v40 = vpop.f32.mrf.mxu3  ;;  %v1228_v49 = vadd.f32 %v1188_v41, %v5838_v45  ;;  %v1471_v9 = vpop.f32.mrf.mxu1 }
 0x19c   : > { %v6017_v43 = vadd.f32 %v1107_v40, %v1007_v39  ;;  %1245 = vst.msk [vmem:[%s6014_s23] sm:$0xff] %vm1244_vm2, %v1228_v49  ;;  %5095 = vmatmul.msk.bf16.vlgmr.msrb.gmra.mxu0 %vm264_vm1, %v5770_v26  ;;  %v1277_v45 = vmul.f32 %v1261_v3, %v1228_v49  ;;  %v1262_v26 = vld [vmem:[%s7501_s2 + $0x8] sm:$0xff] }
 0x19d   : > { %5104 = vmatmul.msk.bf16.vlgmr.msrb.gmra.mxu1 %vm264_vm1, %v5772_v28 }
 0x19e   : > { %5113 = vmatmul.msk.bf16.vlgmr.msrb.gmra.mxu2 %vm264_vm1, %v5857_v17  ;;  %v1331_v28 = vmul.f32 %v1277_v45, %v1228_v49  ;;  %v1293_v13 = vsel %vm1244_vm2, %v1277_v45, 0.0 }
 0x19f   : > { %5122 = vmatmul.msk.bf16.vlgmr.msrb.gmra.mxu3 %vm264_vm1, %v5898_v62 }
 0x1a0   : > { %v1347_v61 = vsel %vm1244_vm2, %v1331_v28, 0.0 }
 0x1a1   : > { %v1547_v11 = vpop.f32.mrf.mxu2  ;;  %v1190_v36 = vpop.f32.mrf.mxu0 }
 0x1a2   : > { %v1548_v57 = vadd.f32 %v1547_v11, %v1471_v9  ;;  %v1648_v54 = vpop.f32.mrf.mxu3  ;;  %v1229_v18 = vadd.f32 %v1190_v36, %v5841_v58  ;;  %v1473_v47 = vpop.f32.mrf.mxu1 }
 0x1a4   : > { %v6036_v63 = vadd.f32 %v1648_v54, %v1548_v57  ;;  %1246 = vst.msk [vmem:[%s6014_s23 + $0x8] sm:$0xff] %vm1244_vm2, %v1229_v18  ;;  %v1278_v17 = vmul.f32 %v1262_v26, %v1229_v18 }
 0x1a6   : > { %v1294_v6 = vsel %vm1244_vm2, %v1278_v17, 0.0  ;;  %v1332_v59 = vmul.f32 %v1278_v17, %v1229_v18 }
 0x1a7   : > { %v1295_v60 = vadd.f32 %v1294_v6, %v1293_v13 }
 0x1a8   : > { %v1348_v5 = vsel %vm1244_vm2, %v1332_v59, 0.0 }
 0x1a9   : > { %v1549_v42 = vpop.f32.mrf.mxu2  ;;  %v1349_v58 = vadd.f32 %v1348_v5, %v1347_v61  ;;  %v1193_v0 = vpop.f32.mrf.mxu0 }
 0x1aa   : > { %v1550_v35 = vadd.f32 %v1549_v42, %v1473_v47  ;;  %v1650_v29 = vpop.f32.mrf.mxu3  ;;  %v1230_v2 = vadd.f32 %v1193_v0, %v5852_v4  ;;  %v1476_v30 = vpop.f32.mrf.mxu1 }
 0x1ac   : > { %v6048_v50 = vadd.f32 %v1650_v29, %v1550_v35  ;;  %1247 = vst.msk [vmem:[%s6014_s23 + $0x10] sm:$0xff] %vm1244_vm2, %v1230_v2  ;;  %v1279_v33 = vmul.f32 %v1263_v22, %v1230_v2  ;;  %5096 = vmatmul.msk.bf16.gmra.mxu0 %vm264_vm1, %v5810_v7 }
 0x1ad   : > { %5105 = vmatmul.msk.bf16.gmra.mxu1 %vm264_vm1, %v5812_v12  ;;  %v1264_v12 = vld [vmem:[%s7501_s2 + $0x18] sm:$0xff] }
 0x1ae   : > { %5114 = vmatmul.msk.bf16.gmra.mxu2 %vm264_vm1, %v5875_v44  ;;  %v1296_v34 = vsel %vm1244_vm2, %v1279_v33, 0.0  ;;  %v1333_v38 = vmul.f32 %v1279_v33, %v1230_v2 }
 0x1af   : > { %5123 = vmatmul.msk.bf16.gmra.mxu3 %vm264_vm1, %v5924_v31  ;;  %v1297_v4 = vadd.f32 %v1296_v34, %v1295_v60 }
 0x1b0   : > { %v1350_v39 = vsel %vm1244_vm2, %v1333_v38, 0.0 }
 0x1b1   : > { %v1552_v40 = vpop.f32.mrf.mxu2  ;;  %v1351_v41 = vadd.f32 %v1350_v39, %v1349_v58  ;;  %v1195_v9 = vpop.f32.mrf.mxu0 }
 0x1b2   : > { %v1553_v49 = vadd.f32 %v1552_v40, %v1476_v30  ;;  %v1653_v7 = vpop.f32.mrf.mxu3  ;;  %v1231_v44 = vadd.f32 %v1195_v9, %v5859_v21  ;;  %v1478_v3 = vpop.f32.mrf.mxu1  ;;  %v1265_v21 = vld [vmem:[%s7501_s2 + $0x20] sm:$0xff] }
 0x1b4   : > { %v6066_v45 = vadd.f32 %v1653_v7, %v1553_v49  ;;  %1248 = vst.msk [vmem:[%s6014_s23 + $0x18] sm:$0xff] %vm1244_vm2, %v1231_v44  ;;  %v1280_v11 = vmul.f32 %v1264_v12, %v1231_v44 }
 0x1b6   : > { %v1298_v57 = vsel %vm1244_vm2, %v1280_v11, 0.0  ;;  %v1334_v54 = vmul.f32 %v1280_v11, %v1231_v44 }
 0x1b7   : > { %v1299_v36 = vadd.f32 %v1298_v57, %v1297_v4 }
 0x1b8   : > { %v1352_v26 = vsel %vm1244_vm2, %v1334_v54, 0.0 }
 0x1b9   : > { %v1554_v18 = vpop.f32.mrf.mxu2  ;;  %v1353_v47 = vadd.f32 %v1352_v26, %v1351_v41  ;;  %v1198_v13 = vpop.f32.mrf.mxu0 }
 0x1ba   : > { %v1555_v28 = vadd.f32 %v1554_v18, %v1478_v3  ;;  %v1655_v17 = vpop.f32.mrf.mxu3  ;;  %v1232_v6 = vadd.f32 %v1198_v13, %v5870_v32  ;;  %v1481_v59 = vpop.f32.mrf.mxu1 }
 0x1bc   : > { %v6076_v60 = vadd.f32 %v1655_v17, %v1555_v28  ;;  %1249 = vst.msk [vmem:[%s6014_s23 + $0x20] sm:$0xff] %vm1244_vm2, %v1232_v6  ;;  %v1281_v61 = vmul.f32 %v1265_v21, %v1232_v6  ;;  %5097 = vmatmul.msk.bf16.gmra.mxu0 %vm264_vm1, %v5898_v62 }
 0x1bd   : > { %5106 = vmatmul.msk.bf16.gmra.mxu1 %vm264_vm1, %v5896_v8  ;;  %v1266_v8 = vld [vmem:[%s7501_s2 + $0x28] sm:$0xff] }
 0x1be   : > { %5115 = vmatmul.msk.bf16.gmra.mxu2 %vm264_vm1, %v5901_v14  ;;  %v1300_v5 = vsel %vm1244_vm2, %v1281_v61, 0.0  ;;  %v1335_v42 = vmul.f32 %v1281_v61, %v1232_v6 }
 0x1bf   : > { %5124 = vmatmul.msk.bf16.gmra.mxu3 %vm264_vm1, %v5950_v16  ;;  %v1301_v32 = vadd.f32 %v1300_v5, %v1299_v36  ;;  %v2063_v5 = vld [vmem:[%s5524_s30 + $0x107] sm:$0xff] }
 0x1c0   : > { %v1354_v58 = vsel %vm1244_vm2, %v1335_v42, 0.0  ;;  %v2064_v42 = vld [vmem:[%s5524_s30 + $0x10f] sm:$0xff] }
 0x1c1   : > { %v1557_v35 = vpop.f32.mrf.mxu2  ;;  %v1355_v29 = vadd.f32 %v1354_v58, %v1353_v47  ;;  %v1200_v22 = vpop.f32.mrf.mxu0 }
 0x1c2   : > { %v1558_v0 = vadd.f32 %v1557_v35, %v1481_v59  ;;  %v1658_v62 = vpop.f32.mrf.mxu3  ;;  %v1233_v14 = vadd.f32 %v1200_v22, %v5877_v51  ;;  %v1483_v2 = vpop.f32.mrf.mxu1  ;;  %v1267_v51 = vld [vmem:[%s7501_s2 + $0x30] sm:$0xff] }
 0x1c4   : > { %v6094_v30 = vadd.f32 %v1658_v62, %v1558_v0  ;;  %1250 = vst.msk [vmem:[%s6014_s23 + $0x28] sm:$0xff] %vm1244_vm2, %v1233_v14  ;;  %v1282_v33 = vmul.f32 %v1266_v8, %v1233_v14  ;;  %v1269_v62 = vld [vmem:[%s7501_s2 + $0x40] sm:$0xff] }
 0x1c6   : > { %v1302_v34 = vsel %vm1244_vm2, %v1282_v33, 0.0  ;;  %v1336_v38 = vmul.f32 %v1282_v33, %v1233_v14  ;;  %v6134_v14 = vpack.c.bf16 %v2064_v42, %v2063_v5 }
 0x1c7   : > { %v1303_v4 = vadd.f32 %v1302_v34, %v1301_v32 }
 0x1c8   : > { %v1356_v39 = vsel %vm1244_vm2, %v1336_v38, 0.0 }
 0x1c9   : > { %v1559_v40 = vpop.f32.mrf.mxu2  ;;  %v1357_v41 = vadd.f32 %v1356_v39, %v1355_v29  ;;  %v1203_v9 = vpop.f32.mrf.mxu0 }
 0x1ca   : > { %v1560_v49 = vadd.f32 %v1559_v40, %v1483_v2  ;;  %v1660_v7 = vpop.f32.mrf.mxu3  ;;  %v1234_v12 = vadd.f32 %v1203_v9, %v5888_v20  ;;  %v1486_v44 = vpop.f32.mrf.mxu1 }
 0x1cc   : > { %v6104_v3 = vadd.f32 %v1660_v7, %v1560_v49  ;;  %1251 = vst.msk [vmem:[%s6014_s23 + $0x30] sm:$0xff] %vm1244_vm2, %v1234_v12  ;;  %v1283_v11 = vmul.f32 %v1267_v51, %v1234_v12  ;;  %5098 = vmatmul.msk.bf16.gmra.mxu0 %vm264_vm1, %v5924_v31 }
 0x1cd   : > { %5107 = vmatmul.msk.bf16.gmra.mxu1 %vm264_vm1, %v5922_v25 }
 0x1ce   : > { %5116 = vmatmul.msk.bf16.gmra.mxu2 %vm264_vm1, %v5927_v52  ;;  %v1304_v57 = vsel %vm1244_vm2, %v1283_v11, 0.0  ;;  %v1337_v54 = vmul.f32 %v1283_v11, %v1234_v12  ;;  %v1268_v52 = vld [vmem:[%s7501_s2 + $0x38] sm:$0xff] }
 0x1cf   : > { %5125 = vmatmul.msk.bf16.gmra.mxu3 %vm264_vm1, %v5992_v55  ;;  %v1305_v20 = vadd.f32 %v1304_v57, %v1303_v4  ;;  %v2065_v57 = vld [vmem:[%s5524_s30 + $0x117] sm:$0xff] }
 0x1d0   : > { %v1358_v36 = vsel %vm1244_vm2, %v1337_v54, 0.0  ;;  %v2066_v54 = vld [vmem:[%s5524_s30 + $0x11f] sm:$0xff] }
 0x1d1   : > { %v1562_v26 = vpop.f32.mrf.mxu2  ;;  %v1359_v31 = vadd.f32 %v1358_v36, %v1357_v41  ;;  %v1205_v25 = vpop.f32.mrf.mxu0 }
 0x1d2   : > { %v1563_v18 = vadd.f32 %v1562_v26, %v1486_v44  ;;  %v1663_v47 = vpop.f32.mrf.mxu3  ;;  %v1235_v28 = vadd.f32 %v1205_v25, %v5903_v37  ;;  %v1488_v17 = vpop.f32.mrf.mxu1 }
 0x1d4   : > { %v6122_v13 = vadd.f32 %v1663_v47, %v1563_v18  ;;  %1252 = vst.msk [vmem:[%s6014_s23 + $0x38] sm:$0xff] %vm1244_vm2, %v1235_v28  ;;  %v1284_v21 = vmul.f32 %v1268_v52, %v1235_v28  ;;  %v1271_v47 = vld [vmem:[%s7501_s2 + $0x50] sm:$0xff] }
 0x1d6   : > { %v1306_v6 = vsel %vm1244_vm2, %v1284_v21, 0.0  ;;  %v1338_v59 = vmul.f32 %v1284_v21, %v1235_v28  ;;  %v6166_v28 = vpack.c.bf16 %v2066_v54, %v2065_v57 }
 0x1d7   : > { %v1307_v61 = vadd.f32 %v1306_v6, %v1305_v20 }
 0x1d8   : > { %v1360_v32 = vsel %vm1244_vm2, %v1338_v59, 0.0 }
 0x1d9   : > { %v1564_v58 = vpop.f32.mrf.mxu2  ;;  %v1361_v35 = vadd.f32 %v1360_v32, %v1359_v31  ;;  %v1208_v37 = vpop.f32.mrf.mxu0  ;;  %v1272_v32 = vld [vmem:[%s7501_s2 + $0x58] sm:$0xff] }
 0x1da   : > { %v1565_v29 = vadd.f32 %v1564_v58, %v1488_v17  ;;  %v1665_v0 = vpop.f32.mrf.mxu3  ;;  %v1236_v22 = vadd.f32 %v1208_v37, %v5914_v27  ;;  %v1491_v8 = vpop.f32.mrf.mxu1  ;;  %v1833_v37 = vld [vmem:[%s5524_s30 + $0x108] sm:$0xff] }
 0x1dc   : > { %v6136_v2 = vadd.f32 %v1665_v0, %v1565_v29  ;;  %1253 = vst.msk [vmem:[%s6014_s23 + $0x40] sm:$0xff] %vm1244_vm2, %v1236_v22  ;;  %v1285_v33 = vmul.f32 %v1269_v62, %v1236_v22  ;;  %5099 = vmatmul.msk.bf16.gmra.mxu0 %vm264_vm1, %v5950_v16 }
 0x1dd   : > { %5108 = vmatmul.msk.bf16.gmra.mxu1 %vm264_vm1, %v5948_v56 }
 0x1de   : > { %5117 = vmatmul.msk.bf16.gmra.mxu2 %vm264_vm1, %v5953_v23  ;;  %v1308_v27 = vsel %vm1244_vm2, %v1285_v33, 0.0  ;;  %v1339_v34 = vmul.f32 %v1285_v33, %v1236_v22  ;;  %v1270_v23 = vld [vmem:[%s7501_s2 + $0x48] sm:$0xff] }
 0x1df   : > { %5126 = vmatmul.msk.bf16.gmra.mxu3 %vm264_vm1, %v6134_v14  ;;  %v1309_v38 = vadd.f32 %v1308_v27, %v1307_v61  ;;  %v1950_v33 = vld [vmem:[%s5524_s30 + $0x109] sm:$0xff]  ;;  %v1951_v27 = vld [vmem:[%s5524_s30 + $0x111] sm:$0xff] }
 0x1e0   : > { %v1362_v4 = vsel %vm1244_vm2, %v1339_v34, 0.0 }
 0x1e1   : > { %v1567_v39 = vpop.f32.mrf.mxu2  ;;  %v1363_v16 = vadd.f32 %v1362_v4, %v1361_v35  ;;  %v1210_v56 = vpop.f32.mrf.mxu0  ;;  %v2068_v4 = vld [vmem:[%s5524_s30 + $0x12f] sm:$0xff] }
 0x1e2   : > { %v1568_v40 = vadd.f32 %v1567_v39, %v1491_v8  ;;  %v1668_v41 = vpop.f32.mrf.mxu3  ;;  %v1237_v49 = vadd.f32 %v1210_v56, %v5929_v53  ;;  %v1493_v7 = vpop.f32.mrf.mxu1  ;;  %v1834_v8 = vld [vmem:[%s5524_s30 + $0x110] sm:$0xff] }
 0x1e4   : > { %v6154_v9 = vadd.f32 %v1668_v41, %v1568_v40  ;;  %1254 = vst.msk [vmem:[%s6014_s23 + $0x48] sm:$0xff] %vm1244_vm2, %v1237_v49  ;;  %v1286_v51 = vmul.f32 %v1270_v23, %v1237_v49  ;;  %v1273_v23 = vld [vmem:[%s7501_s2 + $0x60] sm:$0xff] }
 0x1e6   : > { %v1310_v12 = vsel %vm1244_vm2, %v1286_v51, 0.0  ;;  %v1340_v44 = vmul.f32 %v1286_v51, %v1237_v49  ;;  %v6201_v49 = vpack.c.bf16 %v1834_v8, %v1833_v37 }
 0x1e7   : > { %v1311_v11 = vadd.f32 %v1310_v12, %v1309_v38  ;;  %v2067_v38 = vld [vmem:[%s5524_s30 + $0x127] sm:$0xff] }
 0x1e8   : > { %v1364_v20 = vsel %vm1244_vm2, %v1340_v44, 0.0  ;;  %v6206_v44 = vpack.c.bf16 %v2068_v4, %v2067_v38 }
 0x1e9   : > { %v1569_v36 = vpop.f32.mrf.mxu2  ;;  %v1365_v26 = vadd.f32 %v1364_v20, %v1363_v16  ;;  %v1213_v53 = vpop.f32.mrf.mxu0 }
 0x1ea   : > { %v1570_v31 = vadd.f32 %v1569_v36, %v1493_v7  ;;  %v1670_v18 = vpop.f32.mrf.mxu3  ;;  %v1238_v25 = vadd.f32 %v1213_v53, %v5940_v48  ;;  %v1496_v52 = vpop.f32.mrf.mxu1  ;;  %v6203_v7 = vpack.c.bf16 %v1951_v27, %v1950_v33 }
 0x1ec   : > { %v6168_v17 = vadd.f32 %v1670_v18, %v1570_v31  ;;  %1255 = vst.msk [vmem:[%s6014_s23 + $0x50] sm:$0xff] %vm1244_vm2, %v1238_v25  ;;  %v1287_v21 = vmul.f32 %v1271_v47, %v1238_v25  ;;  %5100 = vmatmul.msk.bf16.gmra.mxu0 %vm264_vm1, %v5992_v55 }
 0x1ed   : > { %5109 = vmatmul.msk.bf16.gmra.mxu1 %vm264_vm1, %v5990_v10 }
 0x1ee   : > { %5118 = vmatmul.msk.bf16.gmra.mxu2 %vm264_vm1, %v5995_v15  ;;  %v1312_v48 = vsel %vm1244_vm2, %v1287_v21, 0.0  ;;  %v1341_v6 = vmul.f32 %v1287_v21, %v1238_v25  ;;  %v1274_v25 = vld [vmem:[%s7501_s2 + $0x68] sm:$0xff] }
 0x1ef   : > { %5127 = vmatmul.msk.bf16.gmra.mxu3 %vm264_vm1, %v6166_v28  ;;  %v1313_v59 = vadd.f32 %v1312_v48, %v1311_v11 }
 0x1f0   : > { %v1366_v61 = vsel %vm1244_vm2, %v1341_v6, 0.0 }
 0x1f1   : > { %v1572_v55 = vpop.f32.mrf.mxu2  ;;  %v1367_v5 = vadd.f32 %v1366_v61, %v1365_v26  ;;  %v1215_v15 = vpop.f32.mrf.mxu0  ;;  %v1836_v61 = vld [vmem:[%s5524_s30 + $0x120] sm:$0xff] }
 0x1f2   : > { %v1573_v10 = vadd.f32 %v1572_v55, %v1496_v52  ;;  %v1673_v42 = vpop.f32.mrf.mxu3  ;;  %v1239_v58 = vadd.f32 %v1215_v15, %v5955_v24  ;;  %v1498_v35 = vpop.f32.mrf.mxu1  ;;  %v1952_v55 = vld [vmem:[%s5524_s30 + $0x119] sm:$0xff] }
 0x1f4   : > { %v6186_v29 = vadd.f32 %v1673_v42, %v1573_v10  ;;  %1256 = vst.msk [vmem:[%s6014_s23 + $0x58] sm:$0xff] %vm1244_vm2, %v1239_v58  ;;  %v1288_v0 = vmul.f32 %v1272_v32, %v1239_v58  ;;  %v5165_v10 = vld [vmem:[%s7500_s1 + $0x4] sm:$0x3] }
 0x1f5   : > { %v1953_v32 = vld [vmem:[%s5524_s30 + $0x121] sm:$0xff] }
 0x1f6   : > { %v1314_v62 = vsel %vm1244_vm2, %v1288_v0, 0.0  ;;  %v1342_v22 = vmul.f32 %v1288_v0, %v1239_v58  ;;  %v5174_v0 = vld [vmem:[%s7500_s1 + $0x6] sm:$0x3] }
 0x1f7   : > { %v1315_v34 = vadd.f32 %v1314_v62, %v1313_v59  ;;  %v1835_v59 = vld [vmem:[%s5524_s30 + $0x118] sm:$0xff]  ;;  %v2915_v33 = vsel %vm289_vm0, %v5174_v0, 0 }
 0x1f8   : > { %v1368_v39 = vsel %vm1244_vm2, %v1342_v22, 0.0  ;;  %v2069_v62 = vld [vmem:[%s5524_s30 + $0x137] sm:$0xff]  ;;  %v2070_v22 = vld [vmem:[%s5524_s30 + $0x13f] sm:$0xff]  ;;  %2924 = vmatpush.bf16.msrb.mxu1 %v2915_v33 }
 0x1f9   : > { %v1574_v24 = vpop.f32.mrf.mxu2  ;;  %v1369_v16 = vadd.f32 %v1368_v39, %v1367_v5  ;;  %v1218_v56 = vpop.f32.mrf.mxu0  ;;  %v5183_v5 = vld [vmem:[%s7500_s1 + $0x8] sm:$0x3] }
 0x1fa   : > { %v1575_v40 = vadd.f32 %v1574_v24, %v1498_v35  ;;  %v1675_v41 = vpop.f32.mrf.mxu3  ;;  %v1240_v51 = vadd.f32 %v1218_v56, %v5978_v1  ;;  %v1501_v12 = vpop.f32.mrf.mxu1  ;;  %v3032_v58 = vsel %vm289_vm0, %v5183_v5, 0  ;;  %v2798_v35 = vsel %vm289_vm0, %v5165_v10, 0  ;;  %v2289_v10 = vld [vmem:[%s5524_s30 + $0xc9] sm:$0xff] }
 0x1fb   : > { %3041 = vmatpush.bf16.msrb.mxu2 %v3032_v58  ;;  %2807 = vmatpush.bf16.msrb.mxu0 %v2798_v35 }
 0x1fc   : > { %v6208_v11 = vadd.f32 %v1675_v41, %v1575_v40  ;;  %1257 = vst.msk [vmem:[%s6014_s23 + $0x60] sm:$0xff] %vm1244_vm2, %v1240_v51  ;;  %v1289_v57 = vmul.f32 %v1273_v23, %v1240_v51  ;;  %5101 = vmatmul.msk.bf16.gmra.mxu0 %vm264_vm1, %v6134_v14  ;;  %v6257_v40 = vpack.c.bf16 %v1836_v61, %v1835_v59  ;;  %v2172_v59 = vld [vmem:[%s5524_s30 + $0xc8] sm:$0xff]  ;;  %v2173_v61 = vld [vmem:[%s5524_s30 + $0xd0] sm:$0xff] }
 0x1fd   : > { %5110 = vmatmul.msk.bf16.gmra.mxu1 %vm264_vm1, %v6201_v49  ;;  %v6259_v41 = vpack.c.bf16 %v1953_v32, %v1952_v55  ;;  %v2188_v58 = vpack.c.bf16 %v2173_v61, %v2172_v59 }
 0x1fe   : > { %5119 = vmatmul.msk.bf16.gmra.mxu2 %vm264_vm1, %v6203_v7  ;;  %v1316_v1 = vsel %vm1244_vm2, %v1289_v57, 0.0  ;;  %v1343_v54 = vmul.f32 %v1289_v57, %v1240_v51  ;;  %v6262_v51 = vpack.c.bf16 %v2070_v22, %v2069_v62 }
 0x1ff   : > { %5128 = vmatmul.msk.bf16.gmra.mxu3 %vm264_vm1, %v6206_v44  ;;  %v1317_v20 = vadd.f32 %v1316_v1, %v1315_v34 }
 0x200   : > { %v1370_v36 = vsel %vm1244_vm2, %v1343_v54, 0.0 }
 0x201   : > { %v1577_v26 = vpop.f32.mrf.mxu2  ;;  %v1371_v31 = vadd.f32 %v1370_v36, %v1369_v16  ;;  %v1220_v47 = vpop.f32.mrf.mxu0  ;;  %v1275_v16 = vld [vmem:[%s7501_s2 + $0x70] sm:$0xff] }
 0x202   : > { %v1578_v18 = vadd.f32 %v1577_v26, %v1501_v12  ;;  %v1678_v53 = vpop.f32.mrf.mxu3  ;;  %v1241_v52 = vadd.f32 %v1220_v47, %v5997_v46  ;;  %v1503_v21 = vpop.f32.mrf.mxu1  ;;  %v5192_v46 = vld [vmem:[%s7500_s1 + $0xa] sm:$0x3]  ;;  %v1276_v47 = vld [vmem:[%s7501_s2 + $0x78] sm:$0xff] }
 0x203   : > { %v3149_v8 = vsel %vm289_vm0, %v5192_v46, 0  ;;  %v2290_v46 = vld [vmem:[%s5524_s30 + $0xd1] sm:$0xff] }
 0x204   : > { %v6226_v48 = vadd.f32 %v1678_v53, %v1578_v18  ;;  %1258 = vst.msk [vmem:[%s6014_s23 + $0x68] sm:$0xff] %vm1244_vm2, %v1241_v52  ;;  %v1290_v6 = vmul.f32 %v1274_v25, %v1241_v52  ;;  %3158 = vmatpush.bf16.msrb.mxu3 %v3149_v8  ;;  %v2305_v62 = vpack.c.bf16 %v2290_v46, %v2289_v10  ;;  %v2176_v10 = vld [vmem:[%s5524_s30 + $0xe8] sm:$0xff]  ;;  %v2177_v46 = vld [vmem:[%s5524_s30 + $0xf0] sm:$0xff] }
 0x206   : > { %v1318_v42 = vsel %vm1244_vm2, %v1290_v6, 0.0  ;;  %v1344_v15 = vmul.f32 %v1290_v6, %v1241_v52 }
 0x207   : > { %v1319_v37 = vadd.f32 %v1318_v42, %v1317_v20 }
 0x208   : > { %v1372_v27 = vsel %vm1244_vm2, %v1344_v15, 0.0 }
 0x209   : > { %v1579_v34 = vpop.f32.mrf.mxu2  ;;  %v1373_v38 = vadd.f32 %v1372_v27, %v1371_v31  ;;  %v1223_v24 = vpop.f32.mrf.mxu0 }
 0x20a   : > { %v1580_v4 = vadd.f32 %v1579_v34, %v1503_v21  ;;  %v1680_v39 = vpop.f32.mrf.mxu3  ;;  %v1242_v56 = vadd.f32 %v1223_v24, %v6009_v19  ;;  %v1506_v23 = vpop.f32.mrf.mxu1 }
 0x20c   : > { %v6264_v12 = vadd.f32 %v1680_v39, %v1580_v4  ;;  %1259 = vst.msk [vmem:[%s6014_s23 + $0x70] sm:$0xff] %vm1244_vm2, %v1242_v56  ;;  %v1291_v57 = vmul.f32 %v1275_v16, %v1242_v56  ;;  %5102 = vmatmul.msk.bf16.gmra.mxu0 %vm264_vm1, %v6166_v28 }
 0x20d   : > { %5111 = vmatmul.msk.bf16.gmra.mxu1 %vm264_vm1, %v6257_v40 }
 0x20e   : > { %5120 = vmatmul.msk.bf16.gmra.mxu2 %vm264_vm1, %v6259_v41  ;;  %v1320_v19 = vsel %vm1244_vm2, %v1291_v57, 0.0  ;;  %v1345_v1 = vmul.f32 %v1291_v57, %v1242_v56  ;;  %v2175_v57 = vld [vmem:[%s5524_s30 + $0xe0] sm:$0xff] }
 0x20f   : > { %5129 = vmatmul.msk.bf16.gmra.mxu3 %vm264_vm1, %v6262_v51  ;;  %v1321_v54 = vadd.f32 %v1320_v19, %v1319_v37  ;;  %v2291_v19 = vld [vmem:[%s5524_s30 + $0xd9] sm:$0xff] }
 0x210   : > { %v1374_v20 = vsel %vm1244_vm2, %v1345_v1, 0.0  ;;  %v2292_v1 = vld [vmem:[%s5524_s30 + $0xe1] sm:$0xff] }
 0x211   : > { %v1582_v36 = vpop.f32.mrf.mxu2  ;;  %v1375_v26 = vadd.f32 %v1374_v20, %v1373_v38  ;;  %v1225_v53 = vpop.f32.mrf.mxu0 }
 0x212   : > { %v1583_v31 = vadd.f32 %v1582_v36, %v1506_v23  ;;  %v1683_v18 = vpop.f32.mrf.mxu3  ;;  %v1243_v25 = vadd.f32 %v1225_v53, %v6017_v43  ;;  %v1508_v52 = vpop.f32.mrf.mxu1  ;;  %v2174_v23 = vld [vmem:[%s5524_s30 + $0xd8] sm:$0xff] }
 0x213   : > { %v2189_v20 = vpack.c.bf16 %v2175_v57, %v2174_v23 }
 0x214   : > { %v6282_v21 = vadd.f32 %v1683_v18, %v1583_v31  ;;  %1260 = vst.msk [vmem:[%s6014_s23 + $0x78] sm:$0xff] %vm1244_vm2, %v1243_v25  ;;  %v1292_v6 = vmul.f32 %v1276_v47, %v1243_v25 }
 0x216   : > { %v1322_v55 = vsel %vm1244_vm2, %v1292_v6, 0.0  ;;  %v1346_v5 = vmul.f32 %v1292_v6, %v1243_v25 }
 0x217   : > { %v6291_v42 = vadd.f32 %v1322_v55, %v1321_v54 }
 0x218   : > { %v1376_v15 = vsel %vm1244_vm2, %v1346_v5, 0.0 }
 0x219   : > { %v1584_v32 = vpop.f32.mrf.mxu2  ;;  %v6294_v43 = vadd.f32 %v1376_v15, %v1375_v26  ;;  %v1765_v37 = vpop.f32.mrf.mxu0  ;;  %v2293_v15 = vld [vmem:[%s5524_s30 + $0xe9] sm:$0xff] }
 0x21a   : > { %v1585_v35 = vadd.f32 %v1584_v32, %v1508_v52  ;;  %v1685_v0 = vpop.f32.mrf.mxu3  ;;  %v1805_v22 = vadd.f32 %v1765_v37, %v6036_v63  ;;  %v1882_v8 = vpop.f32.mrf.mxu1  ;;  %v2294_v32 = vld [vmem:[%s5524_s30 + $0xf1] sm:$0xff]  ;;  %v2190_v37 = vpack.c.bf16 %v2177_v46, %v2176_v10 }
 0x21c   : > { %v6297_v33 = vadd.f32 %v1685_v0, %v1585_v35  ;;  %v1922_v27 = vadd.f32 %v1882_v8, %v1805_v22  ;;  %5131 = vmatmul.msk.bf16.vlgmr.msra.gmra.mxu0 %vm264_vm1, %v2188_v58  ;;  %v2575_v58 = vld [vmem:[%s5524_s30 + $0x128] sm:$0xff]  ;;  %v2576_v35 = vld [vmem:[%s5524_s30 + $0x130] sm:$0xff]  ;;  %v2307_v8 = vpack.c.bf16 %v2294_v32, %v2293_v15 }
 0x21d   : > { %5140 = vmatmul.msk.bf16.vlgmr.msra.gmra.mxu1 %vm264_vm1, %v2305_v62 }
 0x21e   : > { %5149 = vmatmul.msk.bf16.vlgmr.msra.gmra.mxu2 %vm264_vm1, %v6201_v49 }
 0x21f   : > { %5157 = vmatmul.msk.bf16.vlgmr.msra.gmra.mxu3 %vm264_vm1, %v6134_v14  ;;  %v2306_v14 = vpack.c.bf16 %v2292_v1, %v2291_v19  ;;  %v2178_v1 = vld [vmem:[%s5524_s30 + $0xf8] sm:$0xff] }
 0x221   : > { %v1999_v34 = vpop.f32.mrf.mxu2  ;;  %v1767_v4 = vpop.f32.mrf.mxu0 }
 0x222   : > { %v2039_v63 = vadd.f32 %v1999_v34, %v1922_v27  ;;  %v2116_v38 = vpop.f32.mrf.mxu3  ;;  %v1806_v39 = vadd.f32 %v1767_v4, %v6048_v50  ;;  %v1884_v24 = vpop.f32.mrf.mxu1  ;;  %v6330_v27 = vpack.c.bf16 %v2576_v35, %v2575_v58 }
 0x224   : > { %v6306_v16 = vadd.f32 %v2116_v38, %v2039_v63  ;;  %v1923_v56 = vadd.f32 %v1884_v24, %v1806_v39 }
 0x229   : > { %v2001_v54 = vpop.f32.mrf.mxu2  ;;  %v1770_v31 = vpop.f32.mrf.mxu0 }
 0x22a   : > { %v2040_v36 = vadd.f32 %v2001_v54, %v1923_v56  ;;  %v2118_v26 = vpop.f32.mrf.mxu3  ;;  %v1807_v18 = vadd.f32 %v1770_v31, %v6066_v45  ;;  %v1887_v53 = vpop.f32.mrf.mxu1  ;;  %v2179_v54 = vld [vmem:[%s5524_s30 + $0x100] sm:$0xff] }
 0x22b   : > { %v2578_v31 = vld [vmem:[%s5524_s30 + $0x140] sm:$0xff] }
 0x22c   : > { %v6313_v50 = vadd.f32 %v2118_v26, %v2040_v36  ;;  %v1924_v47 = vadd.f32 %v1887_v53, %v1807_v18  ;;  %5132 = vmatmul.msk.bf16.gmra.mxu0 %vm264_vm1, %v2189_v20  ;;  %v2295_v20 = vld [vmem:[%s5524_s30 + $0xf9] sm:$0xff]  ;;  %v2296_v36 = vld [vmem:[%s5524_s30 + $0x101] sm:$0xff]  ;;  %v2191_v18 = vpack.c.bf16 %v2179_v54, %v2178_v1 }
 0x22d   : > { %5141 = vmatmul.msk.bf16.gmra.mxu1 %vm264_vm1, %v2306_v14  ;;  %v2577_v26 = vld [vmem:[%s5524_s30 + $0x138] sm:$0xff] }
 0x22e   : > { %5150 = vmatmul.msk.bf16.gmra.mxu2 %vm264_vm1, %v6257_v40 }
 0x22f   : > { %5158 = vmatmul.msk.bf16.gmra.mxu3 %vm264_vm1, %v6166_v28 }
 0x231   : > { %v2004_v45 = vpop.f32.mrf.mxu2  ;;  %v1772_v6 = vpop.f32.mrf.mxu0 }
 0x232   : > { %v2041_v25 = vadd.f32 %v2004_v45, %v1924_v47  ;;  %v2121_v52 = vpop.f32.mrf.mxu3  ;;  %v1808_v59 = vadd.f32 %v1772_v6, %v6076_v60  ;;  %v1889_v61 = vpop.f32.mrf.mxu1 }
 0x234   : > { %v6322_v55 = vadd.f32 %v2121_v52, %v2041_v25  ;;  %v1925_v5 = vadd.f32 %v1889_v61, %v1808_v59  ;;  %v2308_v25 = vpack.c.bf16 %v2296_v36, %v2295_v20  ;;  %v6350_v52 = vpack.c.bf16 %v2578_v31, %v2577_v26  ;;  %v2582_v26 = vld [vmem:[%s5524_s30 + $0x160] sm:$0xff]  ;;  %v2556_v31 = vld [vmem:[%s5524_s30 + $0x157] sm:$0xff] }
 0x239   : > { %v2006_v0 = vpop.f32.mrf.mxu2  ;;  %v1775_v22 = vpop.f32.mrf.mxu0 }
 0x23a   : > { %v2042_v62 = vadd.f32 %v2006_v0, %v1925_v5  ;;  %v2123_v28 = vpop.f32.mrf.mxu3  ;;  %v1809_v60 = vadd.f32 %v1775_v22, %v6094_v30  ;;  %v1892_v34 = vpop.f32.mrf.mxu1  ;;  %v2579_v0 = vld [vmem:[%s5524_s30 + $0x148] sm:$0xff] }
 0x23c   : > { %v6333_v63 = vadd.f32 %v2123_v28, %v2042_v62  ;;  %v1926_v38 = vadd.f32 %v1892_v34, %v1809_v60  ;;  %5133 = vmatmul.msk.bf16.gmra.mxu0 %vm264_vm1, %v2190_v37  ;;  %v2580_v37 = vld [vmem:[%s5524_s30 + $0x150] sm:$0xff]  ;;  %v2554_v62 = vld [vmem:[%s5524_s30 + $0x147] sm:$0xff] }
 0x23d   : > { %5142 = vmatmul.msk.bf16.gmra.mxu1 %vm264_vm1, %v2307_v8  ;;  %v2555_v28 = vld [vmem:[%s5524_s30 + $0x14f] sm:$0xff] }
 0x23e   : > { %5151 = vmatmul.msk.bf16.gmra.mxu2 %vm264_vm1, %v6330_v27 }
 0x23f   : > { %5159 = vmatmul.msk.bf16.gmra.mxu3 %vm264_vm1, %v6206_v44 }
 0x241   : > { %v2009_v30 = vpop.f32.mrf.mxu2  ;;  %v1777_v24 = vpop.f32.mrf.mxu0 }
 0x242   : > { %v2043_v4 = vadd.f32 %v2009_v30, %v1926_v38  ;;  %v2126_v39 = vpop.f32.mrf.mxu3  ;;  %v1810_v56 = vadd.f32 %v1777_v24, %v6104_v3  ;;  %v1894_v23 = vpop.f32.mrf.mxu1  ;;  %v6368_v38 = vpack.c.bf16 %v2580_v37, %v2579_v0  ;;  %v2301_v0 = vld [vmem:[%s5524_s30 + $0x129] sm:$0xff]  ;;  %v2302_v37 = vld [vmem:[%s5524_s30 + $0x131] sm:$0xff] }
 0x244   : > { %v6342_v57 = vadd.f32 %v2126_v39, %v2043_v4  ;;  %v1927_v19 = vadd.f32 %v1894_v23, %v1810_v56  ;;  %v6371_v39 = vpack.c.bf16 %v2555_v28, %v2554_v62  ;;  %v2583_v62 = vld [vmem:[%s5524_s30 + $0x168] sm:$0xff]  ;;  %v2584_v28 = vld [vmem:[%s5524_s30 + $0x170] sm:$0xff] }
 0x249   : > { %v2011_v14 = vpop.f32.mrf.mxu2  ;;  %v1780_v45 = vpop.f32.mrf.mxu0 }
 0x24a   : > { %v2044_v53 = vadd.f32 %v2011_v14, %v1927_v19  ;;  %v2128_v47 = vpop.f32.mrf.mxu3  ;;  %v1811_v3 = vadd.f32 %v1780_v45, %v6122_v13  ;;  %v1897_v6 = vpop.f32.mrf.mxu1  ;;  %v2557_v14 = vld [vmem:[%s5524_s30 + $0x15f] sm:$0xff] }
 0x24c   : > { %v6353_v59 = vadd.f32 %v2128_v47, %v2044_v53  ;;  %v1928_v61 = vadd.f32 %v1897_v6, %v1811_v3  ;;  %5134 = vmatmul.msk.bf16.gmra.mxu0 %vm264_vm1, %v2191_v18 }
 0x24d   : > { %5143 = vmatmul.msk.bf16.gmra.mxu1 %vm264_vm1, %v2308_v25 }
 0x24e   : > { %5152 = vmatmul.msk.bf16.gmra.mxu2 %vm264_vm1, %v6350_v52 }
 0x24f   : > { %5160 = vmatmul.msk.bf16.gmra.mxu3 %vm264_vm1, %v6262_v51 }
 0x251   : > { %v2014_v5 = vpop.f32.mrf.mxu2  ;;  %v1782_v46 = vpop.f32.mrf.mxu0 }
 0x252   : > { %v2045_v13 = vadd.f32 %v2014_v5, %v1928_v61  ;;  %v2131_v10 = vpop.f32.mrf.mxu3  ;;  %v1812_v15 = vadd.f32 %v1782_v46, %v6136_v2  ;;  %v1899_v32 = vpop.f32.mrf.mxu1  ;;  %v6393_v61 = vpack.c.bf16 %v2557_v14, %v2556_v31  ;;  %v5219_v14 = vld [vmem:[%s7500_s1 + $0x10] sm:$0x3] }
 0x254   : > { %v6362_v58 = vadd.f32 %v2131_v10, %v2045_v13  ;;  %v1929_v35 = vadd.f32 %v1899_v32, %v1812_v15 }
 0x259   : > { %v2016_v22 = vpop.f32.mrf.mxu2  ;;  %v1785_v34 = vpop.f32.mrf.mxu0 }
 0x25a   : > { %v2046_v8 = vadd.f32 %v2016_v22, %v1929_v35  ;;  %v2133_v60 = vpop.f32.mrf.mxu3  ;;  %v1813_v30 = vadd.f32 %v1785_v34, %v6154_v9  ;;  %v1902_v4 = vpop.f32.mrf.mxu1  ;;  %v2558_v22 = vld [vmem:[%s5524_s30 + $0x167] sm:$0xff] }
 0x25c   : > { %v6373_v2 = vadd.f32 %v2133_v60, %v2046_v8  ;;  %v1930_v24 = vadd.f32 %v1902_v4, %v1813_v30  ;;  %5135 = vmatmul.msk.bf16.gmra.mxu0 %vm264_vm1, %v6201_v49  ;;  %v2581_v49 = vld [vmem:[%s5524_s30 + $0x158] sm:$0xff]  ;;  %v2559_v8 = vld [vmem:[%s5524_s30 + $0x16f] sm:$0xff] }
 0x25d   : > { %5144 = vmatmul.msk.bf16.gmra.mxu1 %vm264_vm1, %v6203_v7  ;;  %v6390_v25 = vpack.c.bf16 %v2582_v26, %v2581_v49 }
 0x25e   : > { %5153 = vmatmul.msk.bf16.gmra.mxu2 %vm264_vm1, %v6368_v38 }
 0x25f   : > { %5161 = vmatmul.msk.bf16.gmra.mxu3 %vm264_vm1, %v6371_v39 }
 0x261   : > { %v2019_v9 = vpop.f32.mrf.mxu2  ;;  %v1787_v19 = vpop.f32.mrf.mxu0 }
 0x262   : > { %v2047_v56 = vadd.f32 %v2019_v9, %v1930_v24  ;;  %v2136_v23 = vpop.f32.mrf.mxu3  ;;  %v1814_v1 = vadd.f32 %v1787_v19, %v6168_v17  ;;  %v1904_v54 = vpop.f32.mrf.mxu1  ;;  %v6414_v24 = vpack.c.bf16 %v2302_v37, %v2301_v0  ;;  %v6416_v9 = vpack.c.bf16 %v2584_v28, %v2583_v62 }
 0x264   : > { %v6384_v20 = vadd.f32 %v2136_v23, %v2047_v56  ;;  %v1931_v36 = vadd.f32 %v1904_v54, %v1814_v1  ;;  %v6419_v23 = vpack.c.bf16 %v2559_v8, %v2558_v22 }
 0x269   : > { %v2021_v18 = vpop.f32.mrf.mxu2  ;;  %v1790_v45 = vpop.f32.mrf.mxu0 }
 0x26a   : > { %v2048_v53 = vadd.f32 %v2021_v18, %v1931_v36  ;;  %v2138_v47 = vpop.f32.mrf.mxu3  ;;  %v1815_v3 = vadd.f32 %v1790_v45, %v6186_v29  ;;  %v1907_v6 = vpop.f32.mrf.mxu1  ;;  %v5201_v18 = vld [vmem:[%s7500_s1 + $0xc] sm:$0x3] }
 0x26b   : > { %v3266_v45 = vsel %vm289_vm0, %v5201_v18, 0 }
 0x26c   : > { %v6395_v17 = vadd.f32 %v2138_v47, %v2048_v53  ;;  %v1932_v5 = vadd.f32 %v1907_v6, %v1815_v3  ;;  %5136 = vmatmul.msk.bf16.gmra.mxu0 %vm264_vm1, %v6257_v40  ;;  %v5228_v53 = vld [vmem:[%s7500_s1 + $0x2] sm:$0x3]  ;;  %v5210_v6 = vld [vmem:[%s7500_s1 + $0xe] sm:$0x3] }
 0x26d   : > { %5145 = vmatmul.msk.bf16.gmra.mxu1 %vm264_vm1, %v6259_v41  ;;  %v3782_v3 = vsel %vm289_vm0, %v5228_v53, 0  ;;  %3275 = vmatpush.bf16.msra.mxu0 %v3266_v45 }
 0x26e   : > { %5154 = vmatmul.msk.bf16.gmra.mxu2 %vm264_vm1, %v6390_v25  ;;  %3791 = vmatpush.bf16.msra.mxu3 %v3782_v3 }
 0x26f   : > { %5162 = vmatmul.msk.bf16.gmra.mxu3 %vm264_vm1, %v6393_v61 }
 0x271   : > { %v2024_v29 = vpop.f32.mrf.mxu2  ;;  %v1792_v46 = vpop.f32.mrf.mxu0 }
 0x272   : > { %v2049_v13 = vadd.f32 %v2024_v29, %v1932_v5  ;;  %v2141_v10 = vpop.f32.mrf.mxu3  ;;  %v1816_v15 = vadd.f32 %v1792_v46, %v6208_v11  ;;  %v1909_v32 = vpop.f32.mrf.mxu1  ;;  %v3383_v29 = vsel %vm289_vm0, %v5210_v6, 0  ;;  %v2585_v46 = vld [vmem:[%s5524_s30 + $0x178] sm:$0xff] }
 0x273   : > { %3392 = vmatpush.bf16.msra.mxu1 %v3383_v29 }
 0x274   : > { %v6406_v35 = vadd.f32 %v2141_v10, %v2049_v13  ;;  %v1933_v40 = vadd.f32 %v1909_v32, %v1816_v15  ;;  %v2303_v13 = vld [vmem:[%s5524_s30 + $0x139] sm:$0xff]  ;;  %v2304_v10 = vld [vmem:[%s5524_s30 + $0x141] sm:$0xff] }
 0x275   : > { %v2586_v15 = vld [vmem:[%s5524_s30 + $0x180] sm:$0xff]  ;;  %v2560_v32 = vld [vmem:[%s5524_s30 + $0x177] sm:$0xff]  ;;  %v6456_v22 = vpack.c.bf16 %v2304_v10, %v2303_v13 }
 0x276   : > { %v6458_v8 = vpack.c.bf16 %v2586_v15, %v2585_v46 }
 0x279   : > { %v2026_v60 = vpop.f32.mrf.mxu2  ;;  %v1795_v4 = vpop.f32.mrf.mxu0 }
 0x27a   : > { %v2050_v34 = vadd.f32 %v2026_v60, %v1933_v40  ;;  %v2143_v30 = vpop.f32.mrf.mxu3  ;;  %v1817_v11 = vadd.f32 %v1795_v4, %v6226_v48  ;;  %v1912_v56 = vpop.f32.mrf.mxu1  ;;  %v2561_v40 = vld [vmem:[%s5524_s30 + $0x17f] sm:$0xff] }
 0x27c   : > { %v6421_v19 = vadd.f32 %v2143_v30, %v2050_v34  ;;  %v1934_v1 = vadd.f32 %v1912_v56, %v1817_v11  ;;  %5137 = vmatmul.msk.bf16.gmra.mxu0 %vm264_vm1, %v6330_v27  ;;  %v6461_v30 = vpack.c.bf16 %v2561_v40, %v2560_v32 }
 0x27d   : > { %5146 = vmatmul.msk.bf16.gmra.mxu1 %vm264_vm1, %v6414_v24 }
 0x27e   : > { %5155 = vmatmul.msk.bf16.gmra.mxu2 %vm264_vm1, %v6416_v9 }
 0x27f   : > { %5163 = vmatmul.msk.bf16.gmra.mxu3 %vm264_vm1, %v6419_v23 }
 0x281   : > { %v2029_v54 = vpop.f32.mrf.mxu2  ;;  %v1797_v49 = vpop.f32.mrf.mxu0 }
 0x282   : > { %v2051_v48 = vadd.f32 %v2029_v54, %v1934_v1  ;;  %v2146_v36 = vpop.f32.mrf.mxu3  ;;  %v1818_v26 = vadd.f32 %v1797_v49, %v6264_v12  ;;  %v1914_v31 = vpop.f32.mrf.mxu1  ;;  %v3500_v12 = vsel %vm289_vm0, %v5219_v14, 0 }
 0x283   : > { %3509 = vmatpush.bf16.msra.mxu2 %v3500_v12 }
 0x284   : > { %v6441_v47 = vadd.f32 %v2146_v36, %v2051_v48  ;;  %v1935_v5 = vadd.f32 %v1914_v31, %v1818_v26 }
 0x289   : > { %v2031_v0 = vpop.f32.mrf.mxu2  ;;  %v1800_v28 = vpop.f32.mrf.mxu0 }
 0x28a   : > { %v2052_v37 = vadd.f32 %v2031_v0, %v1935_v5  ;;  %v2148_v62 = vpop.f32.mrf.mxu3  ;;  %v1819_v60 = vadd.f32 %v1800_v28, %v6282_v21  ;;  %v1917_v34 = vpop.f32.mrf.mxu1 }
 0x28c   : > { %v6463_v4 = vadd.f32 %v2148_v62, %v2052_v37  ;;  %v1936_v11 = vadd.f32 %v1917_v34, %v1819_v60  ;;  %5138 = vmatmul.msk.bf16.gmra.mxu0 %vm264_vm1, %v6350_v52 }
 0x28d   : > { %5147 = vmatmul.msk.bf16.gmra.mxu1 %vm264_vm1, %v6456_v22 }
 0x28e   : > { %5156 = vmatmul.msk.bf16.gmra.mxu2 %vm264_vm1, %v6458_v8 }
 0x28f   : > { %5164 = vmatmul.msk.bf16.gmra.mxu3 %vm264_vm1, %v6461_v30 }
 0x291   : > { %v2034_v56 = vpop.f32.mrf.mxu2  ;;  %v1802_v54 = vpop.f32.mrf.mxu0 }
 0x292   : > { %v2053_v21 = vadd.f32 %v2034_v56, %v1936_v11  ;;  %v2151_v1 = vpop.f32.mrf.mxu3  ;;  %v1820_v48 = vadd.f32 %v1802_v54, %v6297_v33  ;;  %v1919_v36 = vpop.f32.mrf.mxu1  ;;  %v2422_v33 = vld [vmem:[%s7501_s2 + $0x80] sm:$0xff] }
 0x294   : > { %v6474_v49 = vadd.f32 %v2151_v1, %v2053_v21  ;;  %v1937_v26 = vadd.f32 %v1919_v36, %v1820_v48  ;;  %v2424_v48 = vld [vmem:[%s7501_s2 + $0x90] sm:$0xff] }
 0x299   : > { %v2036_v31 = vpop.f32.mrf.mxu2  ;;  %v2233_v53 = vpop.f32.mrf.mxu0 }
 0x29a   : > { %v2054_v14 = vadd.f32 %v2036_v31, %v1937_v26  ;;  %v2153_v18 = vpop.f32.mrf.mxu3  ;;  %v2273_v12 = vadd.f32 %v2233_v53, %v6306_v16  ;;  %v2350_v45 = vpop.f32.mrf.mxu1 }
 0x29c   : > { %v6477_v3 = vadd.f32 %v2153_v18, %v2054_v14  ;;  %v2390_v6 = vadd.f32 %v2350_v45, %v2273_v12  ;;  %5166 = vmatmul.msk.bf16.vlgmr.msrb.gmra.mxu0 %vm264_vm1, %v6203_v7 }
 0x29d   : > { %5175 = vmatmul.msk.bf16.vlgmr.msrb.gmra.mxu1 %vm264_vm1, %v6206_v44 }
 0x29e   : > { %5184 = vmatmul.msk.bf16.vlgmr.msrb.gmra.mxu2 %vm264_vm1, %v6330_v27  ;;  %2406 = vst.msk [vmem:[%s6014_s23 + $0x80] sm:$0xff] %vm1244_vm2, %v2390_v6  ;;  %v2438_v7 = vmul.f32 %v2422_v33, %v2390_v6  ;;  %v2423_v27 = vld [vmem:[%s7501_s2 + $0x88] sm:$0xff]  ;;  %v2425_v33 = vld [vmem:[%s7501_s2 + $0x98] sm:$0xff] }
 0x29f   : > { %5193 = vmatmul.msk.bf16.vlgmr.msrb.gmra.mxu3 %vm264_vm1, %v6414_v24 }
 0x2a0   : > { %v2492_v15 = vmul.f32 %v2438_v7, %v2390_v6  ;;  %v2454_v40 = vsel %vm1244_vm2, %v2438_v7, 0.0  ;;  %v3104_v7 = vld [vmem:[%s5524_s30 + $0x151] sm:$0xff] }
 0x2a1   : > { %v2632_v16 = vpop.f32.mrf.mxu2  ;;  %v2235_v29 = vpop.f32.mrf.mxu0 }
 0x2a2   : > { %v2708_v5 = vpop.f32.mrf.mxu3  ;;  %v2274_v44 = vadd.f32 %v2235_v29, %v6313_v50  ;;  %v2352_v10 = vpop.f32.mrf.mxu1  ;;  %v2508_v34 = vsel %vm1244_vm2, %v2492_v15, 0.0  ;;  %v3103_v29 = vld [vmem:[%s5524_s30 + $0x149] sm:$0xff] }
 0x2a3   : > { %v6492_v13 = vadd.f32 %v2708_v5, %v2632_v16 }
 0x2a4   : > { %v2391_v46 = vadd.f32 %v2352_v10, %v2274_v44 }
 0x2a6   : > { %2407 = vst.msk [vmem:[%s6014_s23 + $0x88] sm:$0xff] %vm1244_vm2, %v2391_v46  ;;  %v2439_v32 = vmul.f32 %v2423_v27, %v2391_v46 }
 0x2a8   : > { %v2455_v0 = vsel %vm1244_vm2, %v2439_v32, 0.0  ;;  %v2493_v37 = vmul.f32 %v2439_v32, %v2391_v46 }
 0x2a9   : > { %v2634_v62 = vpop.f32.mrf.mxu2  ;;  %v2456_v28 = vadd.f32 %v2455_v0, %v2454_v40  ;;  %v2238_v50 = vpop.f32.mrf.mxu0 }
 0x2aa   : > { %v2710_v60 = vpop.f32.mrf.mxu3  ;;  %v2509_v11 = vsel %vm1244_vm2, %v2493_v37, 0.0  ;;  %v2275_v21 = vadd.f32 %v2238_v50, %v6322_v55  ;;  %v2355_v1 = vpop.f32.mrf.mxu1 }
 0x2ab   : > { %v6504_v56 = vadd.f32 %v2710_v60, %v2634_v62  ;;  %v2510_v54 = vadd.f32 %v2509_v11, %v2508_v34  ;;  %v6537_v62 = vpack.c.bf16 %v3104_v7, %v3103_v29  ;;  %v2426_v60 = vld [vmem:[%s7501_s2 + $0xa0] sm:$0xff] }
 0x2ac   : > { %v2392_v36 = vadd.f32 %v2355_v1, %v2275_v21  ;;  %5167 = vmatmul.msk.bf16.gmra.mxu0 %vm264_vm1, %v6259_v41 }
 0x2ad   : > { %5176 = vmatmul.msk.bf16.gmra.mxu1 %vm264_vm1, %v6262_v51 }
 0x2ae   : > { %5185 = vmatmul.msk.bf16.gmra.mxu2 %vm264_vm1, %v6350_v52  ;;  %2408 = vst.msk [vmem:[%s6014_s23 + $0x90] sm:$0xff] %vm1244_vm2, %v2392_v36  ;;  %v2440_v55 = vmul.f32 %v2424_v48, %v2392_v36 }
 0x2af   : > { %5194 = vmatmul.msk.bf16.gmra.mxu3 %vm264_vm1, %v6456_v22 }
 0x2b0   : > { %v2457_v26 = vsel %vm1244_vm2, %v2440_v55, 0.0  ;;  %v2494_v31 = vmul.f32 %v2440_v55, %v2392_v36 }
 0x2b1   : > { %v2637_v14 = vpop.f32.mrf.mxu2  ;;  %v2458_v41 = vadd.f32 %v2457_v26, %v2456_v28  ;;  %v2240_v53 = vpop.f32.mrf.mxu0 }
 0x2b2   : > { %v2713_v18 = vpop.f32.mrf.mxu3  ;;  %v2511_v51 = vsel %vm1244_vm2, %v2494_v31, 0.0  ;;  %v2276_v52 = vadd.f32 %v2240_v53, %v6333_v63  ;;  %v2357_v45 = vpop.f32.mrf.mxu1  ;;  %v2427_v31 = vld [vmem:[%s7501_s2 + $0xa8] sm:$0xff] }
 0x2b3   : > { %v6522_v12 = vadd.f32 %v2713_v18, %v2637_v14  ;;  %v2512_v6 = vadd.f32 %v2511_v51, %v2510_v54  ;;  %v3105_v18 = vld [vmem:[%s5524_s30 + $0x159] sm:$0xff]  ;;  %v3106_v53 = vld [vmem:[%s5524_s30 + $0x161] sm:$0xff] }
 0x2b4   : > { %v2393_v16 = vadd.f32 %v2357_v45, %v2276_v52 }
 0x2b6   : > { %2409 = vst.msk [vmem:[%s6014_s23 + $0x98] sm:$0xff] %vm1244_vm2, %v2393_v16  ;;  %v2441_v5 = vmul.f32 %v2425_v33, %v2393_v16 }
 0x2b8   : > { %v2459_v44 = vsel %vm1244_vm2, %v2441_v5, 0.0  ;;  %v2495_v10 = vmul.f32 %v2441_v5, %v2393_v16 }
 0x2b9   : > { %v2639_v27 = vpop.f32.mrf.mxu2  ;;  %v2460_v46 = vadd.f32 %v2459_v44, %v2458_v41  ;;  %v2243_v63 = vpop.f32.mrf.mxu0  ;;  %v6569_v44 = vpack.c.bf16 %v3106_v53, %v3105_v18 }
 0x2ba   : > { %v2715_v15 = vpop.f32.mrf.mxu3  ;;  %v2513_v32 = vsel %vm1244_vm2, %v2495_v10, 0.0  ;;  %v2277_v0 = vadd.f32 %v2243_v63, %v6342_v57  ;;  %v2360_v37 = vpop.f32.mrf.mxu1 }
 0x2bb   : > { %v6534_v40 = vadd.f32 %v2715_v15, %v2639_v27  ;;  %v2514_v28 = vadd.f32 %v2513_v32, %v2512_v6  ;;  %v2428_v27 = vld [vmem:[%s7501_s2 + $0xb0] sm:$0xff] }
 0x2bc   : > { %v2394_v50 = vadd.f32 %v2360_v37, %v2277_v0  ;;  %5168 = vmatmul.msk.bf16.gmra.mxu0 %vm264_vm1, %v6414_v24 }
 0x2bd   : > { %5177 = vmatmul.msk.bf16.gmra.mxu1 %vm264_vm1, %v6371_v39 }
 0x2be   : > { %5186 = vmatmul.msk.bf16.gmra.mxu2 %vm264_vm1, %v6368_v38  ;;  %2410 = vst.msk [vmem:[%s6014_s23 + $0xa0] sm:$0xff] %vm1244_vm2, %v2394_v50  ;;  %v2442_v57 = vmul.f32 %v2426_v60, %v2394_v50 }
 0x2bf   : > { %5195 = vmatmul.msk.bf16.gmra.mxu3 %vm264_vm1, %v6537_v62 }
 0x2c0   : > { %v2461_v34 = vsel %vm1244_vm2, %v2442_v57, 0.0  ;;  %v2496_v11 = vmul.f32 %v2442_v57, %v2394_v50  ;;  %v2429_v57 = vld [vmem:[%s7501_s2 + $0xb8] sm:$0xff] }
 0x2c1   : > { %v2642_v21 = vpop.f32.mrf.mxu2  ;;  %v2462_v24 = vadd.f32 %v2461_v34, %v2460_v46  ;;  %v2245_v54 = vpop.f32.mrf.mxu0 }
 0x2c2   : > { %v2718_v1 = vpop.f32.mrf.mxu3  ;;  %v2515_v48 = vsel %vm1244_vm2, %v2496_v11, 0.0  ;;  %v2278_v38 = vadd.f32 %v2245_v54, %v6353_v59  ;;  %v2362_v55 = vpop.f32.mrf.mxu1 }
 0x2c3   : > { %v6554_v36 = vadd.f32 %v2718_v1, %v2642_v21  ;;  %v2516_v26 = vadd.f32 %v2515_v48, %v2514_v28  ;;  %v3107_v21 = vld [vmem:[%s5524_s30 + $0x169] sm:$0xff] }
 0x2c4   : > { %v2395_v14 = vadd.f32 %v2362_v55, %v2278_v38 }
 0x2c6   : > { %2411 = vst.msk [vmem:[%s6014_s23 + $0xa8] sm:$0xff] %vm1244_vm2, %v2395_v14  ;;  %v2443_v41 = vmul.f32 %v2427_v31, %v2395_v14 }
 0x2c8   : > { %v2463_v51 = vsel %vm1244_vm2, %v2443_v41, 0.0  ;;  %v2497_v52 = vmul.f32 %v2443_v41, %v2395_v14 }
 0x2c9   : > { %v2644_v45 = vpop.f32.mrf.mxu2  ;;  %v2464_v6 = vadd.f32 %v2463_v51, %v2462_v24  ;;  %v2248_v59 = vpop.f32.mrf.mxu0  ;;  %v3108_v24 = vld [vmem:[%s5524_s30 + $0x171] sm:$0xff]  ;;  %v2430_v51 = vld [vmem:[%s7501_s2 + $0xc0] sm:$0xff] }
 0x2ca   : > { %v2720_v33 = vpop.f32.mrf.mxu3  ;;  %v2517_v16 = vsel %vm1244_vm2, %v2497_v52, 0.0  ;;  %v2279_v29 = vadd.f32 %v2248_v59, %v6362_v58  ;;  %v2365_v7 = vpop.f32.mrf.mxu1  ;;  %v6601_v18 = vpack.c.bf16 %v3108_v24, %v3107_v21  ;;  %v2432_v24 = vld [vmem:[%s7501_s2 + $0xd0] sm:$0xff] }
 0x2cb   : > { %v6566_v5 = vadd.f32 %v2720_v33, %v2644_v45  ;;  %v2518_v10 = vadd.f32 %v2517_v16, %v2516_v26 }
 0x2cc   : > { %v2396_v46 = vadd.f32 %v2365_v7, %v2279_v29  ;;  %5169 = vmatmul.msk.bf16.gmra.mxu0 %vm264_vm1, %v6456_v22 }
 0x2cd   : > { %5178 = vmatmul.msk.bf16.gmra.mxu1 %vm264_vm1, %v6393_v61 }
 0x2ce   : > { %5187 = vmatmul.msk.bf16.gmra.mxu2 %vm264_vm1, %v6390_v25  ;;  %2412 = vst.msk [vmem:[%s6014_s23 + $0xb0] sm:$0xff] %vm1244_vm2, %v2396_v46  ;;  %v2444_v58 = vmul.f32 %v2428_v27, %v2396_v46 }
 0x2cf   : > { %5196 = vmatmul.msk.bf16.gmra.mxu3 %vm264_vm1, %v6569_v44 }
 0x2d0   : > { %v2465_v15 = vsel %vm1244_vm2, %v2444_v58, 0.0  ;;  %v2498_v63 = vmul.f32 %v2444_v58, %v2396_v46  ;;  %v2431_v46 = vld [vmem:[%s7501_s2 + $0xc8] sm:$0xff] }
 0x2d1   : > { %v2647_v32 = vpop.f32.mrf.mxu2  ;;  %v2466_v22 = vadd.f32 %v2465_v15, %v2464_v6  ;;  %v2250_v37 = vpop.f32.mrf.mxu0 }
 0x2d2   : > { %v2723_v0 = vpop.f32.mrf.mxu3  ;;  %v2519_v61 = vsel %vm1244_vm2, %v2498_v63, 0.0  ;;  %v2280_v25 = vadd.f32 %v2250_v37, %v6373_v2  ;;  %v2367_v60 = vpop.f32.mrf.mxu1  ;;  %v3109_v63 = vld [vmem:[%s5524_s30 + $0x179] sm:$0xff] }
 0x2d3   : > { %v6586_v28 = vadd.f32 %v2723_v0, %v2647_v32  ;;  %v2520_v50 = vadd.f32 %v2519_v61, %v2518_v10  ;;  %v3110_v32 = vld [vmem:[%s5524_s30 + $0x181] sm:$0xff] }
 0x2d4   : > { %v2397_v34 = vadd.f32 %v2367_v60, %v2280_v25 }
 0x2d6   : > { %2413 = vst.msk [vmem:[%s6014_s23 + $0xb8] sm:$0xff] %vm1244_vm2, %v2397_v34  ;;  %v2445_v11 = vmul.f32 %v2429_v57, %v2397_v34 }
 0x2d8   : > { %v2467_v1 = vsel %vm1244_vm2, %v2445_v11, 0.0  ;;  %v2499_v54 = vmul.f32 %v2445_v11, %v2397_v34  ;;  %v6633_v11 = vpack.c.bf16 %v3110_v32, %v3109_v63 }
 0x2d9   : > { %v2649_v48 = vpop.f32.mrf.mxu2  ;;  %v2468_v38 = vadd.f32 %v2467_v1, %v2466_v22  ;;  %v2253_v2 = vpop.f32.mrf.mxu0 }
 0x2da   : > { %v2725_v55 = vpop.f32.mrf.mxu3  ;;  %v2521_v26 = vsel %vm1244_vm2, %v2499_v54, 0.0  ;;  %v2281_v14 = vadd.f32 %v2253_v2, %v6384_v20  ;;  %v2370_v41 = vpop.f32.mrf.mxu1 }
 0x2db   : > { %v6598_v31 = vadd.f32 %v2725_v55, %v2649_v48  ;;  %v2522_v53 = vadd.f32 %v2521_v26, %v2520_v50 }
 0x2dc   : > { %v2398_v52 = vadd.f32 %v2370_v41, %v2281_v14  ;;  %5170 = vmatmul.msk.bf16.gmra.mxu0 %vm264_vm1, %v6537_v62 }
 0x2dd   : > { %5179 = vmatmul.msk.bf16.gmra.mxu1 %vm264_vm1, %v6419_v23 }
 0x2de   : > { %5188 = vmatmul.msk.bf16.gmra.mxu2 %vm264_vm1, %v6416_v9  ;;  %2414 = vst.msk [vmem:[%s6014_s23 + $0xc0] sm:$0xff] %vm1244_vm2, %v2398_v52  ;;  %v2446_v20 = vmul.f32 %v2430_v51, %v2398_v52  ;;  %v2433_v51 = vld [vmem:[%s7501_s2 + $0xd8] sm:$0xff] }
 0x2df   : > { %5197 = vmatmul.msk.bf16.gmra.mxu3 %vm264_vm1, %v6601_v18 }
 0x2e0   : > { %v2469_v45 = vsel %vm1244_vm2, %v2446_v20, 0.0  ;;  %v2500_v6 = vmul.f32 %v2446_v20, %v2398_v52  ;;  %v2877_v20 = vld [vmem:[%s5524_s30 + $0x187] sm:$0xff] }
 0x2e1   : > { %v2652_v33 = vpop.f32.mrf.mxu2  ;;  %v2470_v59 = vadd.f32 %v2469_v45, %v2468_v38  ;;  %v2255_v29 = vpop.f32.mrf.mxu0 }
 0x2e2   : > { %v2728_v16 = vpop.f32.mrf.mxu3  ;;  %v2523_v23 = vsel %vm1244_vm2, %v2500_v6, 0.0  ;;  %v2282_v9 = vadd.f32 %v2255_v29, %v6395_v17  ;;  %v2372_v10 = vpop.f32.mrf.mxu1  ;;  %v2878_v6 = vld [vmem:[%s5524_s30 + $0x18f] sm:$0xff] }
 0x2e3   : > { %v6618_v7 = vadd.f32 %v2728_v16, %v2652_v33  ;;  %v2524_v27 = vadd.f32 %v2523_v23, %v2522_v53  ;;  %v2994_v33 = vld [vmem:[%s5524_s30 + $0x188] sm:$0xff]  ;;  %v3112_v29 = vld [vmem:[%s5524_s30 + $0x191] sm:$0xff] }
 0x2e4   : > { %v2399_v58 = vadd.f32 %v2372_v10, %v2282_v9  ;;  %v3111_v16 = vld [vmem:[%s5524_s30 + $0x189] sm:$0xff] }
 0x2e6   : > { %2415 = vst.msk [vmem:[%s6014_s23 + $0xc8] sm:$0xff] %vm1244_vm2, %v2399_v58  ;;  %v2447_v15 = vmul.f32 %v2431_v46, %v2399_v58 }
 0x2e8   : > { %v2471_v22 = vsel %vm1244_vm2, %v2447_v15, 0.0  ;;  %v2501_v0 = vmul.f32 %v2447_v15, %v2399_v58  ;;  %v6665_v58 = vpack.c.bf16 %v2878_v6, %v2877_v20  ;;  %v3114_v20 = vld [vmem:[%s5524_s30 + $0x1a1] sm:$0xff] }
 0x2e9   : > { %v2654_v37 = vpop.f32.mrf.mxu2  ;;  %v2472_v61 = vadd.f32 %v2471_v22, %v2470_v59  ;;  %v2258_v17 = vpop.f32.mrf.mxu0  ;;  %v2995_v59 = vld [vmem:[%s5524_s30 + $0x190] sm:$0xff]  ;;  %v3731_v6 = vld [vmem:[%s7500_s1] sm:$0x3] }
 0x2ea   : > { %v2730_v25 = vpop.f32.mrf.mxu3  ;;  %v2525_v60 = vsel %vm1244_vm2, %v2501_v0, 0.0  ;;  %v2283_v57 = vadd.f32 %v2258_v17, %v6406_v35  ;;  %v2375_v34 = vpop.f32.mrf.mxu1  ;;  %v6667_v15 = vpack.c.bf16 %v2995_v59, %v2994_v33  ;;  %v5263_v33 = vld [vmem:[%s7500_s1 + $0x8] sm:$0x3] }
 0x2eb   : > { %v6630_v50 = vadd.f32 %v2730_v25, %v2654_v37  ;;  %v2526_v21 = vadd.f32 %v2525_v60, %v2524_v27  ;;  %v6673_v37 = vpack.c.bf16 %v3112_v29, %v3111_v16  ;;  %v2434_v25 = vld [vmem:[%s7501_s2 + $0xe0] sm:$0xff] }
 0x2ec   : > { %v2400_v1 = vadd.f32 %v2375_v34, %v2283_v57  ;;  %5171 = vmatmul.msk.bf16.gmra.mxu0 %vm264_vm1, %v6569_v44 }
 0x2ed   : > { %5180 = vmatmul.msk.bf16.gmra.mxu1 %vm264_vm1, %v6461_v30 }
 0x2ee   : > { %5189 = vmatmul.msk.bf16.gmra.mxu2 %vm264_vm1, %v6458_v8  ;;  %2416 = vst.msk [vmem:[%s6014_s23 + $0xd0] sm:$0xff] %vm1244_vm2, %v2400_v1  ;;  %v2448_v35 = vmul.f32 %v2432_v24, %v2400_v1 }
 0x2ef   : > { %5198 = vmatmul.msk.bf16.gmra.mxu3 %vm264_vm1, %v6633_v11 }
 0x2f0   : > { %v2473_v54 = vsel %vm1244_vm2, %v2448_v35, 0.0  ;;  %v2502_v48 = vmul.f32 %v2448_v35, %v2400_v1 }
 0x2f1   : > { %v2657_v38 = vpop.f32.mrf.mxu2  ;;  %v2474_v55 = vadd.f32 %v2473_v54, %v2472_v61  ;;  %v2260_v8 = vpop.f32.mrf.mxu0 }
 0x2f2   : > { %v2733_v30 = vpop.f32.mrf.mxu3  ;;  %v2527_v2 = vsel %vm1244_vm2, %v2502_v48, 0.0  ;;  %v2284_v14 = vadd.f32 %v2260_v8, %v6421_v19  ;;  %v2377_v41 = vpop.f32.mrf.mxu1 }
 0x2f3   : > { %v6650_v26 = vadd.f32 %v2733_v30, %v2657_v38  ;;  %v2528_v53 = vadd.f32 %v2527_v2, %v2526_v21  ;;  %v2435_v30 = vld [vmem:[%s7501_s2 + $0xe8] sm:$0xff]  ;;  %v2879_v2 = vld [vmem:[%s5524_s30 + $0x197] sm:$0xff] }
 0x2f4   : > { %v2401_v52 = vadd.f32 %v2377_v41, %v2284_v14  ;;  %v2880_v14 = vld [vmem:[%s5524_s30 + $0x19f] sm:$0xff] }
 0x2f5   : > { %v2996_v41 = vld [vmem:[%s5524_s30 + $0x198] sm:$0xff] }
 0x2f6   : > { %2417 = vst.msk [vmem:[%s6014_s23 + $0xd8] sm:$0xff] %vm1244_vm2, %v2401_v52  ;;  %v2449_v45 = vmul.f32 %v2433_v51, %v2401_v52  ;;  %v2997_v51 = vld [vmem:[%s5524_s30 + $0x1a0] sm:$0xff] }
 0x2f8   : > { %v2475_v23 = vsel %vm1244_vm2, %v2449_v45, 0.0  ;;  %v2503_v9 = vmul.f32 %v2449_v45, %v2401_v52  ;;  %v3113_v52 = vld [vmem:[%s5524_s30 + $0x199] sm:$0xff]  ;;  %v6704_v45 = vpack.c.bf16 %v2880_v14, %v2879_v2 }
 0x2f9   : > { %v2659_v19 = vpop.f32.mrf.mxu2  ;;  %v2476_v10 = vadd.f32 %v2475_v23, %v2474_v55  ;;  %v2263_v46 = vpop.f32.mrf.mxu0 }
 0x2fa   : > { %v2735_v27 = vpop.f32.mrf.mxu3  ;;  %v2529_v63 = vsel %vm1244_vm2, %v2503_v9, 0.0  ;;  %v2285_v22 = vadd.f32 %v2263_v46, %v6441_v47  ;;  %v2380_v0 = vpop.f32.mrf.mxu1  ;;  %v3858_v9 = vsel %vm289_vm0, %v3731_v6, 0 }
 0x2fb   : > { %v6670_v32 = vadd.f32 %v2735_v27, %v2659_v19  ;;  %v2530_v61 = vadd.f32 %v2529_v63, %v2528_v53  ;;  %v5245_v19 = vld [vmem:[%s7500_s1 + $0x4] sm:$0x3]  ;;  %v6721_v63 = vpack.c.bf16 %v2997_v51, %v2996_v41  ;;  %3867 = vmatpush.bf16.msrb.mxu0 %v3858_v9 }
 0x2fc   : > { %v2402_v17 = vadd.f32 %v2380_v0, %v2285_v22  ;;  %5172 = vmatmul.msk.bf16.gmra.mxu0 %vm264_vm1, %v6601_v18  ;;  %v4193_v22 = vsel %vm289_vm0, %v5263_v33, 0  ;;  %v3959_v0 = vsel %vm289_vm0, %v5245_v19, 0  ;;  %v3333_v33 = vld [vmem:[%s5524_s30 + $0x148] sm:$0xff] }
 0x2fd   : > { %5181 = vmatmul.msk.bf16.gmra.mxu1 %vm264_vm1, %v6665_v58  ;;  %4202 = vmatpush.bf16.msrb.mxu3 %v4193_v22 }
 0x2fe   : > { %5190 = vmatmul.msk.bf16.gmra.mxu2 %vm264_vm1, %v6667_v15  ;;  %2418 = vst.msk [vmem:[%s6014_s23 + $0xe0] sm:$0xff] %vm1244_vm2, %v2402_v17  ;;  %v2450_v47 = vmul.f32 %v2434_v25, %v2402_v17  ;;  %3968 = vmatpush.bf16.msrb.mxu1 %v3959_v0 }
 0x2ff   : > { %5199 = vmatmul.msk.bf16.gmra.mxu3 %vm264_vm1, %v6673_v37 }
 0x300   : > { %v2477_v60 = vsel %vm1244_vm2, %v2450_v47, 0.0  ;;  %v2504_v57 = vmul.f32 %v2450_v47, %v2402_v17 }
 0x301   : > { %v2662_v34 = vpop.f32.mrf.mxu2  ;;  %v2478_v21 = vadd.f32 %v2477_v60, %v2476_v10  ;;  %v2265_v1 = vpop.f32.mrf.mxu0  ;;  %v6729_v60 = vpack.c.bf16 %v3114_v20, %v3113_v52  ;;  %v2437_v52 = vld [vmem:[%s7501_s2 + $0xf8] sm:$0xff] }
 0x302   : > { %v2738_v24 = vpop.f32.mrf.mxu3  ;;  %v2531_v35 = vsel %vm1244_vm2, %v2504_v57, 0.0  ;;  %v2286_v48 = vadd.f32 %v2265_v1, %v6463_v4  ;;  %v2382_v38 = vpop.f32.mrf.mxu1  ;;  %v5254_v4 = vld [vmem:[%s7500_s1 + $0x6] sm:$0x3] }
 0x303   : > { %v6690_v54 = vadd.f32 %v2738_v24, %v2662_v34  ;;  %v2532_v55 = vadd.f32 %v2531_v35, %v2530_v61  ;;  %v4076_v23 = vsel %vm289_vm0, %v5254_v4, 0  ;;  %v2436_v34 = vld [vmem:[%s7501_s2 + $0xf0] sm:$0xff] }
 0x304   : > { %v2403_v8 = vadd.f32 %v2382_v38, %v2286_v48  ;;  %4085 = vmatpush.bf16.msrb.mxu2 %v4076_v23  ;;  %v1324_v48 = vrot.slane %v6291_v42, 4 }
 0x306   : > { %2419 = vst.msk [vmem:[%s6014_s23 + $0xe8] sm:$0xff] %vm1244_vm2, %v2403_v8  ;;  %v2451_v53 = vmul.f32 %v2435_v30, %v2403_v8  ;;  %v1325_v4 = vadd.f32 %v1324_v48, %v6291_v42 }
 0x308   : > { %v2479_v59 = vsel %vm1244_vm2, %v2451_v53, 0.0  ;;  %v2505_v16 = vmul.f32 %v2451_v53, %v2403_v8  ;;  %v1378_v53 = vrot.slane %v6294_v43, 4  ;;  %v1326_v9 = vrot.slane %v1325_v4, 2 }
 0x309   : > { %v2664_v29 = vpop.f32.mrf.mxu2  ;;  %v2480_v10 = vadd.f32 %v2479_v59, %v2478_v21  ;;  %v2268_v46 = vpop.f32.mrf.mxu0  ;;  %v3334_v59 = vld [vmem:[%s5524_s30 + $0x150] sm:$0xff] }
 0x30a   : > { %v2740_v27 = vpop.f32.mrf.mxu3  ;;  %v2533_v61 = vsel %vm1244_vm2, %v2505_v16, 0.0  ;;  %v2287_v17 = vadd.f32 %v2268_v46, %v6474_v49  ;;  %v2385_v47 = vpop.f32.mrf.mxu1  ;;  %v1379_v16 = vadd.f32 %v1378_v53, %v6294_v43  ;;  %v3349_v46 = vpack.c.bf16 %v3334_v59, %v3333_v33  ;;  %v3218_v59 = vld [vmem:[%s5524_s30 + $0x157] sm:$0xff] }
 0x30b   : > { %v6726_v25 = vadd.f32 %v2740_v27, %v2664_v29  ;;  %v2534_v57 = vadd.f32 %v2533_v61, %v2532_v55 }
 0x30c   : > { %v2404_v21 = vadd.f32 %v2385_v47, %v2287_v17  ;;  %5173 = vmatmul.msk.bf16.gmra.mxu0 %vm264_vm1, %v6633_v11  ;;  %v1380_v17 = vrot.slane %v1379_v16, 2 }
 0x30d   : > { %5182 = vmatmul.msk.bf16.gmra.mxu1 %vm264_vm1, %v6704_v45 }
 0x30e   : > { %5191 = vmatmul.msk.bf16.gmra.mxu2 %vm264_vm1, %v6721_v63  ;;  %2420 = vst.msk [vmem:[%s6014_s23 + $0xf0] sm:$0xff] %vm1244_vm2, %v2404_v21  ;;  %v2452_v49 = vmul.f32 %v2436_v34, %v2404_v21  ;;  %v1327_v34 = vadd.f32 %v1326_v9, %v1325_v4 }
 0x30f   : > { %5200 = vmatmul.msk.bf16.gmra.mxu3 %vm264_vm1, %v6729_v60 }
 0x310   : > { %v2481_v24 = vsel %vm1244_vm2, %v2452_v49, 0.0  ;;  %v2506_v1 = vmul.f32 %v2452_v49, %v2404_v21  ;;  %v1328_v48 = vrot.slane %v1327_v34, 1 }
 0x311   : > { %v2667_v35 = vpop.f32.mrf.mxu2  ;;  %v2482_v38 = vadd.f32 %v2481_v24, %v2480_v10  ;;  %v2270_v30 = vpop.f32.mrf.mxu0 }
 0x312   : > { %v2743_v55 = vpop.f32.mrf.mxu3  ;;  %v2535_v8 = vsel %vm1244_vm2, %v2506_v1, 0.0  ;;  %v2288_v14 = vadd.f32 %v2270_v30, %v6477_v3  ;;  %v2387_v41 = vpop.f32.mrf.mxu1  ;;  %v1329_v4 = vadd.f32 %v1328_v48, %v1327_v34  ;;  %v3220_v48 = vld [vmem:[%s5524_s30 + $0x167] sm:$0xff] }
 0x313   : > { %v6747_v2 = vadd.f32 %v2743_v55, %v2667_v35  ;;  %v2536_v51 = vadd.f32 %v2535_v8, %v2534_v57 }
 0x314   : > { %v2405_v20 = vadd.f32 %v2387_v41, %v2288_v14 }
 0x316   : > { %2421 = vst.msk [vmem:[%s6014_s23 + $0xf8] sm:$0xff] %vm1244_vm2, %v2405_v20  ;;  %v2453_v6 = vmul.f32 %v2437_v52, %v2405_v20 }
 0x318   : > { %v2483_v3 = vsel %vm1244_vm2, %v2453_v6, 0.0  ;;  %v2507_v29 = vmul.f32 %v2453_v6, %v2405_v20 }
 0x319   : > { %v2669_v23 = vpop.f32.mrf.mxu2  ;;  %v2484_v19 = vadd.f32 %v2483_v3, %v2482_v38  ;;  %v2809_v27 = vpop.f32.mrf.mxu0  ;;  %v3335_v3 = vld [vmem:[%s5524_s30 + $0x158] sm:$0xff] }
 0x31a   : > { %v2745_v10 = vpop.f32.mrf.mxu3  ;;  %v2537_v22 = vsel %vm1244_vm2, %v2507_v29, 0.0  ;;  %v2849_v42 = vadd.f32 %v2809_v27, %v6492_v13  ;;  %v2926_v61 = vpop.f32.mrf.mxu1  ;;  %v1381_v13 = vadd.f32 %v1380_v17, %v1379_v16  ;;  %v3219_v16 = vld [vmem:[%s5524_s30 + $0x15f] sm:$0xff] }
 0x31b   : > { %v6762_v0 = vadd.f32 %v2745_v10, %v2669_v23  ;;  %v2485_v47 = vrot.slane %v2484_v19, 4  ;;  %v2538_v57 = vadd.f32 %v2537_v22, %v2536_v51  ;;  %v3336_v29 = vld [vmem:[%s5524_s30 + $0x160] sm:$0xff] }
 0x31c   : > { %v2966_v43 = vadd.f32 %v2926_v61, %v2849_v42  ;;  %5202 = vmatmul.msk.bf16.vlgmr.msra.gmra.mxu0 %vm264_vm1, %v6371_v39  ;;  %v1382_v41 = vrot.slane %v1381_v13, 1  ;;  %v3350_v42 = vpack.c.bf16 %v3336_v29, %v3335_v3 }
 0x31d   : > { %v2486_v21 = vadd.f32 %v2485_v47, %v2484_v19  ;;  %v2539_v49 = vrot.slane %v2538_v57, 4  ;;  %5211 = vmatmul.msk.bf16.vlgmr.msra.gmra.mxu1 %vm264_vm1, %v3349_v46 }
 0x31e   : > { %5220 = vmatmul.msk.bf16.vlgmr.msra.gmra.mxu2 %vm264_vm1, %v6537_v62  ;;  %v1383_v23 = vadd.f32 %v1382_v41, %v1381_v13 }
 0x31f   : > { %5229 = vmatmul.msk.bf16.vlgmr.msra.gmra.mxu3 %vm264_vm1, %v6667_v15  ;;  %v2487_v24 = vrot.slane %v2486_v21, 2  ;;  %v2540_v1 = vadd.f32 %v2539_v49, %v2538_v57 }
 0x321   : > { %v3043_v35 = vpop.f32.mrf.mxu2  ;;  %v2488_v38 = vadd.f32 %v2487_v24, %v2486_v21  ;;  %v2541_v39 = vrot.slane %v2540_v1, 2  ;;  %v2811_v8 = vpop.f32.mrf.mxu0 }
 0x322   : > { %v3083_v55 = vadd.f32 %v3043_v35, %v2966_v43  ;;  %v3160_v30 = vpop.f32.mrf.mxu3  ;;  %v2850_v14 = vadd.f32 %v2811_v8, %v6504_v56  ;;  %v2928_v62 = vpop.f32.mrf.mxu1  ;;  %v3233_v56 = vpack.c.bf16 %v3219_v16, %v3218_v59  ;;  %v3737_v8 = vld [vmem:[%s5524_s30 + $0x1b0] sm:$0xff] }
 0x323   : > { %v2489_v53 = vrot.slane %v2488_v38, 1  ;;  %v2542_v51 = vadd.f32 %v2541_v39, %v2540_v1  ;;  %v3337_v39 = vld [vmem:[%s5524_s30 + $0x168] sm:$0xff] }
 0x324   : > { %v6773_v52 = vadd.f32 %v3160_v30, %v3083_v55  ;;  %v2967_v20 = vadd.f32 %v2928_v62, %v2850_v14  ;;  %v3338_v55 = vld [vmem:[%s5524_s30 + $0x170] sm:$0xff]  ;;  %v3736_v30 = vld [vmem:[%s5524_s30 + $0x1a8] sm:$0xff] }
 0x325   : > { %v2490_v6 = vadd.f32 %v2489_v53, %v2488_v38  ;;  %v2543_v33 = vrot.slane %v2542_v51, 1  ;;  %v3221_v38 = vld [vmem:[%s5524_s30 + $0x16f] sm:$0xff] }
 0x326   : > { %v3234_v14 = vpack.c.bf16 %v3221_v38, %v3220_v48 }
 0x327   : > { %v2544_v9 = vadd.f32 %v2543_v33, %v2542_v51  ;;  %v6779_v19 = vadd.f32 %v2490_v6, %v1329_v4  ;;  %v3351_v51 = vpack.c.bf16 %v3338_v55, %v3337_v39 }
 0x329   : > { %v3045_v10 = vpop.f32.mrf.mxu2  ;;  %v2814_v22 = vpop.f32.mrf.mxu0  ;;  %v6781_v61 = vadd.f32 %v2544_v9, %v1383_v23 }
 0x32a   : > { %v3084_v27 = vadd.f32 %v3045_v10, %v2967_v20  ;;  %v3162_v46 = vpop.f32.mrf.mxu3  ;;  %v2851_v17 = vadd.f32 %v2814_v22, %v6522_v12  ;;  %v2931_v47 = vpop.f32.mrf.mxu1  ;;  %v3340_v22 = vld [vmem:[%s5524_s30 + $0x180] sm:$0xff] }
 0x32c   : > { %v6784_v57 = vadd.f32 %v3162_v46, %v3084_v27  ;;  %v2968_v43 = vadd.f32 %v2931_v47, %v2851_v17  ;;  %5203 = vmatmul.msk.bf16.gmra.mxu0 %vm264_vm1, %v3233_v56  ;;  %v3222_v56 = vld [vmem:[%s5524_s30 + $0x177] sm:$0xff]  ;;  %v3223_v27 = vld [vmem:[%s5524_s30 + $0x17f] sm:$0xff] }
 0x32d   : > { %5212 = vmatmul.msk.bf16.gmra.mxu1 %vm264_vm1, %v3350_v42  ;;  %v3339_v46 = vld [vmem:[%s5524_s30 + $0x178] sm:$0xff]  ;;  %v3739_v17 = vld [vmem:[%s5524_s30 + $0x1c0] sm:$0xff]  ;;  %v3235_v47 = vpack.c.bf16 %v3223_v27, %v3222_v56 }
 0x32e   : > { %5221 = vmatmul.msk.bf16.gmra.mxu2 %vm264_vm1, %v6569_v44  ;;  %v3738_v42 = vld [vmem:[%s5524_s30 + $0x1b8] sm:$0xff] }
 0x32f   : > { %5230 = vmatmul.msk.bf16.gmra.mxu3 %vm264_vm1, %v6721_v63  ;;  %v3742_v27 = vld [vmem:[%s5524_s30 + $0x1d8] sm:$0xff] }
 0x331   : > { %v3048_v12 = vpop.f32.mrf.mxu2  ;;  %v2816_v49 = vpop.f32.mrf.mxu0 }
 0x332   : > { %v3085_v34 = vadd.f32 %v3048_v12, %v2968_v43  ;;  %v3165_v21 = vpop.f32.mrf.mxu3  ;;  %v2852_v13 = vadd.f32 %v2816_v49, %v6534_v40  ;;  %v2933_v24 = vpop.f32.mrf.mxu1  ;;  %v6802_v40 = vpack.c.bf16 %v3737_v8, %v3736_v30 }
 0x334   : > { %v6793_v1 = vadd.f32 %v3165_v21, %v3085_v34  ;;  %v2969_v35 = vadd.f32 %v2933_v24, %v2852_v13  ;;  %v3352_v21 = vpack.c.bf16 %v3340_v22, %v3339_v46  ;;  %v3743_v46 = vld [vmem:[%s5524_s30 + $0x1e0] sm:$0xff] }
 0x339   : > { %v3050_v44 = vpop.f32.mrf.mxu2  ;;  %v2819_v53 = vpop.f32.mrf.mxu0 }
 0x33a   : > { %v3086_v62 = vadd.f32 %v3050_v44, %v2969_v35  ;;  %v3167_v41 = vpop.f32.mrf.mxu3  ;;  %v2853_v20 = vadd.f32 %v2819_v53, %v6554_v36  ;;  %v2936_v4 = vpop.f32.mrf.mxu1 }
 0x33c   : > { %v6804_v6 = vadd.f32 %v3167_v41, %v3086_v62  ;;  %v2970_v33 = vadd.f32 %v2936_v4, %v2853_v20  ;;  %5204 = vmatmul.msk.bf16.gmra.mxu0 %vm264_vm1, %v3234_v14  ;;  %v3740_v14 = vld [vmem:[%s5524_s30 + $0x1c8] sm:$0xff]  ;;  %v3741_v62 = vld [vmem:[%s5524_s30 + $0x1d0] sm:$0xff] }
 0x33d   : > { %5213 = vmatmul.msk.bf16.gmra.mxu1 %vm264_vm1, %v3351_v51 }
 0x33e   : > { %5222 = vmatmul.msk.bf16.gmra.mxu2 %vm264_vm1, %v6601_v18 }
 0x33f   : > { %5231 = vmatmul.msk.bf16.gmra.mxu3 %vm264_vm1, %v6802_v40 }
 0x341   : > { %v3053_v36 = vpop.f32.mrf.mxu2  ;;  %v2821_v3 = vpop.f32.mrf.mxu0 }
 0x342   : > { %v3087_v59 = vadd.f32 %v3053_v36, %v2970_v33  ;;  %v3170_v16 = vpop.f32.mrf.mxu3  ;;  %v2854_v29 = vadd.f32 %v2821_v3, %v6566_v5  ;;  %v2938_v23 = vpop.f32.mrf.mxu1  ;;  %v6822_v5 = vpack.c.bf16 %v3739_v17, %v3738_v42  ;;  %v6838_v33 = vpack.c.bf16 %v3741_v62, %v3740_v14 }
 0x344   : > { %v6813_v9 = vadd.f32 %v3170_v16, %v3087_v59  ;;  %v2971_v10 = vadd.f32 %v2938_v23, %v2854_v29 }
 0x349   : > { %v3055_v18 = vpop.f32.mrf.mxu2  ;;  %v2824_v34 = vpop.f32.mrf.mxu0 }
 0x34a   : > { %v3088_v43 = vadd.f32 %v3055_v18, %v2971_v10  ;;  %v3172_v12 = vpop.f32.mrf.mxu3  ;;  %v2855_v49 = vadd.f32 %v2824_v34, %v6586_v28  ;;  %v2941_v13 = vpop.f32.mrf.mxu1 }
 0x34c   : > { %v6824_v24 = vadd.f32 %v3172_v12, %v3088_v43  ;;  %v2972_v35 = vadd.f32 %v2941_v13, %v2855_v49  ;;  %5205 = vmatmul.msk.bf16.gmra.mxu0 %vm264_vm1, %v3235_v47  ;;  %v6856_v43 = vpack.c.bf16 %v3743_v46, %v3742_v27 }
 0x34d   : > { %5214 = vmatmul.msk.bf16.gmra.mxu1 %vm264_vm1, %v3352_v21 }
 0x34e   : > { %5223 = vmatmul.msk.bf16.gmra.mxu2 %vm264_vm1, %v6633_v11 }
 0x34f   : > { %5232 = vmatmul.msk.bf16.gmra.mxu3 %vm264_vm1, %v6822_v5 }
 0x351   : > { %v3058_v48 = vpop.f32.mrf.mxu2  ;;  %v2826_v39 = vpop.f32.mrf.mxu0 }
 0x352   : > { %v3089_v28 = vadd.f32 %v3058_v48, %v2972_v35  ;;  %v3175_v38 = vpop.f32.mrf.mxu3  ;;  %v2856_v55 = vadd.f32 %v2826_v39, %v6598_v31  ;;  %v2943_v30 = vpop.f32.mrf.mxu1  ;;  %v3229_v39 = vld [vmem:[%s5524_s30 + $0x1af] sm:$0xff] }
 0x354   : > { %v6833_v8 = vadd.f32 %v3175_v38, %v3089_v28  ;;  %v2973_v44 = vadd.f32 %v2943_v30, %v2856_v55  ;;  %v3228_v38 = vld [vmem:[%s5524_s30 + $0x1a7] sm:$0xff]  ;;  %v3463_v55 = vld [vmem:[%s5524_s30 + $0x1b1] sm:$0xff] }
 0x355   : > { %v3744_v30 = vld [vmem:[%s5524_s30 + $0x1e8] sm:$0xff]  ;;  %v6877_v62 = vpack.c.bf16 %v3229_v39, %v3228_v38 }
 0x359   : > { %v3060_v41 = vpop.f32.mrf.mxu2  ;;  %v2829_v20 = vpop.f32.mrf.mxu0 }
 0x35a   : > { %v3090_v53 = vadd.f32 %v3060_v41, %v2973_v44  ;;  %v3177_v51 = vpop.f32.mrf.mxu3  ;;  %v2857_v11 = vadd.f32 %v2829_v20, %v6618_v7  ;;  %v2946_v4 = vpop.f32.mrf.mxu1  ;;  %v3745_v44 = vld [vmem:[%s5524_s30 + $0x1f0] sm:$0xff] }
 0x35c   : > { %v6840_v36 = vadd.f32 %v3177_v51, %v3090_v53  ;;  %v2974_v31 = vadd.f32 %v2946_v4, %v2857_v11  ;;  %5206 = vmatmul.msk.bf16.gmra.mxu0 %vm264_vm1, %v6665_v58  ;;  %v6882_v4 = vpack.c.bf16 %v3745_v44, %v3744_v30 }
 0x35d   : > { %5215 = vmatmul.msk.bf16.gmra.mxu1 %vm264_vm1, %v6667_v15 }
 0x35e   : > { %5224 = vmatmul.msk.bf16.gmra.mxu2 %vm264_vm1, %v6673_v37 }
 0x35f   : > { %5233 = vmatmul.msk.bf16.gmra.mxu3 %vm264_vm1, %v6838_v33 }
 0x361   : > { %v3063_v7 = vpop.f32.mrf.mxu2  ;;  %v2831_v3 = vpop.f32.mrf.mxu0 }
 0x362   : > { %v3091_v59 = vadd.f32 %v3063_v7, %v2974_v31  ;;  %v3180_v16 = vpop.f32.mrf.mxu3  ;;  %v2858_v29 = vadd.f32 %v2831_v3, %v6630_v50  ;;  %v2948_v23 = vpop.f32.mrf.mxu1 }
 0x364   : > { %v6851_v10 = vadd.f32 %v3180_v16, %v3091_v59  ;;  %v2975_v56 = vadd.f32 %v2948_v23, %v2858_v29  ;;  %v5272_v59 = vld [vmem:[%s7500_s1 + $0xa] sm:$0x3]  ;;  %v5299_v16 = vld [vmem:[%s7500_s1 + $0x10] sm:$0x3] }
 0x365   : > { %v4310_v29 = vsel %vm289_vm0, %v5272_v59, 0  ;;  %v4661_v23 = vsel %vm289_vm0, %v5299_v16, 0 }
 0x366   : > { %4319 = vmatpush.bf16.msra.mxu0 %v4310_v29  ;;  %4670 = vmatpush.bf16.msra.mxu3 %v4661_v23 }
 0x369   : > { %v3065_v22 = vpop.f32.mrf.mxu2  ;;  %v2834_v17 = vpop.f32.mrf.mxu0 }
 0x36a   : > { %v3092_v15 = vadd.f32 %v3065_v22, %v2975_v56  ;;  %v3182_v42 = vpop.f32.mrf.mxu3  ;;  %v2859_v18 = vadd.f32 %v2834_v17, %v6650_v26  ;;  %v2951_v47 = vpop.f32.mrf.mxu1 }
 0x36c   : > { %v6858_v12 = vadd.f32 %v3182_v42, %v3092_v15  ;;  %v2976_v50 = vadd.f32 %v2951_v47, %v2859_v18  ;;  %5207 = vmatmul.msk.bf16.gmra.mxu0 %vm264_vm1, %v6704_v45  ;;  %v3230_v47 = vld [vmem:[%s5524_s30 + $0x1b7] sm:$0xff] }
 0x36d   : > { %5216 = vmatmul.msk.bf16.gmra.mxu1 %vm264_vm1, %v6721_v63  ;;  %v3462_v63 = vld [vmem:[%s5524_s30 + $0x1a9] sm:$0xff] }
 0x36e   : > { %5225 = vmatmul.msk.bf16.gmra.mxu2 %vm264_vm1, %v6729_v60  ;;  %v6879_v20 = vpack.c.bf16 %v3463_v55, %v3462_v63 }
 0x36f   : > { %5234 = vmatmul.msk.bf16.gmra.mxu3 %vm264_vm1, %v6856_v43 }
 0x371   : > { %v3068_v26 = vpop.f32.mrf.mxu2  ;;  %v2836_v49 = vpop.f32.mrf.mxu0 }
 0x372   : > { %v3093_v34 = vadd.f32 %v3068_v26, %v2976_v50  ;;  %v3185_v21 = vpop.f32.mrf.mxu3  ;;  %v2860_v13 = vadd.f32 %v2836_v49, %v6670_v32  ;;  %v2953_v35 = vpop.f32.mrf.mxu1  ;;  %v3231_v50 = vld [vmem:[%s5524_s30 + $0x1bf] sm:$0xff] }
 0x373   : > { %v3464_v26 = vld [vmem:[%s5524_s30 + $0x1b9] sm:$0xff] }
 0x374   : > { %v6869_v48 = vadd.f32 %v3185_v21, %v3093_v34  ;;  %v2977_v28 = vadd.f32 %v2953_v35, %v2860_v13  ;;  %v3465_v34 = vld [vmem:[%s5524_s30 + $0x1c1] sm:$0xff]  ;;  %v3746_v21 = vld [vmem:[%s5524_s30 + $0x1f8] sm:$0xff]  ;;  %v5281_v13 = vld [vmem:[%s7500_s1 + $0xc] sm:$0x3] }
 0x375   : > { %v3747_v49 = vld [vmem:[%s5524_s30 + $0x200] sm:$0xff]  ;;  %v4427_v38 = vsel %vm289_vm0, %v5281_v13, 0  ;;  %v6921_v55 = vpack.c.bf16 %v3465_v34, %v3464_v26 }
 0x376   : > { %4436 = vmatpush.bf16.msra.mxu1 %v4427_v38 }
 0x379   : > { %v3070_v14 = vpop.f32.mrf.mxu2  ;;  %v2839_v51 = vpop.f32.mrf.mxu0 }
 0x37a   : > { %v3094_v41 = vadd.f32 %v3070_v14, %v2977_v28  ;;  %v3187_v53 = vpop.f32.mrf.mxu3  ;;  %v2861_v32 = vadd.f32 %v2839_v51, %v6690_v54  ;;  %v2956_v11 = vpop.f32.mrf.mxu1  ;;  %v5290_v54 = vld [vmem:[%s7500_s1 + $0xe] sm:$0x3]  ;;  %v6918_v28 = vpack.c.bf16 %v3231_v50, %v3230_v47  ;;  %v6924_v14 = vpack.c.bf16 %v3747_v49, %v3746_v21 }
 0x37b   : > { %v4544_v3 = vsel %vm289_vm0, %v5290_v54, 0 }
 0x37c   : > { %v6884_v31 = vadd.f32 %v3187_v53, %v3094_v41  ;;  %v2978_v7 = vadd.f32 %v2956_v11, %v2861_v32  ;;  %5208 = vmatmul.msk.bf16.gmra.mxu0 %vm264_vm1, %v6877_v62  ;;  %4553 = vmatpush.bf16.msra.mxu2 %v4544_v3 }
 0x37d   : > { %5217 = vmatmul.msk.bf16.gmra.mxu1 %vm264_vm1, %v6802_v40 }
 0x37e   : > { %5226 = vmatmul.msk.bf16.gmra.mxu2 %vm264_vm1, %v6879_v20 }
 0x37f   : > { %5235 = vmatmul.msk.bf16.gmra.mxu3 %vm264_vm1, %v6882_v4 }
 0x381   : > { %v3073_v56 = vpop.f32.mrf.mxu2  ;;  %v2841_v22 = vpop.f32.mrf.mxu0 }
 0x382   : > { %v3095_v27 = vadd.f32 %v3073_v56, %v2978_v7  ;;  %v3190_v46 = vpop.f32.mrf.mxu3  ;;  %v2862_v15 = vadd.f32 %v2841_v22, %v6726_v25  ;;  %v2958_v42 = vpop.f32.mrf.mxu1 }
 0x384   : > { %v6907_v17 = vadd.f32 %v3190_v46, %v3095_v27  ;;  %v2979_v18 = vadd.f32 %v2958_v42, %v2862_v15 }
 0x389   : > { %v3075_v35 = vpop.f32.mrf.mxu2  ;;  %v2844_v63 = vpop.f32.mrf.mxu0 }
 0x38a   : > { %v3096_v25 = vadd.f32 %v3075_v35, %v2979_v18  ;;  %v3192_v39 = vpop.f32.mrf.mxu3  ;;  %v2863_v30 = vadd.f32 %v2844_v63, %v6747_v2  ;;  %v2961_v44 = vpop.f32.mrf.mxu1 }
 0x38c   : > { %v6926_v41 = vadd.f32 %v3192_v39, %v3096_v25  ;;  %v2980_v53 = vadd.f32 %v2961_v44, %v2863_v30  ;;  %5209 = vmatmul.msk.bf16.gmra.mxu0 %vm264_vm1, %v6918_v28 }
 0x38d   : > { %5218 = vmatmul.msk.bf16.gmra.mxu1 %vm264_vm1, %v6822_v5 }
 0x38e   : > { %5227 = vmatmul.msk.bf16.gmra.mxu2 %vm264_vm1, %v6921_v55 }
 0x38f   : > { %5236 = vmatmul.msk.bf16.gmra.mxu3 %vm264_vm1, %v6924_v14 }
 0x391   : > { %v3078_v51 = vpop.f32.mrf.mxu2  ;;  %v2846_v11 = vpop.f32.mrf.mxu0 }
 0x392   : > { %v3097_v2 = vadd.f32 %v3078_v51, %v2980_v53  ;;  %v3195_v32 = vpop.f32.mrf.mxu3  ;;  %v2864_v7 = vadd.f32 %v2846_v11, %v6762_v0  ;;  %v2963_v54 = vpop.f32.mrf.mxu1 }
 0x394   : > { %v6937_v59 = vadd.f32 %v3195_v32, %v3097_v2  ;;  %v2981_v16 = vadd.f32 %v2963_v54, %v2864_v7 }
 0x399   : > { %v3080_v3 = vpop.f32.mrf.mxu2  ;;  %v3277_v56 = vpop.f32.mrf.mxu0 }
 0x39a   : > { %v3098_v29 = vadd.f32 %v3080_v3, %v2981_v16  ;;  %v3197_v23 = vpop.f32.mrf.mxu3  ;;  %v3394_v27 = vpop.f32.mrf.mxu1  ;;  %v3317_v22 = vadd.f32 %v3277_v56, %v6773_v52  ;;  %v4030_v56 = vld [vmem:[%s5524_s30 + $0x1c7] sm:$0xff] }
 0x39c   : > { %v6939_v46 = vadd.f32 %v3197_v23, %v3098_v29  ;;  %5237 = vmatmul.msk.bf16.vlgmr.msrb.gmra.mxu0 %vm264_vm1, %v6665_v58  ;;  %v3434_v0 = vadd.f32 %v3394_v27, %v3317_v22  ;;  %v4031_v27 = vld [vmem:[%s5524_s30 + $0x1cf] sm:$0xff] }
 0x39d   : > { %5246 = vmatmul.msk.bf16.vlgmr.msrb.gmra.mxu1 %vm264_vm1, %v6673_v37  ;;  %v3583_v37 = vld [vmem:[%s7501_s2 + $0x100] sm:$0xff] }
 0x39e   : > { %5255 = vmatmul.msk.bf16.vlgmr.msrb.gmra.mxu2 %vm264_vm1, %v6877_v62 }
 0x39f   : > { %5264 = vmatmul.msk.bf16.vlgmr.msrb.gmra.mxu3 %vm264_vm1, %v6802_v40  ;;  %v3584_v40 = vld [vmem:[%s7501_s2 + $0x108] sm:$0xff] }
 0x3a1   : > { %v3511_v15 = vpop.f32.mrf.mxu2  ;;  %v3279_v47 = vpop.f32.mrf.mxu0 }
 0x3a2   : > { %v3551_v42 = vadd.f32 %v3511_v15, %v3434_v0  ;;  %v6950_v18 = vpop.f32.mrf.mxu3  ;;  %v3396_v52 = vpop.f32.mrf.mxu1  ;;  %v3318_v58 = vadd.f32 %v3279_v47, %v6784_v57  ;;  %v3586_v47 = vld [vmem:[%s7501_s2 + $0x118] sm:$0xff] }
 0x3a4   : > { %3567 = vst.msk [vmem:[%s6014_s23 + $0x100] sm:$0xff] %vm1244_vm2, %v3551_v42  ;;  %v3599_v50 = vmul.f32 %v3583_v37, %v3551_v42  ;;  %v3435_v26 = vadd.f32 %v3396_v52, %v3318_v58  ;;  %v6995_v37 = vpack.c.bf16 %v4031_v27, %v4030_v56 }
 0x3a6   : > { %v3653_v38 = vmul.f32 %v3599_v50, %v3551_v42  ;;  %v3615_v39 = vsel %vm1244_vm2, %v3599_v50, 0.0 }
 0x3a9   : > { %v3513_v34 = vpop.f32.mrf.mxu2  ;;  %v3282_v13 = vpop.f32.mrf.mxu0 }
 0x3aa   : > { %v3552_v21 = vadd.f32 %v3513_v34, %v3435_v26  ;;  %v6961_v49 = vpop.f32.mrf.mxu3  ;;  %v3399_v35 = vpop.f32.mrf.mxu1  ;;  %v3319_v25 = vadd.f32 %v3282_v13, %v6793_v1  ;;  %v3669_v1 = vsel %vm1244_vm2, %v3653_v38, 0.0 }
 0x3ac   : > { %3568 = vst.msk [vmem:[%s6014_s23 + $0x108] sm:$0xff] %vm1244_vm2, %v3552_v21  ;;  %v3600_v57 = vmul.f32 %v3584_v40, %v3552_v21  ;;  %5238 = vmatmul.msk.bf16.gmra.mxu0 %vm264_vm1, %v6704_v45  ;;  %v3436_v53 = vadd.f32 %v3399_v35, %v3319_v25 }
 0x3ad   : > { %5247 = vmatmul.msk.bf16.gmra.mxu1 %vm264_vm1, %v6729_v60  ;;  %v3585_v60 = vld [vmem:[%s7501_s2 + $0x110] sm:$0xff] }
 0x3ae   : > { %v3616_v63 = vsel %vm1244_vm2, %v3600_v57, 0.0  ;;  %v3654_v30 = vmul.f32 %v3600_v57, %v3552_v21  ;;  %5256 = vmatmul.msk.bf16.gmra.mxu2 %vm264_vm1, %v6918_v28  ;;  %v3587_v57 = vld [vmem:[%s7501_s2 + $0x120] sm:$0xff] }
 0x3af   : > { %v3617_v44 = vadd.f32 %v3616_v63, %v3615_v39  ;;  %5265 = vmatmul.msk.bf16.gmra.mxu3 %vm264_vm1, %v6822_v5 }
 0x3b0   : > { %v3670_v45 = vsel %vm1244_vm2, %v3654_v30, 0.0 }
 0x3b1   : > { %v3671_v51 = vadd.f32 %v3670_v45, %v3669_v1  ;;  %v3516_v2 = vpop.f32.mrf.mxu2  ;;  %v3284_v7 = vpop.f32.mrf.mxu0 }
 0x3b2   : > { %v3553_v32 = vadd.f32 %v3516_v2, %v3436_v53  ;;  %v6981_v11 = vpop.f32.mrf.mxu3  ;;  %v3401_v54 = vpop.f32.mrf.mxu1  ;;  %v3320_v16 = vadd.f32 %v3284_v7, %v6804_v6  ;;  %v4032_v2 = vld [vmem:[%s5524_s30 + $0x1d7] sm:$0xff] }
 0x3b4   : > { %3569 = vst.msk [vmem:[%s6014_s23 + $0x110] sm:$0xff] %vm1244_vm2, %v3553_v32  ;;  %v3601_v5 = vmul.f32 %v3585_v60, %v3553_v32  ;;  %v3437_v0 = vadd.f32 %v3401_v54, %v3320_v16  ;;  %v4033_v60 = vld [vmem:[%s5524_s30 + $0x1df] sm:$0xff]  ;;  %v3588_v16 = vld [vmem:[%s7501_s2 + $0x128] sm:$0xff] }
 0x3b6   : > { %v3618_v3 = vsel %vm1244_vm2, %v3601_v5, 0.0  ;;  %v3655_v29 = vmul.f32 %v3601_v5, %v3553_v32 }
 0x3b7   : > { %v3619_v23 = vadd.f32 %v3618_v3, %v3617_v44 }
 0x3b8   : > { %v3672_v22 = vsel %vm1244_vm2, %v3655_v29, 0.0 }
 0x3b9   : > { %v3673_v15 = vadd.f32 %v3672_v22, %v3671_v51  ;;  %v3518_v42 = vpop.f32.mrf.mxu2  ;;  %v3287_v6 = vpop.f32.mrf.mxu0 }
 0x3ba   : > { %v3554_v52 = vadd.f32 %v3518_v42, %v3437_v0  ;;  %v6993_v58 = vpop.f32.mrf.mxu3  ;;  %v3404_v50 = vpop.f32.mrf.mxu1  ;;  %v3321_v34 = vadd.f32 %v3287_v6, %v6813_v9  ;;  %v3589_v6 = vld [vmem:[%s7501_s2 + $0x130] sm:$0xff] }
 0x3bc   : > { %3570 = vst.msk [vmem:[%s6014_s23 + $0x118] sm:$0xff] %vm1244_vm2, %v3554_v52  ;;  %v3602_v26 = vmul.f32 %v3586_v47, %v3554_v52  ;;  %5239 = vmatmul.msk.bf16.gmra.mxu0 %vm264_vm1, %v6877_v62  ;;  %v3438_v35 = vadd.f32 %v3404_v50, %v3321_v34 }
 0x3bd   : > { %5248 = vmatmul.msk.bf16.gmra.mxu1 %vm264_vm1, %v6879_v20 }
 0x3be   : > { %v3620_v40 = vsel %vm1244_vm2, %v3602_v26, 0.0  ;;  %v3656_v21 = vmul.f32 %v3602_v26, %v3554_v52  ;;  %5257 = vmatmul.msk.bf16.gmra.mxu2 %vm264_vm1, %v6995_v37 }
 0x3bf   : > { %v3621_v13 = vadd.f32 %v3620_v40, %v3619_v23  ;;  %5266 = vmatmul.msk.bf16.gmra.mxu3 %vm264_vm1, %v6838_v33  ;;  %v7027_v23 = vpack.c.bf16 %v4033_v60, %v4032_v2 }
 0x3c0   : > { %v3674_v9 = vsel %vm1244_vm2, %v3656_v21, 0.0 }
 0x3c1   : > { %v3675_v62 = vadd.f32 %v3674_v9, %v3673_v15  ;;  %v3521_v38 = vpop.f32.mrf.mxu2  ;;  %v3289_v63 = vpop.f32.mrf.mxu0 }
 0x3c2   : > { %v3555_v25 = vadd.f32 %v3521_v38, %v3438_v35  ;;  %v7013_v39 = vpop.f32.mrf.mxu3  ;;  %v3406_v30 = vpop.f32.mrf.mxu1  ;;  %v3322_v1 = vadd.f32 %v3289_v63, %v6824_v24  ;;  %v4035_v63 = vld [vmem:[%s5524_s30 + $0x1ef] sm:$0xff] }
 0x3c4   : > { %3571 = vst.msk [vmem:[%s6014_s23 + $0x120] sm:$0xff] %vm1244_vm2, %v3555_v25  ;;  %v3603_v44 = vmul.f32 %v3587_v57, %v3555_v25  ;;  %v3439_v7 = vadd.f32 %v3406_v30, %v3322_v1  ;;  %v3918_v57 = vld [vmem:[%s5524_s30 + $0x1d1] sm:$0xff] }
 0x3c6   : > { %v3622_v45 = vsel %vm1244_vm2, %v3603_v44, 0.0  ;;  %v3657_v53 = vmul.f32 %v3603_v44, %v3555_v25  ;;  %v4034_v25 = vld [vmem:[%s5524_s30 + $0x1e7] sm:$0xff] }
 0x3c7   : > { %v3623_v51 = vadd.f32 %v3622_v45, %v3621_v13 }
 0x3c8   : > { %v3676_v32 = vsel %vm1244_vm2, %v3657_v53, 0.0  ;;  %v3590_v53 = vld [vmem:[%s7501_s2 + $0x138] sm:$0xff] }
 0x3c9   : > { %v3677_v54 = vadd.f32 %v3676_v32, %v3675_v62  ;;  %v3523_v5 = vpop.f32.mrf.mxu2  ;;  %v3292_v24 = vpop.f32.mrf.mxu0  ;;  %v3917_v62 = vld [vmem:[%s5524_s30 + $0x1c9] sm:$0xff]  ;;  %v7063_v32 = vpack.c.bf16 %v4035_v63, %v4034_v25 }
 0x3ca   : > { %v3556_v3 = vadd.f32 %v3523_v5, %v3439_v7  ;;  %v7025_v29 = vpop.f32.mrf.mxu3  ;;  %v3409_v56 = vpop.f32.mrf.mxu1  ;;  %v3323_v22 = vadd.f32 %v3292_v24, %v6833_v8  ;;  %v7061_v60 = vpack.c.bf16 %v3918_v57, %v3917_v62  ;;  %v3592_v25 = vld [vmem:[%s7501_s2 + $0x148] sm:$0xff] }
 0x3cc   : > { %3572 = vst.msk [vmem:[%s6014_s23 + $0x128] sm:$0xff] %vm1244_vm2, %v3556_v3  ;;  %v3604_v27 = vmul.f32 %v3588_v16, %v3556_v3  ;;  %5240 = vmatmul.msk.bf16.gmra.mxu0 %vm264_vm1, %v6918_v28  ;;  %v3440_v47 = vadd.f32 %v3409_v56, %v3323_v22 }
 0x3cd   : > { %5249 = vmatmul.msk.bf16.gmra.mxu1 %vm264_vm1, %v6921_v55 }
 0x3ce   : > { %v3624_v0 = vsel %vm1244_vm2, %v3604_v27, 0.0  ;;  %v3658_v15 = vmul.f32 %v3604_v27, %v3556_v3  ;;  %5258 = vmatmul.msk.bf16.gmra.mxu2 %vm264_vm1, %v7027_v23 }
 0x3cf   : > { %v3625_v42 = vadd.f32 %v3624_v0, %v3623_v51  ;;  %5267 = vmatmul.msk.bf16.gmra.mxu3 %vm264_vm1, %v6856_v43  ;;  %v3591_v0 = vld [vmem:[%s7501_s2 + $0x140] sm:$0xff] }
 0x3d0   : > { %v3678_v8 = vsel %vm1244_vm2, %v3658_v15, 0.0 }
 0x3d1   : > { %v3679_v28 = vadd.f32 %v3678_v8, %v3677_v54  ;;  %v3526_v52 = vpop.f32.mrf.mxu2  ;;  %v3294_v34 = vpop.f32.mrf.mxu0 }
 0x3d2   : > { %v3557_v50 = vadd.f32 %v3526_v52, %v3440_v47  ;;  %v7045_v26 = vpop.f32.mrf.mxu3  ;;  %v3411_v40 = vpop.f32.mrf.mxu1  ;;  %v3324_v13 = vadd.f32 %v3294_v34, %v6840_v36  ;;  %v3919_v34 = vld [vmem:[%s5524_s30 + $0x1d9] sm:$0xff] }
 0x3d4   : > { %3573 = vst.msk [vmem:[%s6014_s23 + $0x130] sm:$0xff] %vm1244_vm2, %v3557_v50  ;;  %v3605_v21 = vmul.f32 %v3589_v6, %v3557_v50  ;;  %v3441_v44 = vadd.f32 %v3411_v40, %v3324_v13  ;;  %v4036_v13 = vld [vmem:[%s5524_s30 + $0x1f7] sm:$0xff] }
 0x3d6   : > { %v3626_v9 = vsel %vm1244_vm2, %v3605_v21, 0.0  ;;  %v3659_v35 = vmul.f32 %v3605_v21, %v3557_v50  ;;  %v3920_v21 = vld [vmem:[%s5524_s30 + $0x1e1] sm:$0xff] }
 0x3d7   : > { %v3627_v38 = vadd.f32 %v3626_v9, %v3625_v42  ;;  %v4037_v9 = vld [vmem:[%s5524_s30 + $0x1ff] sm:$0xff] }
 0x3d8   : > { %v3680_v30 = vsel %vm1244_vm2, %v3659_v35, 0.0 }
 0x3d9   : > { %v3681_v1 = vadd.f32 %v3680_v30, %v3679_v28  ;;  %v3528_v45 = vpop.f32.mrf.mxu2  ;;  %v3297_v2 = vpop.f32.mrf.mxu0 }
 0x3da   : > { %v3558_v51 = vadd.f32 %v3528_v45, %v3441_v44  ;;  %v7059_v36 = vpop.f32.mrf.mxu3  ;;  %v3414_v7 = vpop.f32.mrf.mxu1  ;;  %v3325_v5 = vadd.f32 %v3297_v2, %v6851_v10  ;;  %v7097_v44 = vpack.c.bf16 %v3920_v21, %v3919_v34  ;;  %v4039_v34 = vld [vmem:[%s5524_s30 + $0x20f] sm:$0xff] }
 0x3dc   : > { %3574 = vst.msk [vmem:[%s6014_s23 + $0x138] sm:$0xff] %vm1244_vm2, %v3558_v51  ;;  %v3606_v54 = vmul.f32 %v3590_v53, %v3558_v51  ;;  %5241 = vmatmul.msk.bf16.gmra.mxu0 %vm264_vm1, %v6995_v37  ;;  %v3442_v56 = vadd.f32 %v3414_v7, %v3325_v5 }
 0x3dd   : > { %5250 = vmatmul.msk.bf16.gmra.mxu1 %vm264_vm1, %v7061_v60 }
 0x3de   : > { %v3628_v16 = vsel %vm1244_vm2, %v3606_v54, 0.0  ;;  %v3660_v3 = vmul.f32 %v3606_v54, %v3558_v51  ;;  %5259 = vmatmul.msk.bf16.gmra.mxu2 %vm264_vm1, %v7063_v32 }
 0x3df   : > { %v3629_v24 = vadd.f32 %v3628_v16, %v3627_v38  ;;  %5268 = vmatmul.msk.bf16.gmra.mxu3 %vm264_vm1, %v6882_v4 }
 0x3e0   : > { %v3682_v10 = vsel %vm1244_vm2, %v3660_v3, 0.0 }
 0x3e1   : > { %v3683_v27 = vadd.f32 %v3682_v10, %v3681_v1  ;;  %v3531_v22 = vpop.f32.mrf.mxu2  ;;  %v3299_v8 = vpop.f32.mrf.mxu0  ;;  %v7099_v1 = vpack.c.bf16 %v4037_v9, %v4036_v13  ;;  %v4155_v13 = vld [vmem:[%s5524_s30 + $0x208] sm:$0xff]  ;;  %v4156_v9 = vld [vmem:[%s5524_s30 + $0x210] sm:$0xff] }
 0x3e2   : > { %v3559_v15 = vadd.f32 %v3531_v22, %v3442_v56  ;;  %v7081_v42 = vpop.f32.mrf.mxu3  ;;  %v3416_v47 = vpop.f32.mrf.mxu1  ;;  %v3326_v52 = vadd.f32 %v3299_v8, %v6858_v12 }
 0x3e4   : > { %3575 = vst.msk [vmem:[%s6014_s23 + $0x140] sm:$0xff] %vm1244_vm2, %v3559_v15  ;;  %v3607_v28 = vmul.f32 %v3591_v0, %v3559_v15  ;;  %v3443_v62 = vadd.f32 %v3416_v47, %v3326_v52 }
 0x3e6   : > { %v3630_v6 = vsel %vm1244_vm2, %v3607_v28, 0.0  ;;  %v3661_v50 = vmul.f32 %v3607_v28, %v3559_v15  ;;  %v3921_v28 = vld [vmem:[%s5524_s30 + $0x1e9] sm:$0xff] }
 0x3e7   : > { %v3631_v40 = vadd.f32 %v3630_v6, %v3629_v24  ;;  %v3593_v24 = vld [vmem:[%s7501_s2 + $0x150] sm:$0xff] }
 0x3e8   : > { %v3684_v35 = vsel %vm1244_vm2, %v3661_v50, 0.0  ;;  %v3922_v6 = vld [vmem:[%s5524_s30 + $0x1f1] sm:$0xff]  ;;  %v4038_v50 = vld [vmem:[%s5524_s30 + $0x207] sm:$0xff] }
 0x3e9   : > { %v3685_v38 = vadd.f32 %v3684_v35, %v3683_v27  ;;  %v3533_v57 = vpop.f32.mrf.mxu2  ;;  %v3302_v30 = vpop.f32.mrf.mxu0 }
 0x3ea   : > { %v3560_v63 = vadd.f32 %v3533_v57, %v3443_v62  ;;  %v7095_v12 = vpop.f32.mrf.mxu3  ;;  %v3419_v45 = vpop.f32.mrf.mxu1  ;;  %v3327_v51 = vadd.f32 %v3302_v30, %v6869_v48  ;;  %v7137_v30 = vpack.c.bf16 %v4039_v34, %v4038_v50  ;;  %v3924_v50 = vld [vmem:[%s5524_s30 + $0x201] sm:$0xff]  ;;  %v4040_v34 = vld [vmem:[%s5524_s30 + $0x217] sm:$0xff] }
 0x3ec   : > { %3576 = vst.msk [vmem:[%s6014_s23 + $0x148] sm:$0xff] %vm1244_vm2, %v3560_v63  ;;  %v3608_v53 = vmul.f32 %v3592_v25, %v3560_v63  ;;  %5242 = vmatmul.msk.bf16.gmra.mxu0 %vm264_vm1, %v7027_v23  ;;  %v3444_v5 = vadd.f32 %v3419_v45, %v3327_v51 }
 0x3ed   : > { %5251 = vmatmul.msk.bf16.gmra.mxu1 %vm264_vm1, %v7097_v44 }
 0x3ee   : > { %v3632_v2 = vsel %vm1244_vm2, %v3608_v53, 0.0  ;;  %v3662_v7 = vmul.f32 %v3608_v53, %v3560_v63  ;;  %5260 = vmatmul.msk.bf16.gmra.mxu2 %vm264_vm1, %v7099_v1  ;;  %v7135_v63 = vpack.c.bf16 %v3922_v6, %v3921_v28  ;;  %v7139_v53 = vpack.c.bf16 %v4156_v9, %v4155_v13  ;;  %v4157_v9 = vld [vmem:[%s5524_s30 + $0x218] sm:$0xff] }
 0x3ef   : > { %v3633_v54 = vadd.f32 %v3632_v2, %v3631_v40  ;;  %5269 = vmatmul.msk.bf16.gmra.mxu3 %vm264_vm1, %v6924_v14 }
 0x3f0   : > { %v3686_v48 = vsel %vm1244_vm2, %v3662_v7, 0.0 }
 0x3f1   : > { %v3687_v16 = vadd.f32 %v3686_v48, %v3685_v38  ;;  %v3536_v3 = vpop.f32.mrf.mxu2  ;;  %v3304_v27 = vpop.f32.mrf.mxu0 }
 0x3f2   : > { %v3561_v10 = vadd.f32 %v3536_v3, %v3444_v5  ;;  %v7117_v56 = vpop.f32.mrf.mxu3  ;;  %v3421_v22 = vpop.f32.mrf.mxu1  ;;  %v3328_v15 = vadd.f32 %v3304_v27, %v6884_v31  ;;  %v3594_v31 = vld [vmem:[%s7501_s2 + $0x158] sm:$0xff] }
 0x3f4   : > { %3577 = vst.msk [vmem:[%s6014_s23 + $0x150] sm:$0xff] %vm1244_vm2, %v3561_v10  ;;  %v3609_v0 = vmul.f32 %v3593_v24, %v3561_v10  ;;  %v3445_v21 = vadd.f32 %v3421_v22, %v3328_v15  ;;  %v3595_v24 = vld [vmem:[%s7501_s2 + $0x160] sm:$0xff] }
 0x3f6   : > { %v3634_v8 = vsel %vm1244_vm2, %v3609_v0, 0.0  ;;  %v3663_v47 = vmul.f32 %v3609_v0, %v3561_v10 }
 0x3f7   : > { %v3635_v52 = vadd.f32 %v3634_v8, %v3633_v54 }
 0x3f8   : > { %v3688_v40 = vsel %vm1244_vm2, %v3663_v47, 0.0 }
 0x3f9   : > { %v3689_v35 = vadd.f32 %v3688_v40, %v3687_v16  ;;  %v3538_v62 = vpop.f32.mrf.mxu2  ;;  %v3307_v25 = vpop.f32.mrf.mxu0  ;;  %v4041_v40 = vld [vmem:[%s5524_s30 + $0x21f] sm:$0xff] }
 0x3fa   : > { %v3562_v38 = vadd.f32 %v3538_v62, %v3445_v21  ;;  %v7133_v57 = vpop.f32.mrf.mxu3  ;;  %v3424_v45 = vpop.f32.mrf.mxu1  ;;  %v3329_v2 = vadd.f32 %v3307_v25, %v6907_v17 }
 0x3fc   : > { %3578 = vst.msk [vmem:[%s6014_s23 + $0x158] sm:$0xff] %vm1244_vm2, %v3562_v38  ;;  %v3610_v51 = vmul.f32 %v3594_v31, %v3562_v38  ;;  %5243 = vmatmul.msk.bf16.gmra.mxu0 %vm264_vm1, %v7063_v32  ;;  %v3446_v5 = vadd.f32 %v3424_v45, %v3329_v2  ;;  %v7177_v2 = vpack.c.bf16 %v4041_v40, %v4040_v34 }
 0x3fd   : > { %5252 = vmatmul.msk.bf16.gmra.mxu1 %vm264_vm1, %v7135_v63 }
 0x3fe   : > { %v3636_v7 = vsel %vm1244_vm2, %v3610_v51, 0.0  ;;  %v3664_v54 = vmul.f32 %v3610_v51, %v3562_v38  ;;  %5261 = vmatmul.msk.bf16.gmra.mxu2 %vm264_vm1, %v7137_v30 }
 0x3ff   : > { %v3637_v48 = vadd.f32 %v3636_v7, %v3635_v52  ;;  %5270 = vmatmul.msk.bf16.gmra.mxu3 %vm264_vm1, %v7139_v53  ;;  %v3923_v52 = vld [vmem:[%s5524_s30 + $0x1f9] sm:$0xff] }
 0x400   : > { %v3690_v17 = vsel %vm1244_vm2, %v3664_v54, 0.0  ;;  %v7175_v51 = vpack.c.bf16 %v3924_v50, %v3923_v52 }
 0x401   : > { %v3691_v16 = vadd.f32 %v3690_v17, %v3689_v35  ;;  %v3541_v3 = vpop.f32.mrf.mxu2  ;;  %v3309_v22 = vpop.f32.mrf.mxu0  ;;  %v4158_v35 = vld [vmem:[%s5524_s30 + $0x220] sm:$0xff] }
 0x402   : > { %v3563_v10 = vadd.f32 %v3541_v3, %v3446_v5  ;;  %v7157_v27 = vpop.f32.mrf.mxu3  ;;  %v3426_v0 = vpop.f32.mrf.mxu1  ;;  %v3330_v8 = vadd.f32 %v3309_v22, %v6926_v41  ;;  %v3596_v41 = vld [vmem:[%s7501_s2 + $0x168] sm:$0xff]  ;;  %v7179_v54 = vpack.c.bf16 %v4158_v35, %v4157_v9 }
 0x404   : > { %3579 = vst.msk [vmem:[%s6014_s23 + $0x160] sm:$0xff] %vm1244_vm2, %v3563_v10  ;;  %v3611_v15 = vmul.f32 %v3595_v24, %v3563_v10  ;;  %v3447_v13 = vadd.f32 %v3426_v0, %v3330_v8  ;;  %v3597_v0 = vld [vmem:[%s7501_s2 + $0x170] sm:$0xff] }
 0x406   : > { %v3638_v47 = vsel %vm1244_vm2, %v3611_v15, 0.0  ;;  %v3665_v28 = vmul.f32 %v3611_v15, %v3563_v10 }
 0x407   : > { %v3639_v6 = vadd.f32 %v3638_v47, %v3637_v48 }
 0x408   : > { %v3692_v21 = vsel %vm1244_vm2, %v3665_v28, 0.0 }
 0x409   : > { %v3693_v62 = vadd.f32 %v3692_v21, %v3691_v16  ;;  %v3543_v31 = vpop.f32.mrf.mxu2  ;;  %v3312_v45 = vpop.f32.mrf.mxu0 }
 0x40a   : > { %v3564_v38 = vadd.f32 %v3543_v31, %v3447_v13  ;;  %v7173_v25 = vpop.f32.mrf.mxu3  ;;  %v3429_v7 = vpop.f32.mrf.mxu1  ;;  %v3331_v17 = vadd.f32 %v3312_v45, %v6937_v59 }
 0x40c   : > { %3580 = vst.msk [vmem:[%s6014_s23 + $0x168] sm:$0xff] %vm1244_vm2, %v3564_v38  ;;  %v3612_v48 = vmul.f32 %v3596_v41, %v3564_v38  ;;  %5244 = vmatmul.msk.bf16.gmra.mxu0 %vm264_vm1, %v7099_v1  ;;  %v3448_v59 = vadd.f32 %v3429_v7, %v3331_v17 }
 0x40d   : > { %5253 = vmatmul.msk.bf16.gmra.mxu1 %vm264_vm1, %v7175_v51 }
 0x40e   : > { %v3640_v5 = vsel %vm1244_vm2, %v3612_v48, 0.0  ;;  %v3666_v16 = vmul.f32 %v3612_v48, %v3564_v38  ;;  %5262 = vmatmul.msk.bf16.gmra.mxu2 %vm264_vm1, %v7177_v2 }
 0x40f   : > { %v3641_v3 = vadd.f32 %v3640_v5, %v3639_v6  ;;  %5271 = vmatmul.msk.bf16.gmra.mxu3 %vm264_vm1, %v7179_v54 }
 0x410   : > { %v3694_v24 = vsel %vm1244_vm2, %v3666_v16, 0.0 }
 0x411   : > { %v3695_v10 = vadd.f32 %v3694_v24, %v3693_v62  ;;  %v3546_v22 = vpop.f32.mrf.mxu2  ;;  %v3314_v47 = vpop.f32.mrf.mxu0  ;;  %v3598_v62 = vld [vmem:[%s7501_s2 + $0x178] sm:$0xff] }
 0x412   : > { %v3565_v15 = vadd.f32 %v3546_v22, %v3448_v59  ;;  %v7197_v8 = vpop.f32.mrf.mxu3  ;;  %v3431_v28 = vpop.f32.mrf.mxu1  ;;  %v3332_v6 = vadd.f32 %v3314_v47, %v6939_v46 }
 0x414   : > { %3581 = vst.msk [vmem:[%s6014_s23 + $0x170] sm:$0xff] %vm1244_vm2, %v3565_v15  ;;  %v3613_v52 = vmul.f32 %v3597_v0, %v3565_v15  ;;  %v3449_v13 = vadd.f32 %v3431_v28, %v3332_v6 }
 0x416   : > { %v3642_v50 = vsel %vm1244_vm2, %v3613_v52, 0.0  ;;  %v3667_v34 = vmul.f32 %v3613_v52, %v3565_v15 }
 0x417   : > { %v3643_v40 = vadd.f32 %v3642_v50, %v3641_v3 }
 0x418   : > { %v3696_v21 = vsel %vm1244_vm2, %v3667_v34, 0.0 }
 0x419   : > { %v3697_v9 = vadd.f32 %v3696_v21, %v3695_v10  ;;  %v3548_v35 = vpop.f32.mrf.mxu2  ;;  %v3869_v38 = vpop.f32.mrf.mxu0 }
 0x41a   : > { %v3566_v31 = vadd.f32 %v3548_v35, %v3449_v13  ;;  %v7207_v41 = vpop.f32.mrf.mxu3  ;;  %v3870_v45 = vadd.f32 %v3869_v38, %v6950_v18  ;;  %v3970_v46 = vpop.f32.mrf.mxu1 }
 0x41c   : > { %3582 = vst.msk [vmem:[%s6014_s23 + $0x178] sm:$0xff] %vm1244_vm2, %v3566_v31  ;;  %v3614_v7 = vmul.f32 %v3598_v62, %v3566_v31  ;;  %v4010_v48 = vadd.f32 %v3970_v46, %v3870_v45  ;;  %5273 = vmatmul.msk.bf16.vlgmr.msra.gmra.mxu0 %vm264_vm1, %v6879_v20 }
 0x41d   : > { %5282 = vmatmul.msk.bf16.vlgmr.msra.gmra.mxu1 %vm264_vm1, %v6995_v37 }
 0x41e   : > { %v3644_v17 = vsel %vm1244_vm2, %v3614_v7, 0.0  ;;  %v3668_v5 = vmul.f32 %v3614_v7, %v3566_v31  ;;  %5291 = vmatmul.msk.bf16.vlgmr.msra.gmra.mxu2 %vm264_vm1, %v6838_v33 }
 0x41f   : > { %v3645_v16 = vadd.f32 %v3644_v17, %v3643_v40  ;;  %5300 = vmatmul.msk.bf16.vlgmr.msra.gmra.mxu3 %vm264_vm1, %v7061_v60 }
 0x420   : > { %v3698_v18 = vsel %vm1244_vm2, %v3668_v5, 0.0 }
 0x421   : > { %v3646_v3 = vrot.slane %v3645_v16, 4  ;;  %v3699_v24 = vadd.f32 %v3698_v18, %v3697_v9  ;;  %v4087_v59 = vpop.f32.mrf.mxu2  ;;  %v3871_v22 = vpop.f32.mrf.mxu0 }
 0x422   : > { %v4127_v10 = vadd.f32 %v4087_v59, %v4010_v48  ;;  %v4204_v20 = vpop.f32.mrf.mxu3  ;;  %v3872_v47 = vadd.f32 %v3871_v22, %v6961_v49  ;;  %v3972_v37 = vpop.f32.mrf.mxu1 }
 0x423   : > { %v3647_v0 = vadd.f32 %v3646_v3, %v3645_v16  ;;  %v3700_v15 = vrot.slane %v3699_v24, 4 }
 0x424   : > { %v7223_v28 = vadd.f32 %v4204_v20, %v4127_v10  ;;  %v4011_v6 = vadd.f32 %v3972_v37, %v3872_v47 }
 0x425   : > { %v3648_v33 = vrot.slane %v3647_v0, 2  ;;  %v3701_v52 = vadd.f32 %v3700_v15, %v3699_v24 }
 0x427   : > { %v3649_v50 = vadd.f32 %v3648_v33, %v3647_v0  ;;  %v3702_v34 = vrot.slane %v3701_v52, 2 }
 0x429   : > { %v3650_v40 = vrot.slane %v3649_v50, 1  ;;  %v3703_v21 = vadd.f32 %v3702_v34, %v3701_v52  ;;  %v4089_v13 = vpop.f32.mrf.mxu2  ;;  %v3874_v62 = vpop.f32.mrf.mxu0 }
 0x42a   : > { %v4128_v9 = vadd.f32 %v4089_v13, %v4011_v6  ;;  %v4206_v35 = vpop.f32.mrf.mxu3  ;;  %v3875_v38 = vadd.f32 %v3874_v62, %v6981_v11  ;;  %v3975_v45 = vpop.f32.mrf.mxu1 }
 0x42b   : > { %v3704_v31 = vrot.slane %v3703_v21, 1  ;;  %v3651_v46 = vadd.f32 %v3650_v40, %v3649_v50 }
 0x42c   : > { %v7226_v49 = vadd.f32 %v4206_v35, %v4128_v9  ;;  %v4012_v7 = vadd.f32 %v3975_v45, %v3875_v38  ;;  %5274 = vmatmul.msk.bf16.gmra.mxu0 %vm264_vm1, %v6921_v55 }
 0x42d   : > { %v7231_v48 = vadd.f32 %v3651_v46, %v6779_v19  ;;  %v3705_v17 = vadd.f32 %v3704_v31, %v3703_v21  ;;  %5283 = vmatmul.msk.bf16.gmra.mxu1 %vm264_vm1, %v7027_v23 }
 0x42e   : > { %5292 = vmatmul.msk.bf16.gmra.mxu2 %vm264_vm1, %v6856_v43 }
 0x42f   : > { %5301 = vmatmul.msk.bf16.gmra.mxu3 %vm264_vm1, %v7097_v44  ;;  %v7240_v11 = vadd.f32 %v3705_v17, %v6781_v61 }
 0x431   : > { %v4092_v5 = vpop.f32.mrf.mxu2  ;;  %v3876_v55 = vpop.f32.mrf.mxu0 }
 0x432   : > { %v4129_v16 = vadd.f32 %v4092_v5, %v4012_v7  ;;  %v4209_v18 = vpop.f32.mrf.mxu3  ;;  %v3877_v19 = vadd.f32 %v3876_v55, %v6993_v58  ;;  %v3977_v3 = vpop.f32.mrf.mxu1  ;;  %v4620_v7 = vld [vmem:[%s5524_s30 + $0x211] sm:$0xff] }
 0x434   : > { %v7243_v24 = vadd.f32 %v4209_v18, %v4129_v16  ;;  %v4013_v59 = vadd.f32 %v3977_v3, %v3877_v19 }
 0x439   : > { %v4094_v23 = vpop.f32.mrf.mxu2  ;;  %v3879_v43 = vpop.f32.mrf.mxu0 }
 0x43a   : > { %v4130_v10 = vadd.f32 %v4094_v23, %v4013_v59  ;;  %v4211_v20 = vpop.f32.mrf.mxu3  ;;  %v3880_v22 = vadd.f32 %v3879_v43, %v7013_v39  ;;  %v3980_v0 = vpop.f32.mrf.mxu1 }
 0x43c   : > { %v7246_v15 = vadd.f32 %v4211_v20, %v4130_v10  ;;  %v4014_v61 = vadd.f32 %v3980_v0, %v3880_v22  ;;  %5275 = vmatmul.msk.bf16.gmra.mxu0 %vm264_vm1, %v7061_v60  ;;  %v4621_v0 = vld [vmem:[%s5524_s30 + $0x219] sm:$0xff] }
 0x43d   : > { %5284 = vmatmul.msk.bf16.gmra.mxu1 %vm264_vm1, %v7063_v32 }
 0x43e   : > { %5293 = vmatmul.msk.bf16.gmra.mxu2 %vm264_vm1, %v6882_v4 }
 0x43f   : > { %5302 = vmatmul.msk.bf16.gmra.mxu3 %vm264_vm1, %v7135_v63 }
 0x441   : > { %v4097_v58 = vpop.f32.mrf.mxu2  ;;  %v3881_v39 = vpop.f32.mrf.mxu0 }
 0x442   : > { %v4131_v47 = vadd.f32 %v4097_v58, %v4014_v61  ;;  %v4214_v37 = vpop.f32.mrf.mxu3  ;;  %v3882_v33 = vadd.f32 %v3881_v39, %v7025_v29  ;;  %v3982_v52 = vpop.f32.mrf.mxu1 }
 0x444   : > { %v7257_v6 = vadd.f32 %v4214_v37, %v4131_v47  ;;  %v4015_v50 = vadd.f32 %v3982_v52, %v3882_v33 }
 0x449   : > { %v4099_v60 = vpop.f32.mrf.mxu2  ;;  %v3884_v32 = vpop.f32.mrf.mxu0 }
 0x44a   : > { %v4132_v34 = vadd.f32 %v4099_v60, %v4015_v50  ;;  %v4216_v40 = vpop.f32.mrf.mxu3  ;;  %v3885_v21 = vadd.f32 %v3884_v32, %v7045_v26  ;;  %v3985_v4 = vpop.f32.mrf.mxu1 }
 0x44c   : > { %v7260_v13 = vadd.f32 %v4216_v40, %v4132_v34  ;;  %v4016_v9 = vadd.f32 %v3985_v4, %v3885_v21  ;;  %5276 = vmatmul.msk.bf16.gmra.mxu0 %vm264_vm1, %v7097_v44  ;;  %v4619_v44 = vld [vmem:[%s5524_s30 + $0x209] sm:$0xff] }
 0x44d   : > { %5285 = vmatmul.msk.bf16.gmra.mxu1 %vm264_vm1, %v7099_v1  ;;  %v4631_v55 = vpack.c.bf16 %v4620_v7, %v4619_v44  ;;  %v4389_v21 = vld [vmem:[%s5524_s30 + $0x227] sm:$0xff]  ;;  %v4390_v4 = vld [vmem:[%s5524_s30 + $0x22f] sm:$0xff] }
 0x44e   : > { %5294 = vmatmul.msk.bf16.gmra.mxu2 %vm264_vm1, %v6924_v14 }
 0x44f   : > { %5303 = vmatmul.msk.bf16.gmra.mxu3 %vm264_vm1, %v7175_v51 }
 0x451   : > { %v4102_v29 = vpop.f32.mrf.mxu2  ;;  %v3886_v62 = vpop.f32.mrf.mxu0 }
 0x452   : > { %v4133_v26 = vadd.f32 %v4102_v29, %v4016_v9  ;;  %v4219_v35 = vpop.f32.mrf.mxu3  ;;  %v3887_v31 = vadd.f32 %v3886_v62, %v7059_v36  ;;  %v3987_v38 = vpop.f32.mrf.mxu1  ;;  %v4506_v9 = vld [vmem:[%s5524_s30 + $0x228] sm:$0xff] }
 0x453   : > { %v4623_v29 = vld [vmem:[%s5524_s30 + $0x229] sm:$0xff] }
 0x454   : > { %v7271_v45 = vadd.f32 %v4219_v35, %v4133_v26  ;;  %v4017_v46 = vadd.f32 %v3987_v38, %v3887_v31  ;;  %v4624_v26 = vld [vmem:[%s5524_s30 + $0x231] sm:$0xff]  ;;  %v4399_v38 = vpack.c.bf16 %v4390_v4, %v4389_v21 }
 0x459   : > { %v4104_v17 = vpop.f32.mrf.mxu2  ;;  %v3889_v16 = vpop.f32.mrf.mxu0 }
 0x45a   : > { %v4134_v1 = vadd.f32 %v4104_v17, %v4017_v46  ;;  %v4221_v5 = vpop.f32.mrf.mxu3  ;;  %v3890_v14 = vadd.f32 %v3889_v16, %v7081_v42  ;;  %v3990_v18 = vpop.f32.mrf.mxu1 }
 0x45c   : > { %v7276_v19 = vadd.f32 %v4221_v5, %v4134_v1  ;;  %v4018_v3 = vadd.f32 %v3990_v18, %v3890_v14  ;;  %5277 = vmatmul.msk.bf16.gmra.mxu0 %vm264_vm1, %v7135_v63  ;;  %v4622_v63 = vld [vmem:[%s5524_s30 + $0x221] sm:$0xff] }
 0x45d   : > { %5286 = vmatmul.msk.bf16.gmra.mxu1 %vm264_vm1, %v7137_v30  ;;  %v4632_v39 = vpack.c.bf16 %v4622_v63, %v4621_v0 }
 0x45e   : > { %5295 = vmatmul.msk.bf16.gmra.mxu2 %vm264_vm1, %v7139_v53 }
 0x45f   : > { %5304 = vmatmul.msk.bf16.gmra.mxu3 %vm264_vm1, %v4631_v55 }
 0x461   : > { %v4107_v36 = vpop.f32.mrf.mxu2  ;;  %v3891_v23 = vpop.f32.mrf.mxu0 }
 0x462   : > { %v4135_v42 = vadd.f32 %v4107_v36, %v4018_v3  ;;  %v4224_v59 = vpop.f32.mrf.mxu3  ;;  %v3892_v10 = vadd.f32 %v3891_v23, %v7095_v12  ;;  %v3992_v20 = vpop.f32.mrf.mxu1  ;;  %v4508_v23 = vld [vmem:[%s5524_s30 + $0x238] sm:$0xff] }
 0x464   : > { %v7286_v43 = vadd.f32 %v4224_v59, %v4135_v42  ;;  %v4019_v22 = vadd.f32 %v3992_v20, %v3892_v10  ;;  %v4391_v59 = vld [vmem:[%s5524_s30 + $0x237] sm:$0xff]  ;;  %v4509_v10 = vld [vmem:[%s5524_s30 + $0x240] sm:$0xff] }
 0x465   : > { %v4625_v20 = vld [vmem:[%s5524_s30 + $0x239] sm:$0xff] }
 0x469   : > { %v4109_v61 = vpop.f32.mrf.mxu2  ;;  %v3894_v47 = vpop.f32.mrf.mxu0 }
 0x46a   : > { %v4136_v58 = vadd.f32 %v4109_v61, %v4019_v22  ;;  %v4226_v30 = vpop.f32.mrf.mxu3  ;;  %v3895_v53 = vadd.f32 %v3894_v47, %v7117_v56  ;;  %v3995_v37 = vpop.f32.mrf.mxu1  ;;  %v4626_v22 = vld [vmem:[%s5524_s30 + $0x241] sm:$0xff]  ;;  %v4517_v47 = vpack.c.bf16 %v4509_v10, %v4508_v23 }
 0x46c   : > { %v7291_v33 = vadd.f32 %v4226_v30, %v4136_v58  ;;  %v4020_v12 = vadd.f32 %v3995_v37, %v3895_v53  ;;  %5278 = vmatmul.msk.bf16.gmra.mxu0 %vm264_vm1, %v7175_v51 }
 0x46d   : > { %5287 = vmatmul.msk.bf16.gmra.mxu1 %vm264_vm1, %v7177_v2  ;;  %v4507_v2 = vld [vmem:[%s5524_s30 + $0x230] sm:$0xff] }
 0x46e   : > { %5296 = vmatmul.msk.bf16.gmra.mxu2 %vm264_vm1, %v7179_v54  ;;  %v4516_v46 = vpack.c.bf16 %v4507_v2, %v4506_v9 }
 0x46f   : > { %5305 = vmatmul.msk.bf16.gmra.mxu3 %vm264_vm1, %v4632_v39 }
 0x471   : > { %v4112_v56 = vpop.f32.mrf.mxu2  ;;  %v3896_v60 = vpop.f32.mrf.mxu0 }
 0x472   : > { %v4137_v52 = vadd.f32 %v4112_v56, %v4020_v12  ;;  %v4229_v50 = vpop.f32.mrf.mxu3  ;;  %v3897_v34 = vadd.f32 %v3896_v60, %v7133_v57  ;;  %v3997_v40 = vpop.f32.mrf.mxu1  ;;  %v4633_v57 = vpack.c.bf16 %v4624_v26, %v4623_v29 }
 0x474   : > { %v7301_v32 = vadd.f32 %v4229_v50, %v4137_v52  ;;  %v4021_v51 = vadd.f32 %v3997_v40, %v3897_v34 }
 0x479   : > { %v4114_v35 = vpop.f32.mrf.mxu2  ;;  %v3899_v31 = vpop.f32.mrf.mxu0 }
 0x47a   : > { %v4138_v54 = vadd.f32 %v4114_v35, %v4021_v51  ;;  %v4231_v62 = vpop.f32.mrf.mxu3  ;;  %v3900_v44 = vadd.f32 %v3899_v31, %v7157_v27  ;;  %v4000_v7 = vpop.f32.mrf.mxu1 }
 0x47c   : > { %v7310_v17 = vadd.f32 %v4231_v62, %v4138_v54  ;;  %v4022_v1 = vadd.f32 %v4000_v7, %v3900_v44  ;;  %5279 = vmatmul.msk.bf16.gmra.mxu0 %vm264_vm1, %v4631_v55  ;;  %v4392_v55 = vld [vmem:[%s5524_s30 + $0x23f] sm:$0xff]  ;;  %s197_s30 = sand.u32 1, %s5405_s16  }
 0x47d   : > { %5288 = vmatmul.msk.bf16.gmra.mxu1 %vm264_vm1, %v4399_v38  ;;  %v4400_v30 = vpack.c.bf16 %v4392_v55, %v4391_v59  ;;  %s4984_s10 = sshll.u32 %s197_s30, 1  ;;  %s4877_s19 = scalar_lea.sflag [#allocation3], %s197_s30 }
 0x47e   : > { %5297 = vmatmul.msk.bf16.gmra.mxu2 %vm264_vm1, %v4516_v46  ;;  %s199_s14 = scalar_lea.vmem [#allocation2], %s4984_s10 }
 0x47f   : > { %5306 = vmatmul.msk.bf16.gmra.mxu3 %vm264_vm1, %v4633_v57  ;;  %v4744_v57 = vld [vmem:[%s7501_s2 + $0x180] sm:$0xff]  ;;  %s4893_s20 = sshll.u32 %s199_s14, 4  ;;  %s4894_s20 = int_to_ptr.vmem [resolvable:$true] %s4893_s20 }
 0x481   : > { %v4117_v27 = vpop.f32.mrf.mxu2  ;;  %v3901_v14 = vpop.f32.mrf.mxu0 }
 0x482   : > { %v4139_v5 = vadd.f32 %v4117_v27, %v4022_v1  ;;  %v4234_v16 = vpop.f32.mrf.mxu3  ;;  %v3902_v18 = vadd.f32 %v3901_v14, %v7173_v25  ;;  %v4002_v3 = vpop.f32.mrf.mxu1  ;;  %v4634_v25 = vpack.c.bf16 %v4626_v22, %v4625_v20 }
 0x484   : > { %v7317_v36 = vadd.f32 %v4234_v16, %v4139_v5  ;;  %v4023_v42 = vadd.f32 %v4002_v3, %v3902_v18  ;;  %v4745_v18 = vld [vmem:[%s7501_s2 + $0x188] sm:$0xff] }
 0x489   : > { %v4119_v0 = vpop.f32.mrf.mxu2  ;;  %v3904_v58 = vpop.f32.mrf.mxu0 }
 0x48a   : > { %v4140_v63 = vadd.f32 %v4119_v0, %v4023_v42  ;;  %v4236_v61 = vpop.f32.mrf.mxu3  ;;  %v3905_v53 = vadd.f32 %v3904_v58, %v7197_v8  ;;  %v4005_v37 = vpop.f32.mrf.mxu1 }
 0x48c   : > { %v7326_v12 = vadd.f32 %v4236_v61, %v4140_v63  ;;  %v4024_v56 = vadd.f32 %v4005_v37, %v3905_v53  ;;  %5280 = vmatmul.msk.bf16.gmra.mxu0 %vm264_vm1, %v4632_v39  ;;  %v4746_v37 = vld [vmem:[%s7501_s2 + $0x190] sm:$0xff] }
 0x48d   : > { %5289 = vmatmul.msk.bf16.gmra.mxu1 %vm264_vm1, %v4400_v30 }
 0x48e   : > { %5298 = vmatmul.msk.bf16.gmra.mxu2 %vm264_vm1, %v4517_v47 }
 0x48f   : > { %5307 = vmatmul.msk.bf16.gmra.mxu3 %vm264_vm1, %v4634_v25 }
 0x491   : > { %v4122_v52 = vpop.f32.mrf.mxu2  ;;  %v3906_v34 = vpop.f32.mrf.mxu0 }
 0x492   : > { %v4141_v50 = vadd.f32 %v4122_v52, %v4024_v56  ;;  %v4239_v60 = vpop.f32.mrf.mxu3  ;;  %v3907_v40 = vadd.f32 %v3906_v34, %v7207_v41  ;;  %v4007_v8 = vpop.f32.mrf.mxu1 }
 0x494   : > { %v7333_v51 = vadd.f32 %v4239_v60, %v4141_v50  ;;  %v4025_v21 = vadd.f32 %v4007_v8, %v3907_v40 }
 0x499   : > { %v4124_v4 = vpop.f32.mrf.mxu2  ;;  %v4321_v2 = vpop.f32.mrf.mxu0 }
 0x49a   : > { %v4142_v9 = vadd.f32 %v4124_v4, %v4025_v21  ;;  %v4241_v39 = vpop.f32.mrf.mxu3  ;;  %v4438_v29 = vpop.f32.mrf.mxu1  ;;  %v4361_v35 = vadd.f32 %v4321_v2, %v7223_v28 }
 0x49c   : > { %v7335_v26 = vadd.f32 %v4241_v39, %v4142_v9  ;;  %v4478_v54 = vadd.f32 %v4438_v29, %v4361_v35 }
 0x4a1   : > { %v4555_v62 = vpop.f32.mrf.mxu2  ;;  %v4323_v46 = vpop.f32.mrf.mxu0 }
 0x4a2   : > { %v4595_v31 = vadd.f32 %v4555_v62, %v4478_v54  ;;  %v4672_v38 = vpop.f32.mrf.mxu3  ;;  %v4440_v41 = vpop.f32.mrf.mxu1  ;;  %v4362_v7 = vadd.f32 %v4323_v46, %v7226_v49 }
 0x4a4   : > { %v4712_v44 = vadd.f32 %v4672_v38, %v4595_v31  ;;  %v4479_v1 = vadd.f32 %v4440_v41, %v4362_v7 }
 0x4a6   : > { %4728 = vst.msk [vmem:[%s6014_s23 + $0x180] sm:$0xff] %vm1244_vm2, %v4712_v44  ;;  %v4760_v5 = vmul.f32 %v4744_v57, %v4712_v44 }
 0x4a8   : > { %v4814_v59 = vmul.f32 %v4760_v5, %v4712_v44  ;;  %v4776_v23 = vsel %vm1244_vm2, %v4760_v5, 0.0 }
 0x4a9   : > { %v4557_v27 = vpop.f32.mrf.mxu2  ;;  %v4326_v14 = vpop.f32.mrf.mxu0 }
 0x4aa   : > { %v4596_v28 = vadd.f32 %v4557_v27, %v4479_v1  ;;  %v4674_v16 = vpop.f32.mrf.mxu3  ;;  %v4443_v3 = vpop.f32.mrf.mxu1  ;;  %v4363_v49 = vadd.f32 %v4326_v14, %v7243_v24  ;;  %v4830_v61 = vsel %vm1244_vm2, %v4814_v59, 0.0 }
 0x4ac   : > { %v4713_v42 = vadd.f32 %v4674_v16, %v4596_v28  ;;  %v4480_v22 = vadd.f32 %v4443_v3, %v4363_v49 }
 0x4ae   : > { %4729 = vst.msk [vmem:[%s6014_s23 + $0x188] sm:$0xff] %vm1244_vm2, %v4713_v42  ;;  %v4761_v55 = vmul.f32 %v4745_v18, %v4713_v42 }
 0x4b0   : > { %v4777_v10 = vsel %vm1244_vm2, %v4761_v55, 0.0  ;;  %v4815_v20 = vmul.f32 %v4761_v55, %v4713_v42 }
 0x4b1   : > { %v4778_v0 = vadd.f32 %v4777_v10, %v4776_v23  ;;  %v4560_v63 = vpop.f32.mrf.mxu2  ;;  %v4328_v24 = vpop.f32.mrf.mxu0 }
 0x4b2   : > { %v4831_v58 = vsel %vm1244_vm2, %v4815_v20, 0.0  ;;  %v4597_v30 = vadd.f32 %v4560_v63, %v4480_v22  ;;  %v4677_v47 = vpop.f32.mrf.mxu3  ;;  %v4445_v25 = vpop.f32.mrf.mxu1  ;;  %v4364_v52 = vadd.f32 %v4328_v24, %v7246_v15  ;;  %v4747_v15 = vld [vmem:[%s7501_s2 + $0x198] sm:$0xff] }
 0x4b3   : > { %v4832_v53 = vadd.f32 %v4831_v58, %v4830_v61 }
 0x4b4   : > { %v4714_v56 = vadd.f32 %v4677_v47, %v4597_v30  ;;  %v4481_v40 = vadd.f32 %v4445_v25, %v4364_v52 }
 0x4b6   : > { %4730 = vst.msk [vmem:[%s6014_s23 + $0x190] sm:$0xff] %vm1244_vm2, %v4714_v56  ;;  %v4762_v50 = vmul.f32 %v4746_v37, %v4714_v56 }
 0x4b8   : > { %v4779_v60 = vsel %vm1244_vm2, %v4762_v50, 0.0  ;;  %v4816_v34 = vmul.f32 %v4762_v50, %v4714_v56 }
 0x4b9   : > { %v4780_v8 = vadd.f32 %v4779_v60, %v4778_v0  ;;  %v4562_v21 = vpop.f32.mrf.mxu2  ;;  %v4331_v2 = vpop.f32.mrf.mxu0 }
 0x4ba   : > { %v4833_v4 = vsel %vm1244_vm2, %v4816_v34, 0.0  ;;  %v4598_v9 = vadd.f32 %v4562_v21, %v4481_v40  ;;  %v4679_v39 = vpop.f32.mrf.mxu3  ;;  %v4448_v35 = vpop.f32.mrf.mxu1  ;;  %v4365_v62 = vadd.f32 %v4331_v2, %v7257_v6  ;;  %v4748_v6 = vld [vmem:[%s7501_s2 + $0x1a0] sm:$0xff] }
 0x4bb   : > { %v4834_v29 = vadd.f32 %v4833_v4, %v4832_v53 }
 0x4bc   : > { %v4715_v54 = vadd.f32 %v4679_v39, %v4598_v9  ;;  %v4482_v41 = vadd.f32 %v4448_v35, %v4365_v62 }
 0x4be   : > { %4731 = vst.msk [vmem:[%s6014_s23 + $0x198] sm:$0xff] %vm1244_vm2, %v4715_v54  ;;  %v4763_v31 = vmul.f32 %v4747_v15, %v4715_v54 }
 0x4c0   : > { %v4781_v38 = vsel %vm1244_vm2, %v4763_v31, 0.0  ;;  %v4817_v46 = vmul.f32 %v4763_v31, %v4715_v54 }
 0x4c1   : > { %v4782_v44 = vadd.f32 %v4781_v38, %v4780_v8  ;;  %v4565_v7 = vpop.f32.mrf.mxu2  ;;  %v4333_v5 = vpop.f32.mrf.mxu0 }
 0x4c2   : > { %v4835_v57 = vsel %vm1244_vm2, %v4817_v46, 0.0  ;;  %v4599_v1 = vadd.f32 %v4565_v7, %v4482_v41  ;;  %v4682_v27 = vpop.f32.mrf.mxu3  ;;  %v4450_v16 = vpop.f32.mrf.mxu1  ;;  %v4366_v18 = vadd.f32 %v4333_v5, %v7260_v13  ;;  %v4749_v13 = vld [vmem:[%s7501_s2 + $0x1a8] sm:$0xff] }
 0x4c3   : > { %v4836_v28 = vadd.f32 %v4835_v57, %v4834_v29 }
 0x4c4   : > { %v4716_v14 = vadd.f32 %v4682_v27, %v4599_v1  ;;  %v4483_v59 = vadd.f32 %v4450_v16, %v4366_v18 }
 0x4c6   : > { %4732 = vst.msk [vmem:[%s6014_s23 + $0x1a0] sm:$0xff] %vm1244_vm2, %v4716_v14  ;;  %v4764_v3 = vmul.f32 %v4748_v6, %v4716_v14 }
 0x4c8   : > { %v4783_v42 = vsel %vm1244_vm2, %v4764_v3, 0.0  ;;  %v4818_v49 = vmul.f32 %v4764_v3, %v4716_v14 }
 0x4c9   : > { %v4784_v55 = vadd.f32 %v4783_v42, %v4782_v44  ;;  %v4567_v23 = vpop.f32.mrf.mxu2  ;;  %v4336_v0 = vpop.f32.mrf.mxu0 }
 0x4ca   : > { %v4837_v10 = vsel %vm1244_vm2, %v4818_v49, 0.0  ;;  %v4600_v20 = vadd.f32 %v4567_v23, %v4483_v59  ;;  %v4684_v22 = vpop.f32.mrf.mxu3  ;;  %v4453_v61 = vpop.f32.mrf.mxu1  ;;  %v4367_v30 = vadd.f32 %v4336_v0, %v7271_v45  ;;  %v4750_v45 = vld [vmem:[%s7501_s2 + $0x1b0] sm:$0xff] }
 0x4cb   : > { %v4838_v63 = vadd.f32 %v4837_v10, %v4836_v28 }
 0x4cc   : > { %v4717_v58 = vadd.f32 %v4684_v22, %v4600_v20  ;;  %v4484_v37 = vadd.f32 %v4453_v61, %v4367_v30 }
 0x4ce   : > { %4733 = vst.msk [vmem:[%s6014_s23 + $0x1a8] sm:$0xff] %vm1244_vm2, %v4717_v58  ;;  %v4765_v47 = vmul.f32 %v4749_v13, %v4717_v58 }
 0x4d0   : > { %v4785_v24 = vsel %vm1244_vm2, %v4765_v47, 0.0  ;;  %v4819_v53 = vmul.f32 %v4765_v47, %v4717_v58 }
 0x4d1   : > { %v4786_v25 = vadd.f32 %v4785_v24, %v4784_v55  ;;  %v4570_v56 = vpop.f32.mrf.mxu2  ;;  %v4338_v34 = vpop.f32.mrf.mxu0 }
 0x4d2   : > { %v4839_v52 = vsel %vm1244_vm2, %v4819_v53, 0.0  ;;  %v4601_v50 = vadd.f32 %v4570_v56, %v4484_v37  ;;  %v4687_v60 = vpop.f32.mrf.mxu3  ;;  %v4455_v8 = vpop.f32.mrf.mxu1  ;;  %v4368_v4 = vadd.f32 %v4338_v34, %v7276_v19  ;;  %v4751_v19 = vld [vmem:[%s7501_s2 + $0x1b8] sm:$0xff] }
 0x4d3   : > { %v4840_v40 = vadd.f32 %v4839_v52, %v4838_v63 }
 0x4d4   : > { %v4718_v21 = vadd.f32 %v4687_v60, %v4601_v50  ;;  %v4485_v29 = vadd.f32 %v4455_v8, %v4368_v4 }
 0x4d6   : > { %4734 = vst.msk [vmem:[%s6014_s23 + $0x1b0] sm:$0xff] %vm1244_vm2, %v4718_v21  ;;  %v4766_v9 = vmul.f32 %v4750_v45, %v4718_v21 }
 0x4d8   : > { %v4787_v39 = vsel %vm1244_vm2, %v4766_v9, 0.0  ;;  %v4820_v2 = vmul.f32 %v4766_v9, %v4718_v21 }
 0x4d9   : > { %v4788_v15 = vadd.f32 %v4787_v39, %v4786_v25  ;;  %v4572_v35 = vpop.f32.mrf.mxu2  ;;  %v4341_v38 = vpop.f32.mrf.mxu0 }
 0x4da   : > { %v4841_v54 = vsel %vm1244_vm2, %v4820_v2, 0.0  ;;  %v4602_v62 = vadd.f32 %v4572_v35, %v4485_v29  ;;  %v4689_v31 = vpop.f32.mrf.mxu3  ;;  %v4458_v41 = vpop.f32.mrf.mxu1  ;;  %v4369_v7 = vadd.f32 %v4341_v38, %v7286_v43  ;;  %v4752_v43 = vld [vmem:[%s7501_s2 + $0x1c0] sm:$0xff] }
 0x4db   : > { %v4842_v46 = vadd.f32 %v4841_v54, %v4840_v40 }
 0x4dc   : > { %v4719_v44 = vadd.f32 %v4689_v31, %v4602_v62  ;;  %v4486_v5 = vadd.f32 %v4458_v41, %v4369_v7 }
 0x4de   : > { %4735 = vst.msk [vmem:[%s6014_s23 + $0x1b8] sm:$0xff] %vm1244_vm2, %v4719_v44  ;;  %v4767_v57 = vmul.f32 %v4751_v19, %v4719_v44 }
 0x4e0   : > { %v4789_v1 = vsel %vm1244_vm2, %v4767_v57, 0.0  ;;  %v4821_v27 = vmul.f32 %v4767_v57, %v4719_v44 }
 0x4e1   : > { %v4790_v28 = vadd.f32 %v4789_v1, %v4788_v15  ;;  %v4575_v6 = vpop.f32.mrf.mxu2  ;;  %v4343_v3 = vpop.f32.mrf.mxu0 }
 0x4e2   : > { %v4843_v16 = vsel %vm1244_vm2, %v4821_v27, 0.0  ;;  %v4603_v14 = vadd.f32 %v4575_v6, %v4486_v5  ;;  %v4692_v18 = vpop.f32.mrf.mxu3  ;;  %v4460_v49 = vpop.f32.mrf.mxu1  ;;  %v4370_v55 = vadd.f32 %v4343_v3, %v7291_v33  ;;  %v4753_v33 = vld [vmem:[%s7501_s2 + $0x1c8] sm:$0xff] }
 0x4e3   : > { %v4844_v42 = vadd.f32 %v4843_v16, %v4842_v46 }
 0x4e4   : > { %v4720_v59 = vadd.f32 %v4692_v18, %v4603_v14  ;;  %v4487_v22 = vadd.f32 %v4460_v49, %v4370_v55 }
 0x4e6   : > { %4736 = vst.msk [vmem:[%s6014_s23 + $0x1c0] sm:$0xff] %vm1244_vm2, %v4720_v59  ;;  %v4768_v23 = vmul.f32 %v4752_v43, %v4720_v59 }
 0x4e8   : > { %v4791_v10 = vsel %vm1244_vm2, %v4768_v23, 0.0  ;;  %v4822_v20 = vmul.f32 %v4768_v23, %v4720_v59 }
 0x4e9   : > { %v4792_v0 = vadd.f32 %v4791_v10, %v4790_v28  ;;  %v4577_v63 = vpop.f32.mrf.mxu2  ;;  %v4346_v30 = vpop.f32.mrf.mxu0 }
 0x4ea   : > { %v4845_v13 = vsel %vm1244_vm2, %v4822_v20, 0.0  ;;  %v4604_v61 = vadd.f32 %v4577_v63, %v4487_v22  ;;  %v4694_v58 = vpop.f32.mrf.mxu3  ;;  %v4463_v24 = vpop.f32.mrf.mxu1  ;;  %v4371_v37 = vadd.f32 %v4346_v30, %v7301_v32  ;;  %v4754_v32 = vld [vmem:[%s7501_s2 + $0x1d0] sm:$0xff] }
 0x4eb   : > { %v4846_v47 = vadd.f32 %v4845_v13, %v4844_v42 }
 0x4ec   : > { %v4721_v53 = vadd.f32 %v4694_v58, %v4604_v61  ;;  %v4488_v50 = vadd.f32 %v4463_v24, %v4371_v37 }
 0x4ee   : > { %4737 = vst.msk [vmem:[%s6014_s23 + $0x1c8] sm:$0xff] %vm1244_vm2, %v4721_v53  ;;  %v4769_v25 = vmul.f32 %v4753_v33, %v4721_v53 }
 0x4f0   : > { %v4793_v56 = vsel %vm1244_vm2, %v4769_v25, 0.0  ;;  %v4823_v52 = vmul.f32 %v4769_v25, %v4721_v53 }
 0x4f1   : > { %v4794_v60 = vadd.f32 %v4793_v56, %v4792_v0  ;;  %v4580_v34 = vpop.f32.mrf.mxu2  ;;  %v4348_v21 = vpop.f32.mrf.mxu0 }
 0x4f2   : > { %v4847_v40 = vsel %vm1244_vm2, %v4823_v52, 0.0  ;;  %v4605_v45 = vadd.f32 %v4580_v34, %v4488_v50  ;;  %v4697_v8 = vpop.f32.mrf.mxu3  ;;  %v4465_v9 = vpop.f32.mrf.mxu1  ;;  %v4372_v2 = vadd.f32 %v4348_v21, %v7310_v17  ;;  %v4755_v17 = vld [vmem:[%s7501_s2 + $0x1d8] sm:$0xff] }
 0x4f3   : > { %v4848_v4 = vadd.f32 %v4847_v40, %v4846_v47 }
 0x4f4   : > { %v4722_v39 = vadd.f32 %v4697_v8, %v4605_v45  ;;  %v4489_v54 = vadd.f32 %v4465_v9, %v4372_v2 }
 0x4f6   : > { %4738 = vst.msk [vmem:[%s6014_s23 + $0x1d0] sm:$0xff] %vm1244_vm2, %v4722_v39  ;;  %v4770_v29 = vmul.f32 %v4754_v32, %v4722_v39 }
 0x4f8   : > { %v4795_v15 = vsel %vm1244_vm2, %v4770_v29, 0.0  ;;  %v4824_v35 = vmul.f32 %v4770_v29, %v4722_v39 }
 0x4f9   : > { %v4796_v62 = vadd.f32 %v4795_v15, %v4794_v60  ;;  %v4582_v31 = vpop.f32.mrf.mxu2  ;;  %v4351_v41 = vpop.f32.mrf.mxu0 }
 0x4fa   : > { %v4849_v38 = vsel %vm1244_vm2, %v4824_v35, 0.0  ;;  %v4606_v46 = vadd.f32 %v4582_v31, %v4489_v54  ;;  %v4699_v19 = vpop.f32.mrf.mxu3  ;;  %v4468_v7 = vpop.f32.mrf.mxu1  ;;  %v4373_v1 = vadd.f32 %v4351_v41, %v7317_v36  ;;  %v4756_v36 = vld [vmem:[%s7501_s2 + $0x1e0] sm:$0xff] }
 0x4fb   : > { %v4850_v44 = vadd.f32 %v4849_v38, %v4848_v4 }
 0x4fc   : > { %v4723_v57 = vadd.f32 %v4699_v19, %v4606_v46  ;;  %v4490_v6 = vadd.f32 %v4468_v7, %v4373_v1 }
 0x4fe   : > { %4739 = vst.msk [vmem:[%s6014_s23 + $0x1d8] sm:$0xff] %vm1244_vm2, %v4723_v57  ;;  %v4771_v27 = vmul.f32 %v4755_v17, %v4723_v57 }
 0x500   : > { %v4797_v5 = vsel %vm1244_vm2, %v4771_v27, 0.0  ;;  %v4825_v28 = vmul.f32 %v4771_v27, %v4723_v57 }
 0x501   : > { %v4798_v16 = vadd.f32 %v4797_v5, %v4796_v62  ;;  %v4585_v14 = vpop.f32.mrf.mxu2  ;;  %v4353_v43 = vpop.f32.mrf.mxu0 }
 0x502   : > { %v4851_v18 = vsel %vm1244_vm2, %v4825_v28, 0.0  ;;  %v4607_v3 = vadd.f32 %v4585_v14, %v4490_v6  ;;  %v4702_v42 = vpop.f32.mrf.mxu3  ;;  %v4470_v59 = vpop.f32.mrf.mxu1  ;;  %v4374_v23 = vadd.f32 %v4353_v43, %v7326_v12  ;;  %v4757_v12 = vld [vmem:[%s7501_s2 + $0x1e8] sm:$0xff] }
 0x503   : > { %v4852_v49 = vadd.f32 %v4851_v18, %v4850_v44 }
 0x504   : > { %v4724_v55 = vadd.f32 %v4702_v42, %v4607_v3  ;;  %v4491_v0 = vadd.f32 %v4470_v59, %v4374_v23 }
 0x506   : > { %4740 = vst.msk [vmem:[%s6014_s23 + $0x1e0] sm:$0xff] %vm1244_vm2, %v4724_v55  ;;  %v4772_v10 = vmul.f32 %v4756_v36, %v4724_v55 }
 0x508   : > { %v4799_v20 = vsel %vm1244_vm2, %v4772_v10, 0.0  ;;  %v4826_v22 = vmul.f32 %v4772_v10, %v4724_v55 }
 0x509   : > { %v4800_v63 = vadd.f32 %v4799_v20, %v4798_v16  ;;  %v4587_v13 = vpop.f32.mrf.mxu2  ;;  %v4356_v47 = vpop.f32.mrf.mxu0 }
 0x50a   : > { %v4853_v61 = vsel %vm1244_vm2, %v4826_v22, 0.0  ;;  %v4608_v58 = vadd.f32 %v4587_v13, %v4491_v0  ;;  %v4704_v30 = vpop.f32.mrf.mxu3  ;;  %v4375_v53 = vadd.f32 %v4356_v47, %v7333_v51  ;;  %v4473_v37 = vpop.f32.mrf.mxu1  ;;  %v4758_v51 = vld [vmem:[%s7501_s2 + $0x1f0] sm:$0xff] }
 0x50b   : > { %v4854_v33 = vadd.f32 %v4853_v61, %v4852_v49 }
 0x50c   : > { %v4725_v24 = vadd.f32 %v4704_v30, %v4608_v58  ;;  %v4492_v50 = vadd.f32 %v4473_v37, %v4375_v53 }
 0x50e   : > { %4741 = vst.msk [vmem:[%s6014_s23 + $0x1e8] sm:$0xff] %vm1244_vm2, %v4725_v24  ;;  %v4773_v25 = vmul.f32 %v4757_v12, %v4725_v24 }
 0x510   : > { %v4801_v56 = vsel %vm1244_vm2, %v4773_v25, 0.0  ;;  %v4827_v52 = vmul.f32 %v4773_v25, %v4725_v24 }
 0x511   : > { %v4802_v60 = vadd.f32 %v4801_v56, %v4800_v63  ;;  %v4590_v34 = vpop.f32.mrf.mxu2  ;;  %v4358_v21 = vpop.f32.mrf.mxu0 }
 0x512   : > { %v4855_v40 = vsel %vm1244_vm2, %v4827_v52, 0.0  ;;  %v4609_v45 = vadd.f32 %v4590_v34, %v4492_v50  ;;  %v4707_v8 = vpop.f32.mrf.mxu3  ;;  %v4376_v9 = vadd.f32 %v4358_v21, %v7335_v26  ;;  %v4475_v2 = vpop.f32.mrf.mxu1  ;;  %v4759_v26 = vld [vmem:[%s7501_s2 + $0x1f8] sm:$0xff] }
 0x513   : > { %v4856_v4 = vadd.f32 %v4855_v40, %v4854_v33 }
 0x514   : > { %v4726_v32 = vadd.f32 %v4707_v8, %v4609_v45  ;;  %v4493_v35 = vadd.f32 %v4475_v2, %v4376_v9 }
 0x516   : > { %4742 = vst.msk [vmem:[%s6014_s23 + $0x1f0] sm:$0xff] %vm1244_vm2, %v4726_v32  ;;  %v4774_v39 = vmul.f32 %v4758_v51, %v4726_v32 }
 0x518   : > { %v4803_v29 = vsel %vm1244_vm2, %v4774_v39, 0.0  ;;  %v4828_v15 = vmul.f32 %v4774_v39, %v4726_v32 }
 0x519   : > { %v4804_v54 = vadd.f32 %v4803_v29, %v4802_v60  ;;  %v4592_v62 = vpop.f32.mrf.mxu2 }
 0x51a   : > { %v4857_v31 = vsel %vm1244_vm2, %v4828_v15, 0.0  ;;  %v4610_v38 = vadd.f32 %v4592_v62, %v4493_v35  ;;  %v4709_v19 = vpop.f32.mrf.mxu3 }
 0x51b   : > { %v4858_v46 = vadd.f32 %v4857_v31, %v4856_v4 }
 0x51c   : > { %v4727_v41 = vadd.f32 %v4709_v19, %v4610_v38 }
 0x51e   : > { %4743 = vst.msk [vmem:[%s6014_s23 + $0x1f8] sm:$0xff] %vm1244_vm2, %v4727_v41  ;;  %v4775_v44 = vmul.f32 %v4759_v26, %v4727_v41 }
 0x520   : > { %v4805_v17 = vsel %vm1244_vm2, %v4775_v44, 0.0  ;;  %v4829_v7 = vmul.f32 %v4775_v44, %v4727_v41 }
 0x521   : > { %v4806_v57 = vadd.f32 %v4805_v17, %v4804_v54 }
 0x522   : > { %v4859_v1 = vsel %vm1244_vm2, %v4829_v7, 0.0 }
 0x523   : > { %v4807_v27 = vrot.slane %v4806_v57, 4  ;;  %v4860_v5 = vadd.f32 %v4859_v1, %v4858_v46 }
 0x525   : > { %v4808_v28 = vadd.f32 %v4807_v27, %v4806_v57  ;;  %v4861_v6 = vrot.slane %v4860_v5, 4 }
 0x527   : > { %v4809_v16 = vrot.slane %v4808_v28, 2  ;;  %v4862_v14 = vadd.f32 %v4861_v6, %v4860_v5 }
 0x529   : > { %v4810_v18 = vadd.f32 %v4809_v16, %v4808_v28  ;;  %v4863_v3 = vrot.slane %v4862_v14, 2 }
 0x52b   : > { %v4811_v42 = vrot.slane %v4810_v18, 1  ;;  %v4864_v43 = vadd.f32 %v4863_v3, %v4862_v14 }
 0x52d   : > { %v4865_v49 = vrot.slane %v4864_v43, 1  ;;  %v4812_v36 = vadd.f32 %v4811_v42, %v4810_v18 }
 0x52f   : > { %v4813_v59 = vadd.f32 %v4812_v36, %v7231_v48  ;;  %v4866_v55 = vadd.f32 %v4865_v49, %v4864_v43 }
 0x531   : > { %v4867_v23 = vadd.f32 %v4866_v55, %v7240_v11  ;;  %4869 = vst.msk [vmem:[%s199_s14] sm:$0x1] %vm4868_vm3, %v4813_v59 }
 0x533   : > { %4870 = vst.msk [vmem:[%s199_s14 + $0x1] sm:$0x1] %vm4868_vm3, %v4867_v23 }
 0x534   : > { %5378 = shalt.err (!%p5375_p4)
}
 0x535   : > { %5312 = dma.vmem_to_hbm [thread:$0]  (%p5478_p5), %s4894_s20, 32, %s4896_s22, %s4877_s19  }
 0x536 PF: > { %p5318_p7 = scmp.ge.s32.totalorder %s5413_s18, 2  ;;  %s4915_s9 = sand.u32 1, %s5401_s15  }
 0x537   : > { %s4916_s30 = scalar_lea.sflag [#allocation3], %s4915_s9 }
 0x538   : > { %p5315_p8 = pnand %p5318_p7, %p5482_p6 }
 0x53a   : > { %p5316_p9 = pneg %p5315_p8 }
 0x53c   : > { %5396 = dma.done.wait (%p5316_p9), %s4916_s30, 32  }
 0x53d   : > { %5398 = vsyncadd (%p5316_p9), %s4916_s30, 4294967264  ;;  %p15_p10 = scmp.ge.s32.totalorder %s5465_s21, 4   ;;  %s7506_s15 = smov %s5405_s16 }
 0x53e   : > { %s7507_s16 = smov %s5409_s17  ;;  %s7508_s17 = smov %s5476_s24 }
 0x53f   : > { %s7509_s18 = smov %s5465_s21  ;;  %17 = sbr.rel (!%p15_p10) target bundleno = 3 (0x3), region = 87 }
 0x544   :  { %4922 = vsyncpa [#allocation3], 1 }
 0x545   :  { %4924 = vsyncpa [#allocation3 + $0x1], 1 }

</bundles_post_ra>
